<compile_context>
chip_gen: v5e
topology: v5e:2x2
jax: 0.10.0
libtpu: 0.0.40
codegen_flags: <defaults>
</compile_context>

<pallas_src>
import jax
import jax.numpy as jnp
from jax.experimental import pallas as pl
from jax.experimental.pallas import tpu as pltpu

NB_FEATURES = 2048   # fixed by fc1 = nn.Linear(2048, 1)
TOPK = 100           # fixed by forward() / classifier = nn.Linear(200, 1)


# ---------------------------------------------------------------------------
# Kernel: per-instance score  s[r] = sum_f x[r, f] * w1[f] + b1
#   VPU elementwise multiply + XLU lane reduce (exact f32, no MXU).
# ---------------------------------------------------------------------------
def _fc1_kernel(x_ref, w_ref, b_ref, out_ref):
    # x_ref: (TR, F) VMEM   w_ref: (1, F) VMEM   b_ref: (1, 1) SMEM
    # out_ref: (1, TR) VMEM  (lane-dense row of scores)
    prod = x_ref[...] * w_ref[...]            # (TR, F)  VPU, w broadcasts over rows
    s = jnp.sum(prod, axis=-1)                # (TR,)    XLU lane reduction, f32 exact
    out_ref[...] = (s + b_ref[0, 0])[None, :]  # unmasked full-vreg stores


def fc1_scores(x, w1, b1, *, max_row_tile=512):
    """scores[b, n] = x[b, n, :] . w1 + b1.

    Rows (B*N) are tiled; each x block is (TR, 2048) f32 <= 4 MiB (8 MiB
    double-buffered), safe under the scoped-VMEM default on all TPU
    generations.  On v6e/v7x max_row_tile=1024 is also fine (32 MiB scoped
    default); keep 512 on v5e (16 MiB).
    """
    B, N, F = x.shape
    R = B * N
    x2 = x.reshape(R, F)
    w_row = w1.reshape(1, F)                  # lane-dense weight (64 KiB in VMEM)

    if R <= max_row_tile:
        tr = R                                # single block == full array extent
    else:
        tr = max_row_tile                     # multiple of 128; last tile may be ragged
    grid = pl.cdiv(R, tr)
    r_out = grid * tr                         # output padded to whole tiles (lane-dense)

    out = pl.pallas_call(
        _fc1_kernel,
        out_shape=jax.ShapeDtypeStruct((1, r_out), jnp.float32),
        grid=(grid,),
        in_specs=[
            pl.BlockSpec((tr, F), lambda r: (r, 0)),                 # x row tile
            pl.BlockSpec((1, F), lambda r: (0, 0)),                  # weight row
            pl.BlockSpec(memory_space=pltpu.MemorySpace.SMEM),       # scalar bias
        ],
        out_specs=pl.BlockSpec((1, tr), lambda r: (0, r)),           # lane-dense scores
        compiler_params=pltpu.CompilerParams(
            dimension_semantics=("parallel",),   # independent row tiles (2-TC shard on v7x)
        ),
    )(x2, w_row, b1)
    # Lanes >= R (ragged tail, if any) hold unspecified values; slice them off
    # before top-k so they can never enter the selection.
    return out[0, :R].reshape(B, N)


# ---------------------------------------------------------------------------
# Forward pass (top-k selection, concat and the 200->1 classifier stay in
# plain JAX: they are a few hundred FLOPs and XLA fuses them).
# ---------------------------------------------------------------------------
def chowder_forward(x, w1, b1, w2, b2):
    scores = fc1_scores(x, w1, b1)                       # (B, N)
    # TODO(synk): torch.topk (sort/selection) has no Pallas TPU primitive;
    # done with lax.top_k. For very large N a two-stage (per-tile) top-k
    # would cut this cost, unnecessary at these sizes.
    y1 = jax.lax.top_k(scores, TOPK)[0]                  # top-100, descending
    y2 = -jax.lax.top_k(-scores, TOPK)[0]                # bottom-100, ascending
    y = jnp.concatenate([y1, y2], axis=1)                # (B, 200)
    logit = y @ w2[0] + b2[0, 0]                         # (B,)
    Y_prob = jax.nn.sigmoid(logit)[:, None]              # (B, 1)
    Y_hat = (Y_prob >= 0.5).astype(jnp.float32)          # (B, 1)
    return Y_prob, Y_hat


def chowder_reference(x, w1, b1, w2, b2):
    s = jnp.einsum("bnf,f->bn", x, w1[0]) + b1[0, 0]
    y1 = jax.lax.top_k(s, TOPK)[0]
    y2 = -jax.lax.top_k(-s, TOPK)[0]
    y = jnp.concatenate([y1, y2], axis=1)
    logit = y @ w2[0] + b2[0, 0]
    p = jax.nn.sigmoid(logit)[:, None]
    return p, (p >= 0.5).astype(jnp.float32)


if __name__ == "__main__":
    B, N, F = 2, 128, NB_FEATURES   # N must be >= 100 for the top-k

    key = jax.random.PRNGKey(0)
    k1, k2, k3, k4, kx = jax.random.split(key, 5)
    # Deterministic synthetic parameters (shapes from Chowder.__init__).
    w1 = jax.random.normal(k1, (1, F), jnp.float32) * 0.02        # fc1.weight (1, 2048)
    b1 = jax.random.normal(k2, (1, 1), jnp.float32) * 0.02        # fc1.bias
    w2 = jax.random.normal(k3, (1, 2 * TOPK), jnp.float32) * 0.1  # classifier weight (1, 200)
    b2 = jax.random.normal(k4, (1, 1), jnp.float32) * 0.1         # classifier bias

    x = jax.random.normal(kx, (B, N, F), jnp.float32)

    fwd = jax.jit(chowder_forward)
    Y_prob, Y_hat = fwd(x, w1, b1, w2, b2)
    jax.block_until_ready((Y_prob, Y_hat))

    ref_prob, ref_hat = chowder_reference(x, w1, b1, w2, b2)
    assert Y_prob.shape == (B, 1) and Y_hat.shape == (B, 1)
    assert jnp.allclose(Y_prob, ref_prob, atol=1e-5, rtol=1e-5)
    assert jnp.array_equal(Y_hat, ref_hat)

    print("KERNEL_OK")
</pallas_src>

<mosaic_0001>
module attributes {stable_mosaic.version = 11 : i64} {
  func.func @_fc1_kernel(%arg0: i32, %arg1: memref<256x2048xf32, #tpu.memory_space<vmem>>, %arg2: memref<1x2048xf32, #tpu.memory_space<vmem>>, %arg3: memref<1x1xf32, #tpu.memory_space<smem>>, %arg4: memref<1x256xf32, #tpu.memory_space<vmem>>) attributes {dimension_semantics = [#tpu.dimension_semantics<parallel>], iteration_bounds = array<i64: 1>, scalar_prefetch = 0 : i64, scratch_operands = 0 : i64, tpu.core_type = #tpu.core_type<tc>, window_params = [{transform_indices = @transform_0, window_bounds = array<i64: 256, 2048>}, {pipeline_mode = #tpu.pipeline_mode<synchronous>, transform_indices = @transform_1, window_bounds = array<i64: 1, 2048>}, {transform_indices = @transform_2, window_bounds = array<i64: 1, 1>}, {transform_indices = @transform_3, window_bounds = array<i64: 1, 256>}]} {
    %c0 = arith.constant 0 : index
    %c0_0 = arith.constant 0 : index
    %0 = vector.load %arg1[%c0, %c0_0] : memref<256x2048xf32, #tpu.memory_space<vmem>>, vector<256x2048xf32>
    %c0_1 = arith.constant 0 : index
    %c0_2 = arith.constant 0 : index
    %1 = vector.load %arg2[%c0_1, %c0_2] : memref<1x2048xf32, #tpu.memory_space<vmem>>, vector<1x2048xf32>
    %2 = vector.broadcast %1 : vector<1x2048xf32> to vector<256x2048xf32>
    %3 = arith.mulf %0, %2 : vector<256x2048xf32>
    %cst = arith.constant dense<0.000000e+00> : vector<256xf32>
    %4 = vector.multi_reduction <add>, %3, %cst [1] : vector<256x2048xf32> to vector<256xf32>
    %c0_3 = arith.constant 0 : index
    %c0_4 = arith.constant 0 : index
    %5 = memref.load %arg3[%c0_3, %c0_4] : memref<1x1xf32, #tpu.memory_space<smem>>
    %6 = vector.broadcast %5 : f32 to vector<256xf32>
    %7 = arith.addf %4, %6 : vector<256xf32>
    %8 = vector.shape_cast %7 : vector<256xf32> to vector<1x256xf32>
    %c0_5 = arith.constant 0 : index
    %c0_6 = arith.constant 0 : index
    %9 = vector.load %arg4[%c0_5, %c0_6] : memref<1x256xf32, #tpu.memory_space<vmem>>, vector<1x256xf32>
    tpu.vector_store %arg4[%c0_5, %c0_6], %8 {strides = array<i32>} : memref<1x256xf32, #tpu.memory_space<vmem>>, vector<1x256xf32>,
    return
  }
  func.func @transform_0(%arg0: i32) -> (i32, i32) {
    %c0_i32 = arith.constant 0 : i32
    %c0_i32_0 = arith.constant 0 : i32
    return %arg0, %c0_i32 : i32, i32
  }
  func.func @transform_1(%arg0: i32) -> (i32, i32) {
    %c0_i32 = arith.constant 0 : i32
    %c0_i32_0 = arith.constant 0 : i32
    %c0_i32_1 = arith.constant 0 : i32
    return %c0_i32, %c0_i32_0 : i32, i32
  }
  func.func @transform_2(%arg0: i32) -> (i32, i32) {
    %c0_i32 = arith.constant 0 : i32
    %c0_i32_0 = arith.constant 0 : i32
    %c0_i32_1 = arith.constant 0 : i32
    return %c0_i32, %c0_i32_0 : i32, i32
  }
  func.func @transform_3(%arg0: i32) -> (i32, i32) {
    %c0_i32 = arith.constant 0 : i32
    %c0_i32_0 = arith.constant 0 : i32
    return %c0_i32, %arg0 : i32, i32
  }
}

</mosaic_0001>

<bundles_post_ra>
// kernel: neg.3
= control target key start
LH: loop header
LB: loop body
LE: loop exit
PB: predicated region body
PF: predicated region fallthrough
CT: control target
= control target key end

     0   :  { %s24_s0 = inlined_call_operand.vmem [shape: f32[2,128], index: 0, kind: input, shape index: {}]   ;;  %s25_s1 = inlined_call_operand.vmem [shape: f32[2,128], index: 1, kind: output, shape index: {}]  }
   0x1   :  { %v2_v0 = vld [vmem:[%s24_s0] sm:$0x3] }
   0x2   :  { %v5_v1 = vxor.u32 2147483648, %v2_v0 }
   0x4   :  { %7 = vst [vmem:[%s25_s1] sm:$0x3] %v5_v1 }

// kernel: chowder_forward.1
= control target key start
LH: loop header
LB: loop body
LE: loop exit
PB: predicated region body
PF: predicated region fallthrough
CT: control target
= control target key end

     0   :  { %9 = vsyncpa [#allocation4], 0  ;;  %s3688_s0 = inlined_call_operand.hbm [shape: f32[256,2048], index: 0, kind: input, shape index: {}]   ;;  %s3689_s1 = inlined_call_operand.hbm [shape: f32[1,2048], index: 1, kind: input, shape index: {}]   ;;  %s3690_s2 = inlined_call_operand.<no memory space> [shape: f32[1,1], index: 2, kind: input, shape index: {}]   ;;  %s3691_s3 = inlined_call_operand.vmem [shape: f32[1,256], index: 3, kind: output, shape index: {}]  }
   0x1   :  { %s15_s14 = sshll.u32 %s3688_s0, 4  ;;  %s16_s14 = int_to_ptr.hbm [resolvable:$true] %s15_s14 }
   0x2   :  { %10 = vsyncpa [#allocation6], 0  ;;  %s2531_s15 = smov [#allocation3]   ;;  %s29_s19 = sshll.u32 %s3689_s1, 4  ;;  %s30_s19 = int_to_ptr.hbm [resolvable:$true] %s29_s19 }
   0x3   :  { %s17_s16 = sshll.u32 %s2531_s15, 4  ;;  %s2532_s20 = smov 2048   ;;  %s18_s16 = int_to_ptr.vmem [resolvable:$true] %s17_s16 }
   0x4   :  { %s2533_s21 = smov 128   ;;  %s2534_s22 = smov [#allocation5]  }
   0x5   :  { %23 = dma.hbm_to_vmem [thread:$0]  %s16_s14, 65536, %s18_s16, [#allocation4], %s2532_s20, %s2532_s20, %s2533_s21  }
   0x6   :  { %s31_s23 = sshll.u32 %s2534_s22, 4  ;;  %s32_s23 = int_to_ptr.vmem [resolvable:$true] %s31_s23 }
   0x7   :  { %34 = dma.hbm_to_vmem [thread:$0]  %s30_s19, 256, %s32_s23, [#allocation6]  }
   0x8   :  { %2527 = dma.done.wait [#allocation4], 65536  }
   0x9   :  { %2528 = vsyncadd [#allocation4], 4294901760 }
   0xa   :  { %2529 = dma.done.wait [#allocation6], 256  }
   0xb   :  { %2530 = vsyncadd [#allocation6], 4294967040  ;;  %v557_v0 = vld [vmem:[#allocation5] sm:$0xff]  ;;  %v46_v4 = vld [vmem:[#allocation3 + $0x8] sm:$0xff]  ;;  %vm2367_vm0 = vcmask 130112   ;;  %vm2371_vm1 = vcmask 195712  }
   0xc   :  { %v2562_v1 = vperm.slane %v557_v0, 0  ;;  %v2564_v2 = vperm.slane %v557_v0, 1  ;;  %v45_v3 = vld [vmem:[#allocation3] sm:$0xff]  ;;  %v2566_v5 = vperm.slane %v557_v0, 2  ;;  %v47_v6 = vld [vmem:[#allocation3 + $0x10] sm:$0xff]  ;;  %v558_v7 = vld [vmem:[#allocation5 + $0x8] sm:$0xff] }
   0xd   :  { %v2568_v8 = vperm.slane %v557_v0, 3  ;;  %v48_v11 = vld [vmem:[#allocation3 + $0x18] sm:$0xff]  ;;  %v61_v12 = vld [vmem:[#allocation3 + $0x80] sm:$0xff]  ;;  %v62_v13 = vld [vmem:[#allocation3 + $0x88] sm:$0xff]  ;;  %v2572_v15 = vperm.slane %v557_v0, 4  ;;  %v2574_v16 = vperm.slane %v557_v0, 5 }
   0xe   :  { %v593_v9 = vmul.f32 %v2562_v1, %v45_v3  ;;  %v594_v10 = vmul.f32 %v2564_v2, %v46_v4  ;;  %v49_v14 = vld [vmem:[#allocation3 + $0x20] sm:$0xff]  ;;  %v595_v17 = vmul.f32 %v2566_v5, %v47_v6  ;;  %v50_v18 = vld [vmem:[#allocation3 + $0x28] sm:$0xff]  ;;  %v2577_v19 = vperm.slane %v557_v0, 6  ;;  %v63_v23 = vld [vmem:[#allocation3 + $0x90] sm:$0xff] }
   0xf   :  { %v2579_v20 = vperm.slane %v557_v0, 7  ;;  %v2581_v21 = vperm.slane %v558_v7, 0  ;;  %v2583_v22 = vperm.slane %v558_v7, 1  ;;  %v51_v24 = vld [vmem:[#allocation3 + $0x30] sm:$0xff]  ;;  %v52_v25 = vld [vmem:[#allocation3 + $0x38] sm:$0xff]  ;;  %v53_v26 = vld [vmem:[#allocation3 + $0x40] sm:$0xff]  ;;  %v596_v27 = vmul.f32 %v2568_v8, %v48_v11 }
  0x10   :  { %v1105_v28 = vadd.f32 %v594_v10, %v593_v9  ;;  %v609_v29 = vmul.f32 %v2562_v1, %v61_v12  ;;  %v610_v30 = vmul.f32 %v2564_v2, %v62_v13  ;;  %v54_v31 = vld [vmem:[#allocation3 + $0x48] sm:$0xff]  ;;  %v2588_v32 = vperm.slane %v558_v7, 2  ;;  %v64_v36 = vld [vmem:[#allocation3 + $0x98] sm:$0xff]  ;;  %v55_v37 = vld [vmem:[#allocation3 + $0x50] sm:$0xff] }
  0x11   :  { %v2590_v33 = vperm.slane %v558_v7, 3  ;;  %v2592_v34 = vperm.slane %v558_v7, 4  ;;  %v2594_v35 = vperm.slane %v558_v7, 5  ;;  %v56_v38 = vld [vmem:[#allocation3 + $0x58] sm:$0xff]  ;;  %v2596_v39 = vperm.slane %v558_v7, 6  ;;  %v65_v42 = vld [vmem:[#allocation3 + $0xa0] sm:$0xff] }
  0x12   :  { %v597_v40 = vmul.f32 %v2572_v15, %v49_v14  ;;  %v1106_v41 = vadd.f32 %v1105_v28, %v595_v17  ;;  %v611_v43 = vmul.f32 %v2566_v5, %v63_v23  ;;  %v57_v44 = vld [vmem:[#allocation3 + $0x60] sm:$0xff]  ;;  %v2600_v45 = vperm.slane %v558_v7, 7  ;;  %v78_v50 = vld [vmem:[#allocation3 + $0x108] sm:$0xff]  ;;  %v59_v52 = vld [vmem:[#allocation3 + $0x70] sm:$0xff] }
  0x13   :  { %v598_v46 = vmul.f32 %v2574_v16, %v50_v18  ;;  %v599_v47 = vmul.f32 %v2577_v19, %v51_v24  ;;  %v600_v48 = vmul.f32 %v2579_v20, %v52_v25  ;;  %v77_v49 = vld [vmem:[#allocation3 + $0x100] sm:$0xff]  ;;  %v58_v51 = vld [vmem:[#allocation3 + $0x68] sm:$0xff]  ;;  %v60_v53 = vld [vmem:[#allocation3 + $0x78] sm:$0xff]  ;;  %v601_v54 = vmul.f32 %v2581_v21, %v53_v26 }
  0x14   :  { %v1107_v55 = vadd.f32 %v1106_v41, %v596_v27  ;;  %v612_v56 = vmul.f32 %v2568_v8, %v64_v36  ;;  %v1122_v57 = vadd.f32 %v610_v30, %v609_v29  ;;  %v2608_v58 = vmul.f32 %v2583_v22, %v54_v31  ;;  %v66_v61 = vld [vmem:[#allocation3 + $0xa8] sm:$0xff]  ;;  %v67_v62 = vld [vmem:[#allocation3 + $0xb0] sm:$0xff]  ;;  %v68_v4 = vld [vmem:[#allocation3 + $0xb8] sm:$0xff] }
  0x15   :  { %v2611_v59 = vmul.f32 %v2588_v32, %v55_v37  ;;  %v2614_v60 = vmul.f32 %v2590_v33, %v56_v38  ;;  %v613_v63 = vmul.f32 %v2572_v15, %v65_v42  ;;  %v79_v0 = vld [vmem:[#allocation3 + $0x110] sm:$0xff]  ;;  %v69_v6 = vld [vmem:[#allocation3 + $0xc0] sm:$0xff]  ;;  %v70_v7 = vld [vmem:[#allocation3 + $0xc8] sm:$0xff]  ;;  %v625_v10 = vmul.f32 %v2562_v1, %v77_v49 }
  0x16   :  { %v1108_v3 = vadd.f32 %v1107_v55, %v597_v40  ;;  %v1123_v9 = vadd.f32 %v1122_v57, %v611_v43  ;;  %v626_v11 = vmul.f32 %v2564_v2, %v78_v50  ;;  %v2620_v12 = vmul.f32 %v2592_v34, %v57_v44  ;;  %v71_v18 = vld [vmem:[#allocation3 + $0xd0] sm:$0xff]  ;;  %v80_v23 = vld [vmem:[#allocation3 + $0x118] sm:$0xff]  ;;  %v73_v26 = vld [vmem:[#allocation3 + $0xe0] sm:$0xff] }
  0x17   :  { %v2623_v13 = vmul.f32 %v2594_v35, %v58_v51  ;;  %v2626_v14 = vmul.f32 %v2596_v39, %v59_v52  ;;  %v2629_v17 = vmul.f32 %v2600_v45, %v60_v53  ;;  %v72_v25 = vld [vmem:[#allocation3 + $0xd8] sm:$0xff]  ;;  %v74_v27 = vld [vmem:[#allocation3 + $0xe8] sm:$0xff]  ;;  %v614_v28 = vmul.f32 %v2574_v16, %v66_v61  ;;  %v75_v31 = vld [vmem:[#allocation3 + $0xf0] sm:$0xff] }
  0x18   :  { %v1109_v24 = vadd.f32 %v1108_v3, %v598_v46  ;;  %v1124_v29 = vadd.f32 %v1123_v9, %v612_v56  ;;  %v627_v30 = vmul.f32 %v2566_v5, %v79_v0  ;;  %v615_v36 = vmul.f32 %v2577_v19, %v67_v62  ;;  %v81_v41 = vld [vmem:[#allocation3 + $0x120] sm:$0xff]  ;;  %v76_v43 = vld [vmem:[#allocation3 + $0xf8] sm:$0xff]  ;;  %v110_v51 = vld [vmem:[#allocation3 + $0x208] sm:$0xff] }
  0x19   :  { %v616_v37 = vmul.f32 %v2579_v20, %v68_v4  ;;  %v617_v38 = vmul.f32 %v2581_v21, %v69_v6  ;;  %v2637_v40 = vmul.f32 %v2583_v22, %v70_v7  ;;  %v628_v46 = vmul.f32 %v2568_v8, %v80_v23  ;;  %v109_v50 = vld [vmem:[#allocation3 + $0x200] sm:$0xff]  ;;  %v83_v57 = vld [vmem:[#allocation3 + $0x130] sm:$0xff] }
  0x1a   :  { %v1110_v42 = vadd.f32 %v1109_v24, %v599_v47  ;;  %v1125_v44 = vadd.f32 %v1124_v29, %v613_v63  ;;  %v1139_v49 = vadd.f32 %v626_v11, %v625_v10  ;;  %v2641_v52 = vmul.f32 %v2588_v32, %v71_v18  ;;  %v82_v47 = vld [vmem:[#allocation3 + $0x128] sm:$0xff]  ;;  %v84_v63 = vld [vmem:[#allocation3 + $0x138] sm:$0xff]  ;;  %v85_v0 = vld [vmem:[#allocation3 + $0x140] sm:$0xff] }
  0x1b   :  { %v2644_v53 = vmul.f32 %v2590_v33, %v72_v25  ;;  %v2647_v55 = vmul.f32 %v2592_v34, %v73_v26  ;;  %v2650_v56 = vmul.f32 %v2594_v35, %v74_v27  ;;  %v629_v3 = vmul.f32 %v2572_v15, %v81_v41  ;;  %v111_v6 = vld [vmem:[#allocation3 + $0x210] sm:$0xff]  ;;  %v86_v10 = vld [vmem:[#allocation3 + $0x148] sm:$0xff]  ;;  %v88_v25 = vld [vmem:[#allocation3 + $0x158] sm:$0xff] }
  0x1c   :  { %v1111_v61 = vadd.f32 %v1110_v42, %v600_v48  ;;  %v1126_v62 = vadd.f32 %v1125_v44, %v614_v28  ;;  %v1140_v4 = vadd.f32 %v1139_v49, %v627_v30  ;;  %v2654_v7 = vmul.f32 %v2596_v39, %v75_v31  ;;  %v87_v24 = vld [vmem:[#allocation3 + $0x150] sm:$0xff]  ;;  %v112_v28 = vld [vmem:[#allocation3 + $0x218] sm:$0xff]  ;;  %v89_v29 = vld [vmem:[#allocation3 + $0x160] sm:$0xff] }
  0x1d   :  { %v2657_v9 = vmul.f32 %v2600_v45, %v76_v43  ;;  %v657_v11 = vmul.f32 %v2562_v1, %v109_v50  ;;  %v658_v18 = vmul.f32 %v2564_v2, %v110_v51  ;;  %v630_v26 = vmul.f32 %v2574_v16, %v82_v47  ;;  %v113_v51 = vld [vmem:[#allocation3 + $0x220] sm:$0xff] }
  0x1e   :  { %v1112_v23 = vadd.f32 %v1111_v61, %v601_v54  ;;  %v1127_v48 = vadd.f32 %v1126_v62, %v615_v36  ;;  %v1141_v27 = vadd.f32 %v1140_v4, %v628_v46  ;;  %v631_v30 = vmul.f32 %v2577_v19, %v83_v57  ;;  %v90_v54 = vld [vmem:[#allocation3 + $0x168] sm:$0xff]  ;;  %v91_v36 = vld [vmem:[#allocation3 + $0x170] sm:$0xff]  ;;  %v92_v46 = vld [vmem:[#allocation3 + $0x178] sm:$0xff] }
  0x1f   :  { %v632_v31 = vmul.f32 %v2579_v20, %v84_v63  ;;  %v633_v41 = vmul.f32 %v2581_v21, %v85_v0  ;;  %v659_v42 = vmul.f32 %v2566_v5, %v111_v6  ;;  %v634_v49 = vmul.f32 %v2583_v22, %v86_v10  ;;  %v114_v4 = vld [vmem:[#allocation3 + $0x228] sm:$0xff] }
  0x20   :  { %v1113_v43 = vadd.f32 %v1112_v23, %v2608_v58  ;;  %v1128_v44 = vadd.f32 %v1127_v48, %v616_v37  ;;  %v1142_v50 = vadd.f32 %v1141_v27, %v629_v3  ;;  %v2669_v47 = vmul.f32 %v2588_v32, %v87_v24  ;;  %v93_v3 = vld [vmem:[#allocation3 + $0x180] sm:$0xff]  ;;  %v94_v6 = vld [vmem:[#allocation3 + $0x188] sm:$0xff]  ;;  %v115_v48 = vld [vmem:[#allocation3 + $0x230] sm:$0xff] }
  0x21   :  { %v2672_v57 = vmul.f32 %v2590_v33, %v88_v25  ;;  %v660_v61 = vmul.f32 %v2568_v8, %v112_v28  ;;  %v1173_v62 = vadd.f32 %v658_v18, %v657_v11  ;;  %v2677_v37 = vmul.f32 %v2592_v34, %v89_v29  ;;  %v117_v27 = vld [vmem:[#allocation3 + $0x240] sm:$0xff]  ;;  %v95_v28 = vld [vmem:[#allocation3 + $0x190] sm:$0xff]  ;;  %v118_v29 = vld [vmem:[#allocation3 + $0x248] sm:$0xff] }
  0x22   :  { %v1114_v63 = vadd.f32 %v1113_v43, %v2611_v59  ;;  %v1129_v58 = vadd.f32 %v1128_v44, %v617_v38  ;;  %v1143_v0 = vadd.f32 %v1142_v50, %v630_v26  ;;  %v2680_v10 = vmul.f32 %v2594_v35, %v90_v54  ;;  %v116_v26 = vld [vmem:[#allocation3 + $0x238] sm:$0xff]  ;;  %v119_v50 = vld [vmem:[#allocation3 + $0x250] sm:$0xff] }
  0x23   :  { %v2683_v23 = vmul.f32 %v2596_v39, %v91_v36  ;;  %v661_v24 = vmul.f32 %v2572_v15, %v113_v51  ;;  %v1174_v11 = vadd.f32 %v1173_v62, %v659_v42  ;;  %v2689_v18 = vmul.f32 %v2600_v45, %v92_v46  ;;  %v120_v46 = vld [vmem:[#allocation3 + $0x258] sm:$0xff] }
  0x24   :  { %v1115_v59 = vadd.f32 %v1114_v63, %v2614_v60  ;;  %v1130_v38 = vadd.f32 %v1129_v58, %v2637_v40  ;;  %v1144_v25 = vadd.f32 %v1143_v0, %v631_v30  ;;  %v662_v43 = vmul.f32 %v2574_v16, %v114_v4  ;;  %v96_v30 = vld [vmem:[#allocation3 + $0x198] sm:$0xff] }
  0x25   :  { %v1175_v44 = vadd.f32 %v1174_v11, %v660_v61  ;;  %v641_v54 = vmul.f32 %v2562_v1, %v93_v3  ;;  %v642_v36 = vmul.f32 %v2564_v2, %v94_v6  ;;  %v663_v51 = vmul.f32 %v2577_v19, %v115_v48  ;;  %v121_v3 = vld [vmem:[#allocation3 + $0x260] sm:$0xff]  ;;  %v122_v6 = vld [vmem:[#allocation3 + $0x268] sm:$0xff] }
  0x26   :  { %v1116_v42 = vadd.f32 %v1115_v59, %v2620_v12  ;;  %v1131_v60 = vadd.f32 %v1130_v38, %v2641_v52  ;;  %v1145_v40 = vadd.f32 %v1144_v25, %v632_v31  ;;  %v664_v62 = vmul.f32 %v2579_v20, %v116_v26  ;;  %v97_v31 = vld [vmem:[#allocation3 + $0x1a0] sm:$0xff] }
  0x27   :  { %v665_v63 = vmul.f32 %v2581_v21, %v117_v27  ;;  %v1176_v58 = vadd.f32 %v1175_v44, %v661_v24  ;;  %v643_v61 = vmul.f32 %v2566_v5, %v95_v28  ;;  %v666_v52 = vmul.f32 %v2583_v22, %v118_v29  ;;  %v125_v44 = vld [vmem:[#allocation3 + $0x280] sm:$0xff] }
  0x28   :  { %v1117_v0 = vadd.f32 %v1116_v42, %v2623_v13  ;;  %v1132_v4 = vadd.f32 %v1131_v60, %v2644_v53  ;;  %v1146_v12 = vadd.f32 %v1145_v40, %v633_v41  ;;  %v667_v48 = vmul.f32 %v2588_v32, %v119_v50  ;;  %v123_v13 = vld [vmem:[#allocation3 + $0x270] sm:$0xff]  ;;  %v98_v41 = vld [vmem:[#allocation3 + $0x1a8] sm:$0xff] }
  0x29   :  { %v1177_v11 = vadd.f32 %v1176_v58, %v662_v43  ;;  %v644_v59 = vmul.f32 %v2568_v8, %v96_v30  ;;  %v1156_v38 = vadd.f32 %v642_v36, %v641_v54  ;;  %v2708_v53 = vmul.f32 %v2590_v33, %v120_v46  ;;  %v126_v42 = vld [vmem:[#allocation3 + $0x288] sm:$0xff]  ;;  %v99_v60 = vld [vmem:[#allocation3 + $0x1b0] sm:$0xff]  ;;  %v101_v30 = vld [vmem:[#allocation3 + $0x1c0] sm:$0xff] }
  0x2a   :  { %v1118_v24 = vadd.f32 %v1117_v0, %v2626_v14  ;;  %v1133_v25 = vadd.f32 %v1132_v4, %v2647_v55  ;;  %v1147_v26 = vadd.f32 %v1146_v12, %v634_v49  ;;  %v2711_v27 = vmul.f32 %v2592_v34, %v121_v3  ;;  %v124_v49 = vld [vmem:[#allocation3 + $0x278] sm:$0xff]  ;;  %v103_v0 = vld [vmem:[#allocation3 + $0x1d0] sm:$0xff] }
  0x2b   :  { %v1178_v28 = vadd.f32 %v1177_v11, %v663_v51  ;;  %v645_v29 = vmul.f32 %v2572_v15, %v97_v31  ;;  %v1157_v43 = vadd.f32 %v1156_v38, %v643_v61  ;;  %v2718_v36 = vmul.f32 %v2594_v35, %v122_v6  ;;  %v100_v51 = vld [vmem:[#allocation3 + $0x1b8] sm:$0xff]  ;;  %v127_v61 = vld [vmem:[#allocation3 + $0x290] sm:$0xff] }
  0x2c   :  { %v1119_v54 = vadd.f32 %v1118_v24, %v2629_v17  ;;  %v1134_v14 = vadd.f32 %v1133_v25, %v2650_v56  ;;  %v1148_v55 = vadd.f32 %v1147_v26, %v2669_v47  ;;  %v2721_v40 = vmul.f32 %v2596_v39, %v123_v13  ;;  %v102_v47 = vld [vmem:[#allocation3 + $0x1c8] sm:$0xff]  ;;  %v128_v11 = vld [vmem:[#allocation3 + $0x298] sm:$0xff] }
  0x2d   :  { %v1179_v50 = vadd.f32 %v1178_v28, %v664_v62  ;;  %v646_v46 = vmul.f32 %v2574_v16, %v98_v41  ;;  %v1158_v58 = vadd.f32 %v1157_v43, %v644_v59  ;;  %v673_v4 = vmul.f32 %v2562_v1, %v125_v44  ;;  %v104_v38 = vld [vmem:[#allocation3 + $0x1d8] sm:$0xff]  ;;  %v106_v13 = vld [vmem:[#allocation3 + $0x1e8] sm:$0xff]  ;;  %v129_v43 = vld [vmem:[#allocation3 + $0x2a0] sm:$0xff] }
  0x2e   :  { %1120 = vadd.xlane.f32.xlu0 %v1119_v54  ;;  %v1135_v17 = vadd.f32 %v1134_v14, %v2654_v7  ;;  %v1149_v56 = vadd.f32 %v1148_v55, %v2672_v57  ;;  %v674_v12 = vmul.f32 %v2564_v2, %v126_v42  ;;  %v2729_v3 = vmul.f32 %v2600_v45, %v124_v49  ;;  %v105_v7 = vld [vmem:[#allocation3 + $0x1e0] sm:$0xff]  ;;  %v174_v14 = vld [vmem:[#allocation3 + $0x408] sm:$0xff]  ;;  %v107_v49 = vld [vmem:[#allocation3 + $0x1f0] sm:$0xff] }
  0x2f   :  { %v1180_v62 = vadd.f32 %v1179_v50, %v665_v63  ;;  %v647_v31 = vmul.f32 %v2577_v19, %v99_v60  ;;  %v1159_v6 = vadd.f32 %v1158_v58, %v645_v29  ;;  %v648_v57 = vmul.f32 %v2579_v20, %v100_v51  ;;  %v173_v54 = vld [vmem:[#allocation3 + $0x400] sm:$0xff]  ;;  %v130_v51 = vld [vmem:[#allocation3 + $0x2a8] sm:$0xff] }
  0x30   :  { %v1150_v59 = vadd.f32 %v1149_v56, %v2677_v37  ;;  %v649_v24 = vmul.f32 %v2581_v21, %v101_v30  ;;  %v675_v25 = vmul.f32 %v2566_v5, %v127_v61  ;;  %v650_v41 = vmul.f32 %v2583_v22, %v102_v47  ;;  %v175_v61 = vld [vmem:[#allocation3 + $0x410] sm:$0xff]  ;;  %v132_v47 = vld [vmem:[#allocation3 + $0x2b8] sm:$0xff] }
  0x31   :  { %v1181_v26 = vadd.f32 %v1180_v62, %v666_v52  ;;  %v651_v63 = vmul.f32 %v2588_v32, %v103_v0  ;;  %v1160_v28 = vadd.f32 %v1159_v6, %v646_v46  ;;  %v1136_v29 = vadd.f32 %v1135_v17, %v2657_v9  ;;  %v108_v46 = vld [vmem:[#allocation3 + $0x1f8] sm:$0xff]  ;;  %v131_v56 = vld [vmem:[#allocation3 + $0x2b0] sm:$0xff]  ;;  %v133_v0 = vld [vmem:[#allocation3 + $0x2c0] sm:$0xff] }
  0x32   :  { %v1151_v37 = vadd.f32 %v1150_v59, %v2680_v10  ;;  %v676_v44 = vmul.f32 %v2568_v8, %v128_v11  ;;  %v1190_v42 = vadd.f32 %v674_v12, %v673_v4  ;;  %v652_v52 = vmul.f32 %v2590_v33, %v104_v38  ;;  %v176_v11 = vld [vmem:[#allocation3 + $0x418] sm:$0xff] }
  0x33   :  { %v1182_v55 = vadd.f32 %v1181_v26, %v667_v48  ;;  %v2743_v60 = vmul.f32 %v2592_v34, %v105_v7  ;;  %v1161_v50 = vadd.f32 %v1160_v28, %v647_v31  ;;  %v2747_v9 = vmul.f32 %v2594_v35, %v106_v13  ;;  %v134_v7 = vld [vmem:[#allocation3 + $0x2c8] sm:$0xff] }
  0x34   :  { %v1152_v30 = vadd.f32 %v1151_v37, %v2683_v23  ;;  %v677_v10 = vmul.f32 %v2572_v15, %v129_v43  ;;  %v1191_v58 = vadd.f32 %v1190_v42, %v675_v25  ;;  %v721_v4 = vmul.f32 %v2562_v1, %v173_v54  ;;  %v136_v25 = vld [vmem:[#allocation3 + $0x2d8] sm:$0xff]  ;;  %v178_v42 = vld [vmem:[#allocation3 + $0x428] sm:$0xff] }
  0x35   :  { %v1183_v48 = vadd.f32 %v1182_v55, %v2708_v53  ;;  %v1162_v17 = vadd.f32 %v1161_v50, %v648_v57  ;;  %v722_v12 = vmul.f32 %v2564_v2, %v174_v14  ;;  %v2755_v62 = vmul.f32 %v2596_v39, %v107_v49  ;;  %v135_v57 = vld [vmem:[#allocation3 + $0x2d0] sm:$0xff]  ;;  %v221_v14 = vld [vmem:[#allocation3 + $0x580] sm:$0xff] }
  0x36   :  { %1137 = vadd.xlane.f32.xlu0 %v1136_v29  ;;  %v1153_v23 = vadd.f32 %v1152_v30, %v2689_v18  ;;  %v678_v31 = vmul.f32 %v2574_v16, %v130_v51  ;;  %v1192_v6 = vadd.f32 %v1191_v58, %v676_v44  ;;  %v2760_v59 = vmul.f32 %v2600_v45, %v108_v46  ;;  %v177_v29 = vld [vmem:[#allocation3 + $0x420] sm:$0xff]  ;;  %v222_v30 = vld [vmem:[#allocation3 + $0x588] sm:$0xff]  ;;  %v140_v58 = vld [vmem:[#allocation3 + $0x2f8] sm:$0xff] }
  0x37   :  { %v1184_v53 = vadd.f32 %v1183_v48, %v2711_v27  ;;  %v1163_v38 = vadd.f32 %v1162_v17, %v649_v24  ;;  %v723_v26 = vmul.f32 %v2566_v5, %v175_v61  ;;  %v679_v18 = vmul.f32 %v2577_v19, %v131_v56  ;;  %v137_v44 = vld [vmem:[#allocation3 + $0x2e0] sm:$0xff] }
  0x38   :  { %1154 = vadd.xlane.f32.xlu1 %v1153_v23  ;;  %v680_v13 = vmul.f32 %v2579_v20, %v132_v47  ;;  %v681_v28 = vmul.f32 %v2581_v21, %v133_v0  ;;  %v1193_v43 = vadd.f32 %v1192_v6, %v677_v10  ;;  %v724_v24 = vmul.f32 %v2568_v8, %v176_v11  ;;  %v179_v47 = vld [vmem:[#allocation3 + $0x430] sm:$0xff]  ;;  %v182_v6 = vld [vmem:[#allocation3 + $0x448] sm:$0xff] }
  0x39   :  { %v1185_v27 = vadd.f32 %v1184_v53, %v2718_v36  ;;  %v1164_v37 = vadd.f32 %v1163_v38, %v650_v41  ;;  %v1241_v54 = vadd.f32 %v722_v12, %v721_v4  ;;  %v682_v55 = vmul.f32 %v2583_v22, %v134_v7  ;;  %v138_v36 = vld [vmem:[#allocation3 + $0x2e8] sm:$0xff]  ;;  %v139_v41 = vld [vmem:[#allocation3 + $0x2f0] sm:$0xff] }
  0x3a   :  { %v683_v49 = vmul.f32 %v2588_v32, %v135_v57  ;;  %v2771_v50 = vmul.f32 %v2590_v33, %v136_v25  ;;  %v1194_v51 = vadd.f32 %v1193_v43, %v678_v31  ;;  %v725_v61 = vmul.f32 %v2572_v15, %v177_v29  ;;  %v223_v4 = vld [vmem:[#allocation3 + $0x590] sm:$0xff]  ;;  %v181_v31 = vld [vmem:[#allocation3 + $0x440] sm:$0xff] }
  0x3b   :  { %v1186_v46 = vadd.f32 %v1185_v27, %v2721_v40  ;;  %v1165_v10 = vadd.f32 %v1164_v37, %v651_v63  ;;  %v1242_v48 = vadd.f32 %v1241_v54, %v723_v26  ;;  %v2776_v17 = vmul.f32 %v2592_v34, %v137_v44  ;;  %v180_v63 = vld [vmem:[#allocation3 + $0x438] sm:$0xff]  ;;  %v185_v43 = vld [vmem:[#allocation3 + $0x460] sm:$0xff] }
  0x3c   :  { %v1195_v56 = vadd.f32 %v1194_v51, %v679_v18  ;;  %v726_v0 = vmul.f32 %v2574_v16, %v178_v42  ;;  %v769_v12 = vmul.f32 %v2562_v1, %v221_v14  ;;  %v770_v53 = vmul.f32 %v2564_v2, %v222_v30  ;;  %v224_v26 = vld [vmem:[#allocation3 + $0x598] sm:$0xff]  ;;  %v186_v51 = vld [vmem:[#allocation3 + $0x468] sm:$0xff] }
  0x3d   :  { %v1187_v23 = vadd.f32 %v1186_v46, %v2729_v3  ;;  %v1166_v40 = vadd.f32 %v1165_v10, %v652_v52  ;;  %v1243_v11 = vadd.f32 %v1242_v48, %v724_v24  ;;  %v2783_v38 = vmul.f32 %v2594_v35, %v138_v36  ;;  %v183_v52 = vld [vmem:[#allocation3 + $0x450] sm:$0xff]  ;;  %v184_v18 = vld [vmem:[#allocation3 + $0x458] sm:$0xff]  ;;  %v141_v10 = vld [vmem:[#allocation3 + $0x300] sm:$0xff] }
  0x3e   :  { %v2786_v7 = vmul.f32 %v2596_v39, %v139_v41  ;;  %v2789_v57 = vmul.f32 %v2600_v45, %v140_v58  ;;  %v1196_v25 = vadd.f32 %v1195_v56, %v680_v13  ;;  %v727_v29 = vmul.f32 %v2577_v19, %v179_v47  ;;  %v225_v13 = vld [vmem:[#allocation3 + $0x5a0] sm:$0xff]  ;;  %v142_v36 = vld [vmem:[#allocation3 + $0x308] sm:$0xff]  ;;  %v188_v47 = vld [vmem:[#allocation3 + $0x478] sm:$0xff] }
  0x3f   :  { %1188 = vadd.xlane.f32.xlu2 %v1187_v23  ;;  %v1167_v3 = vadd.f32 %v1166_v40, %v2743_v60  ;;  %v1244_v27 = vadd.f32 %v1243_v11, %v725_v61  ;;  %v771_v37 = vmul.f32 %v2566_v5, %v223_v4  ;;  %v728_v42 = vmul.f32 %v2579_v20, %v180_v63  ;;  %v226_v48 = vld [vmem:[#allocation3 + $0x5a8] sm:$0xff]  ;;  %v143_v23 = vld [vmem:[#allocation3 + $0x310] sm:$0xff] }
  0x40   :  { %v1197_v44 = vadd.f32 %v1196_v25, %v681_v28  ;;  %v729_v24 = vmul.f32 %v2581_v21, %v181_v31  ;;  %v730_v54 = vmul.f32 %v2583_v22, %v182_v6  ;;  %v772_v30 = vmul.f32 %v2568_v8, %v224_v26  ;;  %v227_v63 = vld [vmem:[#allocation3 + $0x5b0] sm:$0xff]  ;;  %v228_v31 = vld [vmem:[#allocation3 + $0x5b8] sm:$0xff]  ;;  %v229_v25 = vld [vmem:[#allocation3 + $0x5c0] sm:$0xff] }
  0x41   :  { %v1168_v14 = vadd.f32 %v1167_v3, %v2747_v9  ;;  %v1245_v60 = vadd.f32 %v1244_v27, %v726_v0  ;;  %v1292_v46 = vadd.f32 %v770_v53, %v769_v12  ;;  %v731_v58 = vmul.f32 %v2588_v32, %v183_v52  ;;  %v187_v9 = vld [vmem:[#allocation3 + $0x470] sm:$0xff]  ;;  %v144_v52 = vld [vmem:[#allocation3 + $0x318] sm:$0xff] }
  0x42   :  { %v1198_v41 = vadd.f32 %v1197_v44, %v682_v55  ;;  %v2801_v28 = vmul.f32 %v2590_v33, %v184_v18  ;;  %v2804_v61 = vmul.f32 %v2592_v34, %v185_v43  ;;  %v773_v4 = vmul.f32 %v2572_v15, %v225_v13  ;;  %v231_v27 = vld [vmem:[#allocation3 + $0x5d0] sm:$0xff]  ;;  %v232_v44 = vld [vmem:[#allocation3 + $0x5d8] sm:$0xff] }
  0x43   :  { %v1169_v56 = vadd.f32 %v1168_v14, %v2755_v62  ;;  %v1246_v0 = vadd.f32 %v1245_v60, %v727_v29  ;;  %v1293_v12 = vadd.f32 %v1292_v46, %v771_v37  ;;  %v2809_v55 = vmul.f32 %v2594_v35, %v186_v51  ;;  %v230_v29 = vld [vmem:[#allocation3 + $0x5c8] sm:$0xff]  ;;  %v145_v51 = vld [vmem:[#allocation3 + $0x320] sm:$0xff] }
  0x44   :  { %v1199_v40 = vadd.f32 %v1198_v41, %v683_v49  ;;  %v689_v6 = vmul.f32 %v2562_v1, %v141_v10  ;;  %v690_v11 = vmul.f32 %v2564_v2, %v142_v36  ;;  %v774_v26 = vmul.f32 %v2574_v16, %v226_v48  ;;  %v233_v60 = vld [vmem:[#allocation3 + $0x5e0] sm:$0xff]  ;;  %v146_v46 = vld [vmem:[#allocation3 + $0x328] sm:$0xff] }
  0x45   :  { %v1170_v53 = vadd.f32 %v1169_v56, %v2760_v59  ;;  %v1247_v62 = vadd.f32 %v1246_v0, %v728_v42  ;;  %v1294_v3 = vadd.f32 %v1293_v12, %v772_v30  ;;  %v2817_v49 = vmul.f32 %v2596_v39, %v187_v9  ;;  %v269_v9 = vld [vmem:[#allocation3 + $0x700] sm:$0xff]  ;;  %v235_v12 = vld [vmem:[#allocation3 + $0x5f0] sm:$0xff] }
  0x46   :  { %v1200_v18 = vadd.f32 %v1199_v40, %v2771_v50  ;;  %v2820_v43 = vmul.f32 %v2600_v45, %v188_v47  ;;  %v691_v37 = vmul.f32 %v2566_v5, %v143_v23  ;;  %v775_v42 = vmul.f32 %v2577_v19, %v227_v63  ;;  %v270_v47 = vld [vmem:[#allocation3 + $0x708] sm:$0xff] }
  0x47   :  { %1171 = vadd.xlane.f32.xlu1 %v1170_v53  ;;  %v1248_v59 = vadd.f32 %v1247_v62, %v729_v24  ;;  %v776_v13 = vmul.f32 %v2579_v20, %v228_v31  ;;  %v1295_v14 = vadd.f32 %v1294_v3, %v773_v4  ;;  %v777_v30 = vmul.f32 %v2581_v21, %v229_v25  ;;  %v234_v4 = vld [vmem:[#allocation3 + $0x5e8] sm:$0xff]  ;;  %v271_v53 = vld [vmem:[#allocation3 + $0x710] sm:$0xff]  ;;  %v148_v25 = vld [vmem:[#allocation3 + $0x338] sm:$0xff] }
  0x48   :  { %v1201_v50 = vadd.f32 %v1200_v18, %v2776_v17  ;;  %v692_v10 = vmul.f32 %v2568_v8, %v144_v52  ;;  %v1207_v36 = vadd.f32 %v690_v11, %v689_v6  ;;  %v778_v48 = vmul.f32 %v2583_v22, %v230_v29  ;;  %v147_v6 = vld [vmem:[#allocation3 + $0x330] sm:$0xff] }
  0x49   :  { %v1249_v41 = vadd.f32 %v1248_v59, %v730_v54  ;;  %v779_v24 = vmul.f32 %v2588_v32, %v231_v27  ;;  %v1296_v56 = vadd.f32 %v1295_v14, %v774_v26  ;;  %v2832_v17 = vmul.f32 %v2590_v33, %v232_v44  ;;  %v272_v59 = vld [vmem:[#allocation3 + $0x718] sm:$0xff]  ;;  %v150_v44 = vld [vmem:[#allocation3 + $0x348] sm:$0xff] }
  0x4a   :  { %v1202_v0 = vadd.f32 %v1201_v50, %v2783_v38  ;;  %v693_v23 = vmul.f32 %v2572_v15, %v145_v51  ;;  %v1208_v40 = vadd.f32 %v1207_v36, %v691_v37  ;;  %v2836_v54 = vmul.f32 %v2592_v34, %v233_v60  ;;  %v236_v38 = vld [vmem:[#allocation3 + $0x5f8] sm:$0xff]  ;;  %v149_v37 = vld [vmem:[#allocation3 + $0x340] sm:$0xff] }
  0x4b   :  { %v1250_v63 = vadd.f32 %v1249_v41, %v731_v58  ;;  %v1297_v31 = vadd.f32 %v1296_v56, %v775_v42  ;;  %v694_v11 = vmul.f32 %v2574_v16, %v146_v46  ;;  %v817_v3 = vmul.f32 %v2562_v1, %v269_v9  ;;  %v151_v42 = vld [vmem:[#allocation3 + $0x350] sm:$0xff]  ;;  %v273_v36 = vld [vmem:[#allocation3 + $0x720] sm:$0xff]  ;;  %v274_v9 = vld [vmem:[#allocation3 + $0x728] sm:$0xff] }
  0x4c   :  { %v1203_v62 = vadd.f32 %v1202_v0, %v2786_v7  ;;  %v1209_v26 = vadd.f32 %v1208_v40, %v692_v10  ;;  %v818_v52 = vmul.f32 %v2564_v2, %v270_v47  ;;  %v2844_v58 = vmul.f32 %v2594_v35, %v234_v4  ;;  %v152_v10 = vld [vmem:[#allocation3 + $0x358] sm:$0xff]  ;;  %v153_v41 = vld [vmem:[#allocation3 + $0x360] sm:$0xff]  ;;  %v158_v40 = vld [vmem:[#allocation3 + $0x388] sm:$0xff] }
  0x4d   :  { %v1251_v18 = vadd.f32 %v1250_v63, %v2801_v28  ;;  %v2847_v29 = vmul.f32 %v2596_v39, %v235_v12  ;;  %v1298_v27 = vadd.f32 %v1297_v31, %v776_v13  ;;  %v695_v14 = vmul.f32 %v2577_v19, %v147_v6  ;;  %v154_v63 = vld [vmem:[#allocation3 + $0x368] sm:$0xff]  ;;  %v155_v31 = vld [vmem:[#allocation3 + $0x370] sm:$0xff] }
  0x4e   :  { %v1204_v7 = vadd.f32 %v1203_v62, %v2789_v57  ;;  %v1210_v51 = vadd.f32 %v1209_v26, %v693_v23  ;;  %v819_v50 = vmul.f32 %v2566_v5, %v271_v53  ;;  %v2854_v60 = vmul.f32 %v2600_v45, %v236_v38  ;;  %v157_v23 = vld [vmem:[#allocation3 + $0x380] sm:$0xff] }
  0x4f   :  { %v1252_v28 = vadd.f32 %v1251_v18, %v2804_v61  ;;  %v1299_v46 = vadd.f32 %v1298_v27, %v777_v30  ;;  %v696_v13 = vmul.f32 %v2579_v20, %v148_v25  ;;  %v697_v57 = vmul.f32 %v2581_v21, %v149_v37  ;;  %v276_v27 = vld [vmem:[#allocation3 + $0x738] sm:$0xff]  ;;  %v277_v37 = vld [vmem:[#allocation3 + $0x740] sm:$0xff] }
  0x50   :  { %1205 = vadd.xlane.f32.xlu2 %v1204_v7  ;;  %v1211_v56 = vadd.f32 %v1210_v51, %v694_v11  ;;  %v820_v47 = vmul.f32 %v2568_v8, %v272_v59  ;;  %v1343_v0 = vadd.f32 %v818_v52, %v817_v3  ;;  %v698_v12 = vmul.f32 %v2583_v22, %v150_v44  ;;  %v159_v3 = vld [vmem:[#allocation3 + $0x390] sm:$0xff]  ;;  %v156_v52 = vld [vmem:[#allocation3 + $0x378] sm:$0xff] }
  0x51   :  { %v1253_v4 = vadd.f32 %v1252_v28, %v2809_v55  ;;  %v1300_v61 = vadd.f32 %v1299_v46, %v778_v48  ;;  %v699_v30 = vmul.f32 %v2588_v32, %v151_v42  ;;  %v700_v6 = vmul.f32 %v2590_v33, %v152_v10  ;;  %v275_v48 = vld [vmem:[#allocation3 + $0x730] sm:$0xff]  ;;  %v160_v51 = vld [vmem:[#allocation3 + $0x398] sm:$0xff]  ;;  %v278_v28 = vld [vmem:[#allocation3 + $0x748] sm:$0xff] }
  0x52   :  { %v1212_v53 = vadd.f32 %v1211_v56, %v695_v14  ;;  %v821_v11 = vmul.f32 %v2572_v15, %v273_v36  ;;  %v1344_v62 = vadd.f32 %v1343_v0, %v819_v50  ;;  %v2866_v55 = vmul.f32 %v2592_v34, %v153_v41  ;;  %v279_v46 = vld [vmem:[#allocation3 + $0x750] sm:$0xff]  ;;  %v280_v10 = vld [vmem:[#allocation3 + $0x758] sm:$0xff]  ;;  %v281_v0 = vld [vmem:[#allocation3 + $0x760] sm:$0xff] }
  0x53   :  { %v1254_v38 = vadd.f32 %v1253_v4, %v2817_v49  ;;  %v1301_v25 = vadd.f32 %v1300_v61, %v779_v24  ;;  %v822_v26 = vmul.f32 %v2574_v16, %v274_v9  ;;  %v705_v7 = vmul.f32 %v2562_v1, %v157_v23  ;;  %v162_v61 = vld [vmem:[#allocation3 + $0x3a8] sm:$0xff] }
  0x54   :  { %v1213_v18 = vadd.f32 %v1212_v53, %v696_v13  ;;  %v1345_v59 = vadd.f32 %v1344_v62, %v820_v47  ;;  %v706_v44 = vmul.f32 %v2564_v2, %v158_v40  ;;  %v2874_v24 = vmul.f32 %v2594_v35, %v154_v63  ;;  %v161_v47 = vld [vmem:[#allocation3 + $0x3a0] sm:$0xff]  ;;  %v190_v62 = vld [vmem:[#allocation3 + $0x488] sm:$0xff] }
  0x55   :  { %v1255_v42 = vadd.f32 %v1254_v38, %v2820_v43  ;;  %v1302_v49 = vadd.f32 %v1301_v25, %v2832_v17  ;;  %v2877_v14 = vmul.f32 %v2596_v39, %v155_v31  ;;  %v823_v13 = vmul.f32 %v2577_v19, %v275_v48  ;;  %v189_v63 = vld [vmem:[#allocation3 + $0x480] sm:$0xff]  ;;  %v282_v25 = vld [vmem:[#allocation3 + $0x768] sm:$0xff] }
  0x56   :  { %v1214_v50 = vadd.f32 %v1213_v18, %v697_v57  ;;  %v1346_v36 = vadd.f32 %v1345_v59, %v821_v11  ;;  %v707_v41 = vmul.f32 %v2566_v5, %v159_v3  ;;  %v2883_v17 = vmul.f32 %v2600_v45, %v156_v52  ;;  %v191_v59 = vld [vmem:[#allocation3 + $0x490] sm:$0xff] }
  0x57   :  { %v1303_v43 = vadd.f32 %v1302_v49, %v2836_v54  ;;  %v824_v56 = vmul.f32 %v2579_v20, %v276_v27  ;;  %v825_v9 = vmul.f32 %v2581_v21, %v277_v37  ;;  %v708_v23 = vmul.f32 %v2568_v8, %v160_v51  ;;  %v164_v27 = vld [vmem:[#allocation3 + $0x3b8] sm:$0xff]  ;;  %v165_v49 = vld [vmem:[#allocation3 + $0x3c0] sm:$0xff] }
  0x58   :  { %1256 = vadd.xlane.f32.xlu2 %v1255_v42  ;;  %v1215_v57 = vadd.f32 %v1214_v50, %v698_v12  ;;  %v1347_v4 = vadd.f32 %v1346_v36, %v822_v26  ;;  %v1224_v40 = vadd.f32 %v706_v44, %v705_v7  ;;  %v826_v54 = vmul.f32 %v2583_v22, %v278_v28  ;;  %v283_v12 = vld [vmem:[#allocation3 + $0x770] sm:$0xff]  ;;  %v192_v50 = vld [vmem:[#allocation3 + $0x498] sm:$0xff] }
  0x59   :  { %v1304_v31 = vadd.f32 %v1303_v43, %v2844_v58  ;;  %v827_v53 = vmul.f32 %v2588_v32, %v279_v46  ;;  %v2892_v11 = vmul.f32 %v2590_v33, %v280_v10  ;;  %v163_v26 = vld [vmem:[#allocation3 + $0x3b0] sm:$0xff]  ;;  %v709_v3 = vmul.f32 %v2572_v15, %v161_v47 }
  0x5a   :  { %v1216_v38 = vadd.f32 %v1215_v57, %v699_v30  ;;  %v1348_v48 = vadd.f32 %v1347_v4, %v823_v13  ;;  %v1225_v52 = vadd.f32 %v1224_v40, %v707_v41  ;;  %v2897_v58 = vmul.f32 %v2592_v34, %v281_v0  ;;  %v284_v30 = vld [vmem:[#allocation3 + $0x778] sm:$0xff]  ;;  %v166_v13 = vld [vmem:[#allocation3 + $0x3c8] sm:$0xff]  ;;  %v167_v43 = vld [vmem:[#allocation3 + $0x3d0] sm:$0xff] }
  0x5b   :  { %v1305_v18 = vadd.f32 %v1304_v31, %v2847_v29  ;;  %v710_v37 = vmul.f32 %v2574_v16, %v162_v61  ;;  %v737_v7 = vmul.f32 %v2562_v1, %v189_v63  ;;  %v738_v28 = vmul.f32 %v2564_v2, %v190_v62  ;;  %v193_v57 = vld [vmem:[#allocation3 + $0x4a0] sm:$0xff]  ;;  %v194_v62 = vld [vmem:[#allocation3 + $0x4a8] sm:$0xff] }
  0x5c   :  { %v1217_v44 = vadd.f32 %v1216_v38, %v700_v6  ;;  %v1349_v42 = vadd.f32 %v1348_v48, %v824_v56  ;;  %v1226_v51 = vadd.f32 %v1225_v52, %v708_v23  ;;  %v2904_v29 = vmul.f32 %v2594_v35, %v282_v25  ;;  %v168_v56 = vld [vmem:[#allocation3 + $0x3d8] sm:$0xff]  ;;  %v317_v40 = vld [vmem:[#allocation3 + $0x880] sm:$0xff]  ;;  %v318_v25 = vld [vmem:[#allocation3 + $0x888] sm:$0xff] }
  0x5d   :  { %v1306_v46 = vadd.f32 %v1305_v18, %v2854_v60  ;;  %v2907_v10 = vmul.f32 %v2596_v39, %v283_v12  ;;  %v711_v36 = vmul.f32 %v2577_v19, %v163_v26  ;;  %v739_v0 = vmul.f32 %v2566_v5, %v191_v59  ;;  %v169_v63 = vld [vmem:[#allocation3 + $0x3e0] sm:$0xff]  ;;  %v319_v52 = vld [vmem:[#allocation3 + $0x890] sm:$0xff]  ;;  %v172_v59 = vld [vmem:[#allocation3 + $0x3f8] sm:$0xff] }
  0x5e   :  { %v1218_v6 = vadd.f32 %v1217_v44, %v2866_v55  ;;  %v1350_v41 = vadd.f32 %v1349_v42, %v825_v9  ;;  %v1227_v47 = vadd.f32 %v1226_v51, %v709_v3  ;;  %v2913_v60 = vmul.f32 %v2600_v45, %v284_v30  ;;  %v195_v30 = vld [vmem:[#allocation3 + $0x4b0] sm:$0xff] }
  0x5f   :  { %v712_v4 = vmul.f32 %v2579_v20, %v164_v27  ;;  %v713_v61 = vmul.f32 %v2581_v21, %v165_v49  ;;  %v740_v23 = vmul.f32 %v2568_v8, %v192_v50  ;;  %v1258_v38 = vadd.f32 %v738_v28, %v737_v7  ;;  %v196_v28 = vld [vmem:[#allocation3 + $0x4b8] sm:$0xff] }
  0x60   :  { %1307 = vadd.xlane.f32.xlu2 %v1306_v46  ;;  %v1219_v55 = vadd.f32 %v1218_v6, %v2874_v24  ;;  %v1351_v9 = vadd.f32 %v1350_v41, %v826_v54  ;;  %v1228_v31 = vadd.f32 %v1227_v47, %v710_v37  ;;  %v714_v12 = vmul.f32 %v2583_v22, %v166_v13  ;;  %v170_v24 = vld [vmem:[#allocation3 + $0x3e8] sm:$0xff]  ;;  %v171_v54 = vld [vmem:[#allocation3 + $0x3f0] sm:$0xff]  ;;  %v197_v46 = vld [vmem:[#allocation3 + $0x4c0] sm:$0xff] }
  0x61   :  { %v715_v48 = vmul.f32 %v2588_v32, %v167_v43  ;;  %v2922_v26 = vmul.f32 %v2590_v33, %v168_v56  ;;  %v741_v3 = vmul.f32 %v2572_v15, %v193_v57  ;;  %v1259_v44 = vadd.f32 %v1258_v38, %v739_v0  ;;  %v198_v56 = vld [vmem:[#allocation3 + $0x4c8] sm:$0xff]  ;;  %v199_v57 = vld [vmem:[#allocation3 + $0x4d0] sm:$0xff]  ;;  %v200_v0 = vld [vmem:[#allocation3 + $0x4d8] sm:$0xff] }
  0x62   :  { %v1220_v18 = vadd.f32 %v1219_v55, %v2877_v14  ;;  %v1352_v27 = vadd.f32 %v1351_v9, %v827_v53  ;;  %v1229_v37 = vadd.f32 %v1228_v31, %v711_v36  ;;  %v2927_v7 = vmul.f32 %v2592_v34, %v169_v63  ;;  %v320_v36 = vld [vmem:[#allocation3 + $0x898] sm:$0xff]  ;;  %v201_v55 = vld [vmem:[#allocation3 + $0x4e0] sm:$0xff] }
  0x63   :  { %v742_v42 = vmul.f32 %v2574_v16, %v194_v62  ;;  %v865_v49 = vmul.f32 %v2562_v1, %v317_v40  ;;  %v866_v51 = vmul.f32 %v2564_v2, %v318_v25  ;;  %v1260_v13 = vadd.f32 %v1259_v44, %v740_v23  ;;  %v321_v40 = vld [vmem:[#allocation3 + $0x8a0] sm:$0xff] }
  0x64   :  { %v1221_v50 = vadd.f32 %v1220_v18, %v2883_v17  ;;  %v1353_v14 = vadd.f32 %v1352_v27, %v2892_v11  ;;  %v1230_v53 = vadd.f32 %v1229_v37, %v712_v4  ;;  %v2935_v6 = vmul.f32 %v2594_v35, %v170_v24  ;;  %v205_v18 = vld [vmem:[#allocation3 + $0x500] sm:$0xff]  ;;  %v206_v27 = vld [vmem:[#allocation3 + $0x508] sm:$0xff] }
  0x65   :  { %v2938_v41 = vmul.f32 %v2596_v39, %v171_v54  ;;  %v2941_v43 = vmul.f32 %v2600_v45, %v172_v59  ;;  %v867_v47 = vmul.f32 %v2566_v5, %v319_v52  ;;  %v743_v4 = vmul.f32 %v2577_v19, %v195_v30  ;;  %v322_v52 = vld [vmem:[#allocation3 + $0x8a8] sm:$0xff] }
  0x66   :  { %1222 = vadd.xlane.f32.xlu0 %v1221_v50  ;;  %v1354_v17 = vadd.f32 %v1353_v14, %v2897_v58  ;;  %v1231_v11 = vadd.f32 %v1230_v53, %v713_v61  ;;  %v1261_v23 = vadd.f32 %v1260_v13, %v741_v3  ;;  %v744_v9 = vmul.f32 %v2579_v20, %v196_v28  ;;  %v202_v24 = vld [vmem:[#allocation3 + $0x4e8] sm:$0xff]  ;;  %v204_v50 = vld [vmem:[#allocation3 + $0x4f8] sm:$0xff] }
  0x67   :  { %v745_v63 = vmul.f32 %v2581_v21, %v197_v46  ;;  %v868_v31 = vmul.f32 %v2568_v8, %v320_v36  ;;  %v1394_v62 = vadd.f32 %v866_v51, %v865_v49  ;;  %v746_v58 = vmul.f32 %v2583_v22, %v198_v56  ;;  %v323_v49 = vld [vmem:[#allocation3 + $0x8b0] sm:$0xff]  ;;  %v324_v14 = vld [vmem:[#allocation3 + $0x8b8] sm:$0xff] }
  0x68   :  { %v1355_v38 = vadd.f32 %v1354_v17, %v2904_v29  ;;  %v1232_v25 = vadd.f32 %v1231_v11, %v714_v12  ;;  %v1262_v61 = vadd.f32 %v1261_v23, %v742_v42  ;;  %v747_v3 = vmul.f32 %v2588_v32, %v199_v57  ;;  %v203_v29 = vld [vmem:[#allocation3 + $0x4f0] sm:$0xff]  ;;  %v208_v17 = vld [vmem:[#allocation3 + $0x518] sm:$0xff]  ;;  %v326_v57 = vld [vmem:[#allocation3 + $0x8c8] sm:$0xff] }
  0x69   :  { %v2953_v54 = vmul.f32 %v2590_v33, %v200_v0  ;;  %v869_v59 = vmul.f32 %v2572_v15, %v321_v40  ;;  %v1395_v37 = vadd.f32 %v1394_v62, %v867_v47  ;;  %v2958_v12 = vmul.f32 %v2592_v34, %v201_v55  ;;  %v207_v51 = vld [vmem:[#allocation3 + $0x510] sm:$0xff]  ;;  %v325_v47 = vld [vmem:[#allocation3 + $0x8c0] sm:$0xff] }
  0x6a   :  { %v1356_v44 = vadd.f32 %v1355_v38, %v2907_v10  ;;  %v1233_v30 = vadd.f32 %v1232_v25, %v715_v48  ;;  %v1263_v42 = vadd.f32 %v1262_v61, %v743_v4  ;;  %v870_v53 = vmul.f32 %v2574_v16, %v322_v52  ;;  %v327_v0 = vld [vmem:[#allocation3 + $0x8d0] sm:$0xff]  ;;  %v209_v62 = vld [vmem:[#allocation3 + $0x520] sm:$0xff]  ;;  %v210_v52 = vld [vmem:[#allocation3 + $0x528] sm:$0xff] }
  0x6b   :  { %v1396_v28 = vadd.f32 %v1395_v37, %v868_v31  ;;  %v753_v46 = vmul.f32 %v2562_v1, %v205_v18  ;;  %v754_v13 = vmul.f32 %v2564_v2, %v206_v27  ;;  %v2966_v48 = vmul.f32 %v2594_v35, %v202_v24  ;;  %v329_v38 = vld [vmem:[#allocation3 + $0x8e0] sm:$0xff] }
  0x6c   :  { %v1357_v36 = vadd.f32 %v1356_v44, %v2913_v60  ;;  %v1234_v10 = vadd.f32 %v1233_v30, %v2922_v26  ;;  %v1264_v56 = vadd.f32 %v1263_v42, %v744_v9  ;;  %v2969_v11 = vmul.f32 %v2596_v39, %v203_v29  ;;  %v328_v9 = vld [vmem:[#allocation3 + $0x8d8] sm:$0xff]  ;;  %v238_v44 = vld [vmem:[#allocation3 + $0x608] sm:$0xff]  ;;  %v331_v29 = vld [vmem:[#allocation3 + $0x8f0] sm:$0xff] }
  0x6d   :  { %v871_v4 = vmul.f32 %v2577_v19, %v323_v49  ;;  %v1397_v23 = vadd.f32 %v1396_v28, %v869_v59  ;;  %v755_v40 = vmul.f32 %v2566_v5, %v207_v51  ;;  %v2975_v26 = vmul.f32 %v2600_v45, %v204_v50  ;;  %v330_v30 = vld [vmem:[#allocation3 + $0x8e8] sm:$0xff] }
  0x6e   :  { %1358 = vadd.xlane.f32.xlu2 %v1357_v36  ;;  %v1235_v60 = vadd.f32 %v1234_v10, %v2927_v7  ;;  %v1265_v55 = vadd.f32 %v1264_v56, %v745_v63  ;;  %v872_v31 = vmul.f32 %v2579_v20, %v324_v14  ;;  %v873_v25 = vmul.f32 %v2581_v21, %v325_v47  ;;  %v237_v63 = vld [vmem:[#allocation3 + $0x600] sm:$0xff]  ;;  %v212_v10 = vld [vmem:[#allocation3 + $0x538] sm:$0xff] }
  0x6f   :  { %v1398_v61 = vadd.f32 %v1397_v23, %v870_v53  ;;  %v756_v18 = vmul.f32 %v2568_v8, %v208_v17  ;;  %v1275_v27 = vadd.f32 %v754_v13, %v753_v46  ;;  %v874_v7 = vmul.f32 %v2583_v22, %v326_v57  ;;  %v239_v46 = vld [vmem:[#allocation3 + $0x610] sm:$0xff]  ;;  %v332_v13 = vld [vmem:[#allocation3 + $0x8f8] sm:$0xff]  ;;  %v213_v56 = vld [vmem:[#allocation3 + $0x540] sm:$0xff] }
  0x70   :  { %v1236_v24 = vadd.f32 %v1235_v60, %v2935_v6  ;;  %v1266_v59 = vadd.f32 %v1265_v55, %v746_v58  ;;  %v875_v37 = vmul.f32 %v2588_v32, %v327_v0  ;;  %v876_v42 = vmul.f32 %v2590_v33, %v328_v9  ;;  %v211_v58 = vld [vmem:[#allocation3 + $0x530] sm:$0xff]  ;;  %v240_v23 = vld [vmem:[#allocation3 + $0x618] sm:$0xff]  ;;  %v214_v60 = vld [vmem:[#allocation3 + $0x548] sm:$0xff] }
  0x71   :  { %v1399_v49 = vadd.f32 %v1398_v61, %v871_v4  ;;  %v757_v51 = vmul.f32 %v2572_v15, %v209_v62  ;;  %v1276_v50 = vadd.f32 %v1275_v27, %v755_v40  ;;  %v2987_v6 = vmul.f32 %v2592_v34, %v329_v38  ;;  %v215_v55 = vld [vmem:[#allocation3 + $0x550] sm:$0xff]  ;;  %v216_v9 = vld [vmem:[#allocation3 + $0x558] sm:$0xff]  ;;  %v217_v27 = vld [vmem:[#allocation3 + $0x560] sm:$0xff] }
  0x72   :  { %v1237_v14 = vadd.f32 %v1236_v24, %v2938_v41  ;;  %v1267_v53 = vadd.f32 %v1266_v59, %v747_v3  ;;  %v758_v28 = vmul.f32 %v2574_v16, %v210_v52  ;;  %v785_v17 = vmul.f32 %v2562_v1, %v237_v63  ;;  %v242_v59 = vld [vmem:[#allocation3 + $0x628] sm:$0xff] }
  0x73   :  { %v1400_v36 = vadd.f32 %v1399_v49, %v872_v31  ;;  %v1277_v47 = vadd.f32 %v1276_v50, %v756_v18  ;;  %v786_v57 = vmul.f32 %v2564_v2, %v238_v44  ;;  %v2995_v3 = vmul.f32 %v2594_v35, %v330_v30  ;;  %v241_v18 = vld [vmem:[#allocation3 + $0x620] sm:$0xff]  ;;  %v366_v50 = vld [vmem:[#allocation3 + $0xa08] sm:$0xff] }
  0x74   :  { %v1238_v0 = vadd.f32 %v1237_v14, %v2941_v43  ;;  %v1268_v41 = vadd.f32 %v1267_v53, %v2953_v54  ;;  %v2998_v4 = vmul.f32 %v2596_v39, %v331_v29  ;;  %v759_v31 = vmul.f32 %v2577_v19, %v211_v58  ;;  %v365_v30 = vld [vmem:[#allocation3 + $0xa00] sm:$0xff]  ;;  %v218_v53 = vld [vmem:[#allocation3 + $0x568] sm:$0xff] }
  0x75   :  { %v1401_v40 = vadd.f32 %v1400_v36, %v873_v25  ;;  %v1278_v62 = vadd.f32 %v1277_v47, %v757_v51  ;;  %v787_v38 = vmul.f32 %v2566_v5, %v239_v46  ;;  %v3004_v54 = vmul.f32 %v2600_v45, %v332_v13  ;;  %v368_v47 = vld [vmem:[#allocation3 + $0xa18] sm:$0xff] }
  0x76   :  { %1239 = vadd.xlane.f32.xlu1 %v1238_v0  ;;  %v1269_v43 = vadd.f32 %v1268_v41, %v2958_v12  ;;  %v760_v61 = vmul.f32 %v2579_v20, %v212_v10  ;;  %v761_v52 = vmul.f32 %v2581_v21, %v213_v56  ;;  %v788_v63 = vmul.f32 %v2568_v8, %v240_v23  ;;  %v367_v56 = vld [vmem:[#allocation3 + $0xa10] sm:$0xff]  ;;  %v244_v41 = vld [vmem:[#allocation3 + $0x638] sm:$0xff]  ;;  %v245_v23 = vld [vmem:[#allocation3 + $0x640] sm:$0xff] }
  0x77   :  { %v1402_v25 = vadd.f32 %v1401_v40, %v874_v7  ;;  %v1279_v24 = vadd.f32 %v1278_v62, %v758_v28  ;;  %v1309_v44 = vadd.f32 %v786_v57, %v785_v17  ;;  %v762_v12 = vmul.f32 %v2583_v22, %v214_v60  ;;  %v219_v7 = vld [vmem:[#allocation3 + $0x570] sm:$0xff]  ;;  %v369_v62 = vld [vmem:[#allocation3 + $0xa20] sm:$0xff] }
  0x78   :  { %v1270_v29 = vadd.f32 %v1269_v43, %v2966_v48  ;;  %v763_v49 = vmul.f32 %v2588_v32, %v215_v55  ;;  %v3013_v51 = vmul.f32 %v2590_v33, %v216_v9  ;;  %v243_v28 = vld [vmem:[#allocation3 + $0x630] sm:$0xff]  ;;  %v789_v46 = vmul.f32 %v2572_v15, %v241_v18  ;;  %v246_v43 = vld [vmem:[#allocation3 + $0x648] sm:$0xff]  ;;  %v248_v18 = vld [vmem:[#allocation3 + $0x658] sm:$0xff] }
  0x79   :  { %v1403_v14 = vadd.f32 %v1402_v25, %v875_v37  ;;  %v1280_v58 = vadd.f32 %v1279_v24, %v759_v31  ;;  %v1310_v13 = vadd.f32 %v1309_v44, %v787_v38  ;;  %v3018_v48 = vmul.f32 %v2592_v34, %v217_v27  ;;  %v220_v37 = vld [vmem:[#allocation3 + $0x578] sm:$0xff]  ;;  %v253_v44 = vld [vmem:[#allocation3 + $0x680] sm:$0xff] }
  0x7a   :  { %v1271_v36 = vadd.f32 %v1270_v29, %v2969_v11  ;;  %v790_v10 = vmul.f32 %v2574_v16, %v242_v59  ;;  %v913_v17 = vmul.f32 %v2562_v1, %v365_v30  ;;  %v914_v60 = vmul.f32 %v2564_v2, %v366_v50  ;;  %v249_v30 = vld [vmem:[#allocation3 + $0x660] sm:$0xff]  ;;  %v370_v50 = vld [vmem:[#allocation3 + $0xa28] sm:$0xff] }
  0x7b   :  { %v1404_v57 = vadd.f32 %v1403_v14, %v876_v42  ;;  %v1281_v0 = vadd.f32 %v1280_v58, %v760_v61  ;;  %v1311_v40 = vadd.f32 %v1310_v13, %v788_v63  ;;  %v3025_v11 = vmul.f32 %v2594_v35, %v218_v53  ;;  %v247_v61 = vld [vmem:[#allocation3 + $0x650] sm:$0xff]  ;;  %v254_v53 = vld [vmem:[#allocation3 + $0x688] sm:$0xff] }
  0x7c   :  { %v1272_v55 = vadd.f32 %v1271_v36, %v2975_v26  ;;  %v3028_v9 = vmul.f32 %v2596_v39, %v219_v7  ;;  %v791_v31 = vmul.f32 %v2577_v19, %v243_v28  ;;  %v915_v27 = vmul.f32 %v2566_v5, %v367_v56  ;;  %v255_v13 = vld [vmem:[#allocation3 + $0x690] sm:$0xff] }
  0x7d   :  { %v1405_v42 = vadd.f32 %v1404_v57, %v2987_v6  ;;  %v1282_v38 = vadd.f32 %v1281_v0, %v761_v52  ;;  %v1312_v25 = vadd.f32 %v1311_v40, %v789_v46  ;;  %v3034_v26 = vmul.f32 %v2600_v45, %v220_v37  ;;  %v371_v37 = vld [vmem:[#allocation3 + $0xa30] sm:$0xff] }
  0x7e   :  { %1273 = vadd.xlane.f32.xlu0 %v1272_v55  ;;  %v792_v24 = vmul.f32 %v2579_v20, %v244_v41  ;;  %v793_v59 = vmul.f32 %v2581_v21, %v245_v23  ;;  %v916_v63 = vmul.f32 %v2568_v8, %v368_v47  ;;  %v1445_v14 = vadd.f32 %v914_v60, %v913_v17  ;;  %v252_v47 = vld [vmem:[#allocation3 + $0x678] sm:$0xff]  ;;  %v373_v55 = vld [vmem:[#allocation3 + $0xa40] sm:$0xff] }
  0x7f   :  { %v1406_v6 = vadd.f32 %v1405_v42, %v2995_v3  ;;  %v1283_v52 = vadd.f32 %v1282_v38, %v762_v12  ;;  %v1313_v29 = vadd.f32 %v1312_v25, %v790_v10  ;;  %v794_v7 = vmul.f32 %v2583_v22, %v246_v43  ;;  %v250_v3 = vld [vmem:[#allocation3 + $0x668] sm:$0xff]  ;;  %v251_v12 = vld [vmem:[#allocation3 + $0x670] sm:$0xff]  ;;  %v372_v60 = vld [vmem:[#allocation3 + $0xa38] sm:$0xff] }
  0x80   :  { %v795_v58 = vmul.f32 %v2588_v32, %v247_v61  ;;  %v3043_v28 = vmul.f32 %v2590_v33, %v248_v18  ;;  %v917_v46 = vmul.f32 %v2572_v15, %v369_v62  ;;  %v1446_v57 = vadd.f32 %v1445_v14, %v915_v27  ;;  %v374_v61 = vld [vmem:[#allocation3 + $0xa48] sm:$0xff]  ;;  %v375_v25 = vld [vmem:[#allocation3 + $0xa50] sm:$0xff]  ;;  %v376_v27 = vld [vmem:[#allocation3 + $0xa58] sm:$0xff] }
  0x81   :  { %v1407_v36 = vadd.f32 %v1406_v6, %v2998_v4  ;;  %v1284_v56 = vadd.f32 %v1283_v52, %v763_v49  ;;  %v1314_v10 = vadd.f32 %v1313_v29, %v791_v31  ;;  %v3048_v17 = vmul.f32 %v2592_v34, %v249_v30  ;;  %v256_v31 = vld [vmem:[#allocation3 + $0x698] sm:$0xff]  ;;  %v377_v6 = vld [vmem:[#allocation3 + $0xa60] sm:$0xff] }
  0x82   :  { %v918_v0 = vmul.f32 %v2574_v16, %v370_v50  ;;  %v801_v41 = vmul.f32 %v2562_v1, %v253_v44  ;;  %v802_v23 = vmul.f32 %v2564_v2, %v254_v53  ;;  %v1447_v62 = vadd.f32 %v1446_v57, %v916_v63  ;;  %v257_v44 = vld [vmem:[#allocation3 + $0x6a0] sm:$0xff] }
  0x83   :  { %v1408_v40 = vadd.f32 %v1407_v36, %v3004_v54  ;;  %v1285_v4 = vadd.f32 %v1284_v56, %v3013_v51  ;;  %v1315_v49 = vadd.f32 %v1314_v10, %v792_v24  ;;  %v3056_v42 = vmul.f32 %v2594_v35, %v250_v3  ;;  %v285_v36 = vld [vmem:[#allocation3 + $0x780] sm:$0xff]  ;;  %v286_v56 = vld [vmem:[#allocation3 + $0x788] sm:$0xff] }
  0x84   :  { %v3059_v38 = vmul.f32 %v2596_v39, %v251_v12  ;;  %v3062_v43 = vmul.f32 %v2600_v45, %v252_v47  ;;  %v803_v18 = vmul.f32 %v2566_v5, %v255_v13  ;;  %v919_v24 = vmul.f32 %v2577_v19, %v371_v37  ;;  %v258_v13 = vld [vmem:[#allocation3 + $0x6a8] sm:$0xff] }
  0x85   :  { %1409 = vadd.xlane.f32.xlu2 %v1408_v40  ;;  %v1286_v54 = vadd.f32 %v1285_v4, %v3018_v48  ;;  %v1316_v51 = vadd.f32 %v1315_v49, %v793_v59  ;;  %v1448_v63 = vadd.f32 %v1447_v62, %v917_v46  ;;  %v920_v52 = vmul.f32 %v2579_v20, %v372_v60  ;;  %v378_v3 = vld [vmem:[#allocation3 + $0xa68] sm:$0xff]  ;;  %v380_v40 = vld [vmem:[#allocation3 + $0xa78] sm:$0xff] }
  0x86   :  { %v921_v30 = vmul.f32 %v2581_v21, %v373_v55  ;;  %v804_v29 = vmul.f32 %v2568_v8, %v256_v31  ;;  %v1326_v50 = vadd.f32 %v802_v23, %v801_v41  ;;  %v922_v48 = vmul.f32 %v2583_v22, %v374_v61  ;;  %v259_v41 = vld [vmem:[#allocation3 + $0x6b0] sm:$0xff]  ;;  %v260_v4 = vld [vmem:[#allocation3 + $0x6b8] sm:$0xff] }
  0x87   :  { %v1287_v14 = vadd.f32 %v1286_v54, %v3025_v11  ;;  %v1317_v53 = vadd.f32 %v1316_v51, %v794_v7  ;;  %v1449_v59 = vadd.f32 %v1448_v63, %v918_v0  ;;  %v923_v46 = vmul.f32 %v2588_v32, %v375_v25  ;;  %v379_v11 = vld [vmem:[#allocation3 + $0xa70] sm:$0xff]  ;;  %v288_v54 = vld [vmem:[#allocation3 + $0x798] sm:$0xff]  ;;  %v262_v25 = vld [vmem:[#allocation3 + $0x6c8] sm:$0xff] }
  0x88   :  { %v3074_v12 = vmul.f32 %v2590_v33, %v376_v27  ;;  %v805_v47 = vmul.f32 %v2572_v15, %v257_v44  ;;  %v1327_v10 = vadd.f32 %v1326_v50, %v803_v18  ;;  %v3079_v7 = vmul.f32 %v2592_v34, %v377_v6  ;;  %v287_v23 = vld [vmem:[#allocation3 + $0x790] sm:$0xff]  ;;  %v261_v18 = vld [vmem:[#allocation3 + $0x6c0] sm:$0xff] }
  0x89   :  { %v1288_v57 = vadd.f32 %v1287_v14, %v3028_v9  ;;  %v1318_v37 = vadd.f32 %v1317_v53, %v795_v58  ;;  %v1450_v0 = vadd.f32 %v1449_v59, %v919_v24  ;;  %v806_v49 = vmul.f32 %v2574_v16, %v258_v13  ;;  %v263_v27 = vld [vmem:[#allocation3 + $0x6d0] sm:$0xff]  ;;  %v289_v50 = vld [vmem:[#allocation3 + $0x7a0] sm:$0xff]  ;;  %v290_v13 = vld [vmem:[#allocation3 + $0x7a8] sm:$0xff] }
  0x8a   :  { %v1328_v60 = vadd.f32 %v1327_v10, %v804_v29  ;;  %v833_v55 = vmul.f32 %v2562_v1, %v285_v36  ;;  %v834_v62 = vmul.f32 %v2564_v2, %v286_v56  ;;  %v3087_v58 = vmul.f32 %v2594_v35, %v378_v3  ;;  %v265_v14 = vld [vmem:[#allocation3 + $0x6e0] sm:$0xff] }
  0x8b   :  { %v1289_v31 = vadd.f32 %v1288_v57, %v3034_v26  ;;  %v1319_v9 = vadd.f32 %v1318_v37, %v3043_v28  ;;  %v1451_v61 = vadd.f32 %v1450_v0, %v920_v52  ;;  %v3090_v51 = vmul.f32 %v2596_v39, %v379_v11  ;;  %v264_v52 = vld [vmem:[#allocation3 + $0x6d8] sm:$0xff]  ;;  %v414_v57 = vld [vmem:[#allocation3 + $0xb88] sm:$0xff]  ;;  %v267_v11 = vld [vmem:[#allocation3 + $0x6f0] sm:$0xff] }
  0x8c   :  { %v807_v24 = vmul.f32 %v2577_v19, %v259_v41  ;;  %v1329_v63 = vadd.f32 %v1328_v60, %v805_v47  ;;  %v835_v44 = vmul.f32 %v2566_v5, %v287_v23  ;;  %v3096_v28 = vmul.f32 %v2600_v45, %v380_v40  ;;  %v266_v37 = vld [vmem:[#allocation3 + $0x6e8] sm:$0xff] }
  0x8d   :  { %1290 = vadd.xlane.f32.xlu1 %v1289_v31  ;;  %v1320_v26 = vadd.f32 %v1319_v9, %v3048_v17  ;;  %v1452_v6 = vadd.f32 %v1451_v61, %v921_v30  ;;  %v808_v29 = vmul.f32 %v2579_v20, %v260_v4  ;;  %v809_v53 = vmul.f32 %v2581_v21, %v261_v18  ;;  %v413_v30 = vld [vmem:[#allocation3 + $0xb80] sm:$0xff]  ;;  %v292_v9 = vld [vmem:[#allocation3 + $0x7b8] sm:$0xff] }
  0x8e   :  { %v1330_v59 = vadd.f32 %v1329_v63, %v806_v49  ;;  %v836_v36 = vmul.f32 %v2568_v8, %v288_v54  ;;  %v1360_v56 = vadd.f32 %v834_v62, %v833_v55  ;;  %v810_v17 = vmul.f32 %v2583_v22, %v262_v25  ;;  %v415_v55 = vld [vmem:[#allocation3 + $0xb90] sm:$0xff]  ;;  %v268_v62 = vld [vmem:[#allocation3 + $0x6f8] sm:$0xff]  ;;  %v293_v61 = vld [vmem:[#allocation3 + $0x7c0] sm:$0xff] }
  0x8f   :  { %v1321_v3 = vadd.f32 %v1320_v26, %v3056_v42  ;;  %v1453_v47 = vadd.f32 %v1452_v6, %v922_v48  ;;  %v811_v10 = vmul.f32 %v2588_v32, %v263_v27  ;;  %v812_v0 = vmul.f32 %v2590_v33, %v264_v52  ;;  %v291_v48 = vld [vmem:[#allocation3 + $0x7b0] sm:$0xff]  ;;  %v416_v63 = vld [vmem:[#allocation3 + $0xb98] sm:$0xff]  ;;  %v294_v26 = vld [vmem:[#allocation3 + $0x7c8] sm:$0xff] }
  0x90   :  { %v1331_v41 = vadd.f32 %v1330_v59, %v807_v24  ;;  %v837_v23 = vmul.f32 %v2572_v15, %v289_v50  ;;  %v1361_v40 = vadd.f32 %v1360_v56, %v835_v44  ;;  %v3108_v42 = vmul.f32 %v2592_v34, %v265_v14  ;;  %v295_v6 = vld [vmem:[#allocation3 + $0x7d0] sm:$0xff]  ;;  %v296_v52 = vld [vmem:[#allocation3 + $0x7d8] sm:$0xff]  ;;  %v297_v56 = vld [vmem:[#allocation3 + $0x7e0] sm:$0xff] }
  0x91   :  { %v1322_v4 = vadd.f32 %v1321_v3, %v3059_v38  ;;  %v1454_v49 = vadd.f32 %v1453_v47, %v923_v46  ;;  %v838_v60 = vmul.f32 %v2574_v16, %v290_v13  ;;  %v961_v54 = vmul.f32 %v2562_v1, %v413_v30  ;;  %v418_v47 = vld [vmem:[#allocation3 + $0xba8] sm:$0xff] }
  0x92   :  { %v1332_v31 = vadd.f32 %v1331_v41, %v808_v29  ;;  %v1362_v18 = vadd.f32 %v1361_v40, %v836_v36  ;;  %v962_v25 = vmul.f32 %v2564_v2, %v414_v57  ;;  %v3116_v46 = vmul.f32 %v2594_v35, %v266_v37  ;;  %v417_v36 = vld [vmem:[#allocation3 + $0xba0] sm:$0xff]  ;;  %v302_v40 = vld [vmem:[#allocation3 + $0x808] sm:$0xff] }
  0x93   :  { %v1323_v27 = vadd.f32 %v1322_v4, %v3062_v43  ;;  %v1455_v38 = vadd.f32 %v1454_v49, %v3074_v12  ;;  %v3119_v24 = vmul.f32 %v2596_v39, %v267_v11  ;;  %v839_v29 = vmul.f32 %v2577_v19, %v291_v48  ;;  %v301_v37 = vld [vmem:[#allocation3 + $0x800] sm:$0xff]  ;;  %v298_v49 = vld [vmem:[#allocation3 + $0x7e8] sm:$0xff] }
  0x94   :  { %v1333_v44 = vadd.f32 %v1332_v31, %v809_v53  ;;  %v1363_v50 = vadd.f32 %v1362_v18, %v837_v23  ;;  %v963_v14 = vmul.f32 %v2566_v5, %v415_v55  ;;  %v3125_v12 = vmul.f32 %v2600_v45, %v268_v62  ;;  %v304_v18 = vld [vmem:[#allocation3 + $0x818] sm:$0xff] }
  0x95   :  { %1324 = vadd.xlane.f32.xlu0 %v1323_v27  ;;  %v1456_v43 = vadd.f32 %v1455_v38, %v3079_v7  ;;  %v840_v59 = vmul.f32 %v2579_v20, %v292_v9  ;;  %v841_v13 = vmul.f32 %v2581_v21, %v293_v61  ;;  %v964_v30 = vmul.f32 %v2568_v8, %v416_v63  ;;  %v303_v61 = vld [vmem:[#allocation3 + $0x810] sm:$0xff]  ;;  %v420_v38 = vld [vmem:[#allocation3 + $0xbb8] sm:$0xff]  ;;  %v421_v63 = vld [vmem:[#allocation3 + $0xbc0] sm:$0xff] }
  0x96   :  { %v1334_v53 = vadd.f32 %v1333_v44, %v810_v17  ;;  %v1364_v3 = vadd.f32 %v1363_v50, %v838_v60  ;;  %v1496_v57 = vadd.f32 %v962_v25, %v961_v54  ;;  %v842_v7 = vmul.f32 %v2583_v22, %v294_v26  ;;  %v299_v17 = vld [vmem:[#allocation3 + $0x7f0] sm:$0xff]  ;;  %v305_v50 = vld [vmem:[#allocation3 + $0x820] sm:$0xff] }
  0x97   :  { %v1457_v11 = vadd.f32 %v1456_v43, %v3087_v58  ;;  %v843_v41 = vmul.f32 %v2588_v32, %v295_v6  ;;  %v3134_v23 = vmul.f32 %v2590_v33, %v296_v52  ;;  %v419_v60 = vld [vmem:[#allocation3 + $0xbb0] sm:$0xff]  ;;  %v965_v55 = vmul.f32 %v2572_v15, %v417_v36  ;;  %v422_v43 = vld [vmem:[#allocation3 + $0xbc8] sm:$0xff]  ;;  %v424_v36 = vld [vmem:[#allocation3 + $0xbd8] sm:$0xff] }
  0x98   :  { %v1335_v4 = vadd.f32 %v1334_v53, %v811_v10  ;;  %v1365_v48 = vadd.f32 %v1364_v3, %v839_v29  ;;  %v1497_v62 = vadd.f32 %v1496_v57, %v963_v14  ;;  %v3139_v58 = vmul.f32 %v2592_v34, %v297_v56  ;;  %v300_v10 = vld [vmem:[#allocation3 + $0x7f8] sm:$0xff] }
  0x99   :  { %v1458_v31 = vadd.f32 %v1457_v11, %v3090_v51  ;;  %v966_v9 = vmul.f32 %v2574_v16, %v418_v47  ;;  %v849_v54 = vmul.f32 %v2562_v1, %v301_v37  ;;  %v850_v26 = vmul.f32 %v2564_v2, %v302_v40  ;;  %v425_v37 = vld [vmem:[#allocation3 + $0xbe0] sm:$0xff] }
  0x9a   :  { %v1336_v25 = vadd.f32 %v1335_v4, %v812_v0  ;;  %v1366_v27 = vadd.f32 %v1365_v48, %v840_v59  ;;  %v1498_v44 = vadd.f32 %v1497_v62, %v964_v30  ;;  %v3146_v51 = vmul.f32 %v2594_v35, %v298_v49  ;;  %v423_v59 = vld [vmem:[#allocation3 + $0xbd0] sm:$0xff]  ;;  %v306_v30 = vld [vmem:[#allocation3 + $0x828] sm:$0xff]  ;;  %v333_v4 = vld [vmem:[#allocation3 + $0x900] sm:$0xff] }
  0x9b   :  { %v1459_v6 = vadd.f32 %v1458_v31, %v3096_v28  ;;  %v3149_v52 = vmul.f32 %v2596_v39, %v299_v17  ;;  %v967_v29 = vmul.f32 %v2577_v19, %v419_v60  ;;  %v851_v56 = vmul.f32 %v2566_v5, %v303_v61  ;;  %v334_v49 = vld [vmem:[#allocation3 + $0x908] sm:$0xff]  ;;  %v335_v62 = vld [vmem:[#allocation3 + $0x910] sm:$0xff] }
  0x9c   :  { %v1337_v0 = vadd.f32 %v1336_v25, %v3108_v42  ;;  %v1367_v14 = vadd.f32 %v1366_v27, %v841_v13  ;;  %v1499_v53 = vadd.f32 %v1498_v44, %v965_v55  ;;  %v3155_v28 = vmul.f32 %v2600_v45, %v300_v10  ;;  %v307_v10 = vld [vmem:[#allocation3 + $0x830] sm:$0xff] }
  0x9d   :  { %1460 = vadd.xlane.f32.xlu2 %v1459_v6  ;;  %v968_v3 = vmul.f32 %v2579_v20, %v420_v38  ;;  %v969_v47 = vmul.f32 %v2581_v21, %v421_v63  ;;  %v852_v57 = vmul.f32 %v2568_v8, %v304_v18  ;;  %v1377_v40 = vadd.f32 %v850_v26, %v849_v54  ;;  %v428_v18 = vld [vmem:[#allocation3 + $0xbf8] sm:$0xff]  ;;  %v309_v6 = vld [vmem:[#allocation3 + $0x840] sm:$0xff] }
  0x9e   :  { %v1338_v42 = vadd.f32 %v1337_v0, %v3116_v46  ;;  %v1368_v13 = vadd.f32 %v1367_v14, %v842_v7  ;;  %v1500_v11 = vadd.f32 %v1499_v53, %v966_v9  ;;  %v970_v17 = vmul.f32 %v2583_v22, %v422_v43  ;;  %v426_v46 = vld [vmem:[#allocation3 + $0xbe8] sm:$0xff]  ;;  %v427_v7 = vld [vmem:[#allocation3 + $0xbf0] sm:$0xff]  ;;  %v308_v26 = vld [vmem:[#allocation3 + $0x838] sm:$0xff] }
  0x9f   :  { %v971_v48 = vmul.f32 %v2588_v32, %v423_v59  ;;  %v3164_v60 = vmul.f32 %v2590_v33, %v424_v36  ;;  %v853_v55 = vmul.f32 %v2572_v15, %v305_v50  ;;  %v1378_v54 = vadd.f32 %v1377_v40, %v851_v56  ;;  %v310_v59 = vld [vmem:[#allocation3 + $0x848] sm:$0xff]  ;;  %v311_v53 = vld [vmem:[#allocation3 + $0x850] sm:$0xff]  ;;  %v312_v56 = vld [vmem:[#allocation3 + $0x858] sm:$0xff] }
  0xa0   :  { %v1339_v31 = vadd.f32 %v1338_v42, %v3119_v24  ;;  %v1369_v61 = vadd.f32 %v1368_v13, %v843_v41  ;;  %v1501_v9 = vadd.f32 %v1500_v11, %v967_v29  ;;  %v3169_v25 = vmul.f32 %v2592_v34, %v425_v37  ;;  %v336_v29 = vld [vmem:[#allocation3 + $0x918] sm:$0xff]  ;;  %v313_v42 = vld [vmem:[#allocation3 + $0x860] sm:$0xff] }
  0xa1   :  { %v854_v27 = vmul.f32 %v2574_v16, %v306_v30  ;;  %v881_v38 = vmul.f32 %v2562_v1, %v333_v4  ;;  %v882_v63 = vmul.f32 %v2564_v2, %v334_v49  ;;  %v1379_v50 = vadd.f32 %v1378_v54, %v852_v57  ;;  %v337_v57 = vld [vmem:[#allocation3 + $0x920] sm:$0xff] }
  0xa2   :  { %v1340_v44 = vadd.f32 %v1339_v31, %v3125_v12  ;;  %v1370_v24 = vadd.f32 %v1369_v61, %v3134_v23  ;;  %v1502_v41 = vadd.f32 %v1501_v9, %v968_v3  ;;  %v3177_v0 = vmul.f32 %v2594_v35, %v426_v46  ;;  %v461_v31 = vld [vmem:[#allocation3 + $0xd00] sm:$0xff]  ;;  %v462_v61 = vld [vmem:[#allocation3 + $0xd08] sm:$0xff] }
  0xa3   :  { %v3180_v14 = vmul.f32 %v2596_v39, %v427_v7  ;;  %v3183_v43 = vmul.f32 %v2600_v45, %v428_v18  ;;  %v883_v36 = vmul.f32 %v2566_v5, %v335_v62  ;;  %v855_v3 = vmul.f32 %v2577_v19, %v307_v10  ;;  %v338_v62 = vld [vmem:[#allocation3 + $0x928] sm:$0xff] }
  0xa4   :  { %1341 = vadd.xlane.f32.xlu1 %v1340_v44  ;;  %v1371_v12 = vadd.f32 %v1370_v24, %v3139_v58  ;;  %v1503_v23 = vadd.f32 %v1502_v41, %v969_v47  ;;  %v1380_v30 = vadd.f32 %v1379_v50, %v853_v55  ;;  %v856_v13 = vmul.f32 %v2579_v20, %v308_v26  ;;  %v314_v46 = vld [vmem:[#allocation3 + $0x868] sm:$0xff]  ;;  %v316_v44 = vld [vmem:[#allocation3 + $0x878] sm:$0xff] }
  0xa5   :  { %v857_v37 = vmul.f32 %v2581_v21, %v309_v6  ;;  %v884_v11 = vmul.f32 %v2568_v8, %v336_v29  ;;  %v1411_v40 = vadd.f32 %v882_v63, %v881_v38  ;;  %v858_v58 = vmul.f32 %v2583_v22, %v310_v59  ;;  %v339_v38 = vld [vmem:[#allocation3 + $0x930] sm:$0xff]  ;;  %v340_v24 = vld [vmem:[#allocation3 + $0x938] sm:$0xff] }
  0xa6   :  { %v1372_v4 = vadd.f32 %v1371_v12, %v3146_v51  ;;  %v1504_v49 = vadd.f32 %v1503_v23, %v970_v17  ;;  %v1381_v47 = vadd.f32 %v1380_v30, %v854_v27  ;;  %v859_v55 = vmul.f32 %v2588_v32, %v311_v53  ;;  %v315_v51 = vld [vmem:[#allocation3 + $0x870] sm:$0xff]  ;;  %v464_v12 = vld [vmem:[#allocation3 + $0xd18] sm:$0xff]  ;;  %v342_v53 = vld [vmem:[#allocation3 + $0x948] sm:$0xff] }
  0xa7   :  { %v3195_v7 = vmul.f32 %v2590_v33, %v312_v56  ;;  %v885_v18 = vmul.f32 %v2572_v15, %v337_v57  ;;  %v1412_v9 = vadd.f32 %v1411_v40, %v883_v36  ;;  %v3200_v17 = vmul.f32 %v2592_v34, %v313_v42  ;;  %v463_v63 = vld [vmem:[#allocation3 + $0xd10] sm:$0xff]  ;;  %v341_v36 = vld [vmem:[#allocation3 + $0x940] sm:$0xff] }
  0xa8   :  { %v1373_v54 = vadd.f32 %v1372_v4, %v3149_v52  ;;  %v1505_v10 = vadd.f32 %v1504_v49, %v971_v48  ;;  %v1382_v27 = vadd.f32 %v1381_v47, %v855_v3  ;;  %v886_v41 = vmul.f32 %v2574_v16, %v338_v62  ;;  %v343_v56 = vld [vmem:[#allocation3 + $0x950] sm:$0xff]  ;;  %v465_v40 = vld [vmem:[#allocation3 + $0xd20] sm:$0xff]  ;;  %v466_v62 = vld [vmem:[#allocation3 + $0xd28] sm:$0xff] }
  0xa9   :  { %v1413_v26 = vadd.f32 %v1412_v9, %v884_v11  ;;  %v1009_v6 = vmul.f32 %v2562_v1, %v461_v31  ;;  %v1010_v50 = vmul.f32 %v2564_v2, %v462_v61  ;;  %v3208_v48 = vmul.f32 %v2594_v35, %v314_v46  ;;  %v345_v4 = vld [vmem:[#allocation3 + $0x960] sm:$0xff] }
  0xaa   :  { %v1374_v29 = vadd.f32 %v1373_v54, %v3155_v28  ;;  %v1506_v52 = vadd.f32 %v1505_v10, %v3164_v60  ;;  %v1383_v59 = vadd.f32 %v1382_v27, %v856_v13  ;;  %v3211_v23 = vmul.f32 %v2596_v39, %v315_v51  ;;  %v344_v13 = vld [vmem:[#allocation3 + $0x958] sm:$0xff]  ;;  %v350_v54 = vld [vmem:[#allocation3 + $0x988] sm:$0xff]  ;;  %v347_v51 = vld [vmem:[#allocation3 + $0x970] sm:$0xff] }
  0xab   :  { %v887_v3 = vmul.f32 %v2577_v19, %v339_v38  ;;  %v1414_v30 = vadd.f32 %v1413_v26, %v885_v18  ;;  %v1011_v57 = vmul.f32 %v2566_v5, %v463_v63  ;;  %v3217_v60 = vmul.f32 %v2600_v45, %v316_v44  ;;  %v346_v10 = vld [vmem:[#allocation3 + $0x968] sm:$0xff] }
  0xac   :  { %1375 = vadd.xlane.f32.xlu0 %v1374_v29  ;;  %v1507_v28 = vadd.f32 %v1506_v52, %v3169_v25  ;;  %v1384_v42 = vadd.f32 %v1383_v59, %v857_v37  ;;  %v888_v11 = vmul.f32 %v2579_v20, %v340_v24  ;;  %v889_v49 = vmul.f32 %v2581_v21, %v341_v36  ;;  %v349_v37 = vld [vmem:[#allocation3 + $0x980] sm:$0xff]  ;;  %v468_v52 = vld [vmem:[#allocation3 + $0xd38] sm:$0xff] }
  0xad   :  { %v1415_v47 = vadd.f32 %v1414_v30, %v886_v41  ;;  %v1012_v31 = vmul.f32 %v2568_v8, %v464_v12  ;;  %v1547_v61 = vadd.f32 %v1010_v50, %v1009_v6  ;;  %v890_v25 = vmul.f32 %v2583_v22, %v342_v53  ;;  %v351_v6 = vld [vmem:[#allocation3 + $0x990] sm:$0xff]  ;;  %v348_v50 = vld [vmem:[#allocation3 + $0x978] sm:$0xff]  ;;  %v469_v59 = vld [vmem:[#allocation3 + $0xd40] sm:$0xff] }
  0xae   :  { %v1508_v46 = vadd.f32 %v1507_v28, %v3177_v0  ;;  %v1385_v18 = vadd.f32 %v1384_v42, %v858_v58  ;;  %v891_v9 = vmul.f32 %v2588_v32, %v343_v56  ;;  %v892_v27 = vmul.f32 %v2590_v33, %v344_v13  ;;  %v467_v58 = vld [vmem:[#allocation3 + $0xd30] sm:$0xff]  ;;  %v352_v30 = vld [vmem:[#allocation3 + $0x998] sm:$0xff]  ;;  %v470_v28 = vld [vmem:[#allocation3 + $0xd48] sm:$0xff] }
  0xaf   :  { %v1416_v38 = vadd.f32 %v1415_v47, %v887_v3  ;;  %v1013_v63 = vmul.f32 %v2572_v15, %v465_v40  ;;  %v1548_v44 = vadd.f32 %v1547_v61, %v1011_v57  ;;  %v3229_v0 = vmul.f32 %v2592_v34, %v345_v4  ;;  %v471_v42 = vld [vmem:[#allocation3 + $0xd50] sm:$0xff]  ;;  %v472_v13 = vld [vmem:[#allocation3 + $0xd58] sm:$0xff]  ;;  %v473_v61 = vld [vmem:[#allocation3 + $0xd60] sm:$0xff] }
  0xb0   :  { %v1509_v24 = vadd.f32 %v1508_v46, %v3180_v14  ;;  %v1386_v41 = vadd.f32 %v1385_v18, %v859_v55  ;;  %v1014_v26 = vmul.f32 %v2574_v16, %v466_v62  ;;  %v897_v12 = vmul.f32 %v2562_v1, %v349_v37  ;;  %v354_v18 = vld [vmem:[#allocation3 + $0x9a8] sm:$0xff] }
  0xb1   :  { %v1417_v29 = vadd.f32 %v1416_v38, %v888_v11  ;;  %v1549_v36 = vadd.f32 %v1548_v44, %v1012_v31  ;;  %v898_v53 = vmul.f32 %v2564_v2, %v350_v54  ;;  %v3237_v55 = vmul.f32 %v2594_v35, %v346_v10  ;;  %v353_v31 = vld [vmem:[#allocation3 + $0x9a0] sm:$0xff]  ;;  %v382_v44 = vld [vmem:[#allocation3 + $0xa88] sm:$0xff] }
  0xb2   :  { %v1510_v56 = vadd.f32 %v1509_v24, %v3183_v43  ;;  %v1387_v14 = vadd.f32 %v1386_v41, %v3195_v7  ;;  %v3240_v3 = vmul.f32 %v2596_v39, %v347_v51  ;;  %v1015_v11 = vmul.f32 %v2577_v19, %v467_v58  ;;  %v381_v10 = vld [vmem:[#allocation3 + $0xa80] sm:$0xff]  ;;  %v474_v41 = vld [vmem:[#allocation3 + $0xd68] sm:$0xff] }
  0xb3   :  { %v1418_v57 = vadd.f32 %v1417_v29, %v889_v49  ;;  %v1550_v40 = vadd.f32 %v1549_v36, %v1013_v63  ;;  %v899_v4 = vmul.f32 %v2566_v5, %v351_v6  ;;  %v3246_v7 = vmul.f32 %v2600_v45, %v348_v50  ;;  %v383_v36 = vld [vmem:[#allocation3 + $0xa90] sm:$0xff] }
  0xb4   :  { %1511 = vadd.xlane.f32.xlu2 %v1510_v56  ;;  %v1388_v43 = vadd.f32 %v1387_v14, %v3200_v17  ;;  %v1016_v47 = vmul.f32 %v2579_v20, %v468_v52  ;;  %v1017_v62 = vmul.f32 %v2581_v21, %v469_v59  ;;  %v900_v37 = vmul.f32 %v2568_v8, %v352_v30  ;;  %v356_v52 = vld [vmem:[#allocation3 + $0x9b8] sm:$0xff]  ;;  %v357_v14 = vld [vmem:[#allocation3 + $0x9c0] sm:$0xff] }
  0xb5   :  { %v1419_v49 = vadd.f32 %v1418_v57, %v890_v25  ;;  %v1551_v46 = vadd.f32 %v1550_v40, %v1014_v26  ;;  %v1428_v54 = vadd.f32 %v898_v53, %v897_v12  ;;  %v1018_v17 = vmul.f32 %v2583_v22, %v470_v28  ;;  %v475_v25 = vld [vmem:[#allocation3 + $0xd70] sm:$0xff]  ;;  %v384_v57 = vld [vmem:[#allocation3 + $0xa98] sm:$0xff] }
  0xb6   :  { %v1389_v51 = vadd.f32 %v1388_v43, %v3208_v48  ;;  %v1019_v38 = vmul.f32 %v2588_v32, %v471_v42  ;;  %v3255_v63 = vmul.f32 %v2590_v33, %v472_v13  ;;  %v355_v26 = vld [vmem:[#allocation3 + $0x9b0] sm:$0xff]  ;;  %v901_v6 = vmul.f32 %v2572_v15, %v353_v31 }
  0xb7   :  { %v1420_v24 = vadd.f32 %v1419_v49, %v891_v9  ;;  %v1552_v58 = vadd.f32 %v1551_v46, %v1015_v11  ;;  %v1429_v50 = vadd.f32 %v1428_v54, %v899_v4  ;;  %v3260_v48 = vmul.f32 %v2592_v34, %v473_v61  ;;  %v476_v9 = vld [vmem:[#allocation3 + $0xd78] sm:$0xff]  ;;  %v358_v11 = vld [vmem:[#allocation3 + $0x9c8] sm:$0xff]  ;;  %v359_v43 = vld [vmem:[#allocation3 + $0x9d0] sm:$0xff] }
  0xb8   :  { %v1390_v29 = vadd.f32 %v1389_v51, %v3211_v23  ;;  %v902_v59 = vmul.f32 %v2574_v16, %v354_v18  ;;  %v929_v12 = vmul.f32 %v2562_v1, %v381_v10  ;;  %v930_v28 = vmul.f32 %v2564_v2, %v382_v44  ;;  %v385_v49 = vld [vmem:[#allocation3 + $0xaa0] sm:$0xff]  ;;  %v386_v44 = vld [vmem:[#allocation3 + $0xaa8] sm:$0xff] }
  0xb9   :  { %v1421_v53 = vadd.f32 %v1420_v24, %v892_v27  ;;  %v1553_v56 = vadd.f32 %v1552_v58, %v1016_v47  ;;  %v1430_v30 = vadd.f32 %v1429_v50, %v900_v37  ;;  %v3267_v23 = vmul.f32 %v2594_v35, %v474_v41  ;;  %v360_v47 = vld [vmem:[#allocation3 + $0x9d8] sm:$0xff]  ;;  %v509_v54 = vld [vmem:[#allocation3 + $0xe80] sm:$0xff]  ;;  %v510_v41 = vld [vmem:[#allocation3 + $0xe88] sm:$0xff] }
  0xba   :  { %v1391_v42 = vadd.f32 %v1390_v29, %v3217_v60  ;;  %v3270_v13 = vmul.f32 %v2596_v39, %v475_v25  ;;  %v903_v40 = vmul.f32 %v2577_v19, %v355_v26  ;;  %v931_v61 = vmul.f32 %v2566_v5, %v383_v36  ;;  %v361_v10 = vld [vmem:[#allocation3 + $0x9e0] sm:$0xff]  ;;  %v511_v50 = vld [vmem:[#allocation3 + $0xe90] sm:$0xff]  ;;  %v364_v36 = vld [vmem:[#allocation3 + $0x9f8] sm:$0xff] }
  0xbb   :  { %v1422_v27 = vadd.f32 %v1421_v53, %v3229_v0  ;;  %v1554_v4 = vadd.f32 %v1553_v56, %v1017_v62  ;;  %v1431_v31 = vadd.f32 %v1430_v30, %v901_v6  ;;  %v3276_v60 = vmul.f32 %v2600_v45, %v476_v9  ;;  %v387_v9 = vld [vmem:[#allocation3 + $0xab0] sm:$0xff] }
  0xbc   :  { %1392 = vadd.xlane.f32.xlu1 %v1391_v42  ;;  %v904_v46 = vmul.f32 %v2579_v20, %v356_v52  ;;  %v905_v18 = vmul.f32 %v2581_v21, %v357_v14  ;;  %v932_v37 = vmul.f32 %v2568_v8, %v384_v57  ;;  %v1462_v24 = vadd.f32 %v930_v28, %v929_v12  ;;  %v388_v28 = vld [vmem:[#allocation3 + $0xab8] sm:$0xff]  ;;  %v389_v42 = vld [vmem:[#allocation3 + $0xac0] sm:$0xff] }
  0xbd   :  { %v1423_v0 = vadd.f32 %v1422_v27, %v3237_v55  ;;  %v1555_v62 = vadd.f32 %v1554_v4, %v1018_v17  ;;  %v1432_v51 = vadd.f32 %v1431_v31, %v902_v59  ;;  %v906_v25 = vmul.f32 %v2583_v22, %v358_v11  ;;  %v362_v55 = vld [vmem:[#allocation3 + $0x9e8] sm:$0xff]  ;;  %v363_v17 = vld [vmem:[#allocation3 + $0x9f0] sm:$0xff] }
  0xbe   :  { %v907_v58 = vmul.f32 %v2588_v32, %v359_v43  ;;  %v3285_v26 = vmul.f32 %v2590_v33, %v360_v47  ;;  %v933_v6 = vmul.f32 %v2572_v15, %v385_v49  ;;  %v1463_v53 = vadd.f32 %v1462_v24, %v931_v61  ;;  %v390_v47 = vld [vmem:[#allocation3 + $0xac8] sm:$0xff]  ;;  %v391_v49 = vld [vmem:[#allocation3 + $0xad0] sm:$0xff]  ;;  %v392_v61 = vld [vmem:[#allocation3 + $0xad8] sm:$0xff] }
  0xbf   :  { %v1424_v29 = vadd.f32 %v1423_v0, %v3240_v3  ;;  %v1556_v52 = vadd.f32 %v1555_v62, %v1019_v38  ;;  %v1433_v59 = vadd.f32 %v1432_v51, %v903_v40  ;;  %v3290_v12 = vmul.f32 %v2592_v34, %v361_v10  ;;  %v512_v40 = vld [vmem:[#allocation3 + $0xe98] sm:$0xff]  ;;  %v393_v0 = vld [vmem:[#allocation3 + $0xae0] sm:$0xff] }
  0xc0   :  { %v934_v56 = vmul.f32 %v2574_v16, %v386_v44  ;;  %v1057_v14 = vmul.f32 %v2562_v1, %v509_v54  ;;  %v1058_v30 = vmul.f32 %v2564_v2, %v510_v41  ;;  %v1464_v11 = vadd.f32 %v1463_v53, %v932_v37  ;;  %v513_v54 = vld [vmem:[#allocation3 + $0xea0] sm:$0xff] }
  0xc1   :  { %v1425_v57 = vadd.f32 %v1424_v29, %v3246_v7  ;;  %v1557_v3 = vadd.f32 %v1556_v52, %v3255_v63  ;;  %v1434_v38 = vadd.f32 %v1433_v59, %v904_v46  ;;  %v3298_v27 = vmul.f32 %v2594_v35, %v362_v55  ;;  %v397_v29 = vld [vmem:[#allocation3 + $0xb00] sm:$0xff]  ;;  %v398_v52 = vld [vmem:[#allocation3 + $0xb08] sm:$0xff] }
  0xc2   :  { %v3301_v4 = vmul.f32 %v2596_v39, %v363_v17  ;;  %v3304_v43 = vmul.f32 %v2600_v45, %v364_v36  ;;  %v1059_v31 = vmul.f32 %v2566_v5, %v511_v50  ;;  %v935_v46 = vmul.f32 %v2577_v19, %v387_v9  ;;  %v514_v50 = vld [vmem:[#allocation3 + $0xea8] sm:$0xff] }
  0xc3   :  { %1426 = vadd.xlane.f32.xlu0 %v1425_v57  ;;  %v1558_v7 = vadd.f32 %v1557_v3, %v3260_v48  ;;  %v1435_v63 = vadd.f32 %v1434_v38, %v905_v18  ;;  %v1465_v37 = vadd.f32 %v1464_v11, %v933_v6  ;;  %v936_v62 = vmul.f32 %v2579_v20, %v388_v28  ;;  %v394_v55 = vld [vmem:[#allocation3 + $0xae8] sm:$0xff]  ;;  %v396_v57 = vld [vmem:[#allocation3 + $0xaf8] sm:$0xff] }
  0xc4   :  { %v937_v10 = vmul.f32 %v2581_v21, %v389_v42  ;;  %v1060_v51 = vmul.f32 %v2568_v8, %v512_v40  ;;  %v1598_v44 = vadd.f32 %v1058_v30, %v1057_v14  ;;  %v938_v48 = vmul.f32 %v2583_v22, %v390_v47  ;;  %v515_v14 = vld [vmem:[#allocation3 + $0xeb0] sm:$0xff]  ;;  %v516_v3 = vld [vmem:[#allocation3 + $0xeb8] sm:$0xff] }
  0xc5   :  { %v1559_v24 = vadd.f32 %v1558_v7, %v3267_v23  ;;  %v1436_v41 = vadd.f32 %v1435_v63, %v906_v25  ;;  %v1466_v18 = vadd.f32 %v1465_v37, %v934_v56  ;;  %v939_v6 = vmul.f32 %v2588_v32, %v391_v49  ;;  %v395_v23 = vld [vmem:[#allocation3 + $0xaf0] sm:$0xff]  ;;  %v400_v7 = vld [vmem:[#allocation3 + $0xb18] sm:$0xff]  ;;  %v518_v49 = vld [vmem:[#allocation3 + $0xec8] sm:$0xff] }
  0xc6   :  { %v3316_v17 = vmul.f32 %v2590_v33, %v392_v61  ;;  %v1061_v36 = vmul.f32 %v2572_v15, %v513_v54  ;;  %v1599_v59 = vadd.f32 %v1598_v44, %v1059_v31  ;;  %v3321_v25 = vmul.f32 %v2592_v34, %v393_v0  ;;  %v399_v30 = vld [vmem:[#allocation3 + $0xb10] sm:$0xff]  ;;  %v517_v31 = vld [vmem:[#allocation3 + $0xec0] sm:$0xff] }
  0xc7   :  { %v1560_v53 = vadd.f32 %v1559_v24, %v3270_v13  ;;  %v1437_v9 = vadd.f32 %v1436_v41, %v907_v58  ;;  %v1467_v56 = vadd.f32 %v1466_v18, %v935_v46  ;;  %v1062_v38 = vmul.f32 %v2574_v16, %v514_v50  ;;  %v519_v61 = vld [vmem:[#allocation3 + $0xed0] sm:$0xff]  ;;  %v401_v44 = vld [vmem:[#allocation3 + $0xb20] sm:$0xff]  ;;  %v402_v50 = vld [vmem:[#allocation3 + $0xb28] sm:$0xff] }
  0xc8   :  { %v1600_v28 = vadd.f32 %v1599_v59, %v1060_v51  ;;  %v945_v42 = vmul.f32 %v2562_v1, %v397_v29  ;;  %v946_v11 = vmul.f32 %v2564_v2, %v398_v52  ;;  %v3329_v58 = vmul.f32 %v2594_v35, %v394_v55  ;;  %v521_v24 = vld [vmem:[#allocation3 + $0xee0] sm:$0xff] }
  0xc9   :  { %v1561_v40 = vadd.f32 %v1560_v53, %v3276_v60  ;;  %v1438_v13 = vadd.f32 %v1437_v9, %v3285_v26  ;;  %v1468_v47 = vadd.f32 %v1467_v56, %v936_v62  ;;  %v3332_v63 = vmul.f32 %v2596_v39, %v395_v23  ;;  %v520_v62 = vld [vmem:[#allocation3 + $0xed8] sm:$0xff]  ;;  %v430_v53 = vld [vmem:[#allocation3 + $0xc08] sm:$0xff]  ;;  %v523_v23 = vld [vmem:[#allocation3 + $0xef0] sm:$0xff] }
  0xca   :  { %v1063_v46 = vmul.f32 %v2577_v19, %v515_v14  ;;  %v1601_v37 = vadd.f32 %v1600_v28, %v1061_v36  ;;  %v947_v54 = vmul.f32 %v2566_v5, %v399_v30  ;;  %v3338_v26 = vmul.f32 %v2600_v45, %v396_v57  ;;  %v522_v9 = vld [vmem:[#allocation3 + $0xee8] sm:$0xff] }
  0xcb   :  { %1562 = vadd.xlane.f32.xlu2 %v1561_v40  ;;  %v1439_v60 = vadd.f32 %v1438_v13, %v3290_v12  ;;  %v1469_v0 = vadd.f32 %v1468_v47, %v937_v10  ;;  %v1064_v51 = vmul.f32 %v2579_v20, %v516_v3  ;;  %v1065_v41 = vmul.f32 %v2581_v21, %v517_v31  ;;  %v429_v10 = vld [vmem:[#allocation3 + $0xc00] sm:$0xff]  ;;  %v404_v13 = vld [vmem:[#allocation3 + $0xb38] sm:$0xff] }
  0xcc   :  { %v1602_v18 = vadd.f32 %v1601_v37, %v1062_v38  ;;  %v948_v29 = vmul.f32 %v2568_v8, %v400_v7  ;;  %v1479_v52 = vadd.f32 %v946_v11, %v945_v42  ;;  %v1066_v12 = vmul.f32 %v2583_v22, %v518_v49  ;;  %v431_v42 = vld [vmem:[#allocation3 + $0xc10] sm:$0xff]  ;;  %v524_v11 = vld [vmem:[#allocation3 + $0xef8] sm:$0xff]  ;;  %v405_v47 = vld [vmem:[#allocation3 + $0xb40] sm:$0xff] }
  0xcd   :  { %v1440_v55 = vadd.f32 %v1439_v60, %v3298_v27  ;;  %v1470_v36 = vadd.f32 %v1469_v0, %v938_v48  ;;  %v1067_v59 = vmul.f32 %v2588_v32, %v519_v61  ;;  %v1068_v56 = vmul.f32 %v2590_v33, %v520_v62  ;;  %v403_v48 = vld [vmem:[#allocation3 + $0xb30] sm:$0xff]  ;;  %v432_v37 = vld [vmem:[#allocation3 + $0xc18] sm:$0xff]  ;;  %v406_v60 = vld [vmem:[#allocation3 + $0xb48] sm:$0xff] }
  0xce   :  { %v1603_v14 = vadd.f32 %v1602_v18, %v1063_v46  ;;  %v949_v30 = vmul.f32 %v2572_v15, %v401_v44  ;;  %v1480_v57 = vadd.f32 %v1479_v52, %v947_v54  ;;  %v3350_v27 = vmul.f32 %v2592_v34, %v521_v24  ;;  %v407_v0 = vld [vmem:[#allocation3 + $0xb50] sm:$0xff]  ;;  %v408_v62 = vld [vmem:[#allocation3 + $0xb58] sm:$0xff]  ;;  %v409_v52 = vld [vmem:[#allocation3 + $0xb60] sm:$0xff] }
  0xcf   :  { %v1441_v3 = vadd.f32 %v1440_v55, %v3301_v4  ;;  %v1471_v38 = vadd.f32 %v1470_v36, %v939_v6  ;;  %v950_v28 = vmul.f32 %v2574_v16, %v402_v50  ;;  %v977_v7 = vmul.f32 %v2562_v1, %v429_v10  ;;  %v434_v36 = vld [vmem:[#allocation3 + $0xc28] sm:$0xff] }
  0xd0   :  { %v1604_v40 = vadd.f32 %v1603_v14, %v1064_v51  ;;  %v1481_v31 = vadd.f32 %v1480_v57, %v948_v29  ;;  %v978_v49 = vmul.f32 %v2564_v2, %v430_v53  ;;  %v3358_v6 = vmul.f32 %v2594_v35, %v522_v9  ;;  %v433_v29 = vld [vmem:[#allocation3 + $0xc20] sm:$0xff]  ;;  %v446_v57 = vld [vmem:[#allocation3 + $0xc88] sm:$0xff] }
  0xd1   :  { %v1442_v61 = vadd.f32 %v1441_v3, %v3304_v43  ;;  %v1472_v4 = vadd.f32 %v1471_v38, %v3316_v17  ;;  %v3361_v46 = vmul.f32 %v2596_v39, %v523_v23  ;;  %v951_v51 = vmul.f32 %v2577_v19, %v403_v48  ;;  %v445_v9 = vld [vmem:[#allocation3 + $0xc80] sm:$0xff]  ;;  %v410_v38 = vld [vmem:[#allocation3 + $0xb68] sm:$0xff] }
  0xd2   :  { %v1605_v54 = vadd.f32 %v1604_v40, %v1065_v41  ;;  %v1482_v44 = vadd.f32 %v1481_v31, %v949_v30  ;;  %v979_v24 = vmul.f32 %v2566_v5, %v431_v42  ;;  %v3367_v17 = vmul.f32 %v2600_v45, %v524_v11  ;;  %v448_v31 = vld [vmem:[#allocation3 + $0xc98] sm:$0xff] }
  0xd3   :  { %1443 = vadd.xlane.f32.xlu1 %v1442_v61  ;;  %v1473_v43 = vadd.f32 %v1472_v4, %v3321_v25  ;;  %v952_v18 = vmul.f32 %v2579_v20, %v404_v13  ;;  %v953_v50 = vmul.f32 %v2581_v21, %v405_v47  ;;  %v980_v10 = vmul.f32 %v2568_v8, %v432_v37  ;;  %v447_v47 = vld [vmem:[#allocation3 + $0xc90] sm:$0xff]  ;;  %v436_v4 = vld [vmem:[#allocation3 + $0xc38] sm:$0xff]  ;;  %v437_v37 = vld [vmem:[#allocation3 + $0xc40] sm:$0xff] }
  0xd4   :  { %v1606_v41 = vadd.f32 %v1605_v54, %v1066_v12  ;;  %v1483_v55 = vadd.f32 %v1482_v44, %v950_v28  ;;  %v1513_v53 = vadd.f32 %v978_v49, %v977_v7  ;;  %v954_v25 = vmul.f32 %v2583_v22, %v406_v60  ;;  %v411_v12 = vld [vmem:[#allocation3 + $0xb70] sm:$0xff]  ;;  %v449_v44 = vld [vmem:[#allocation3 + $0xca0] sm:$0xff] }
  0xd5   :  { %v1474_v23 = vadd.f32 %v1473_v43, %v3329_v58  ;;  %v955_v14 = vmul.f32 %v2588_v32, %v407_v0  ;;  %v3376_v30 = vmul.f32 %v2590_v33, %v408_v62  ;;  %v435_v28 = vld [vmem:[#allocation3 + $0xc30] sm:$0xff]  ;;  %v981_v42 = vmul.f32 %v2572_v15, %v433_v29  ;;  %v438_v43 = vld [vmem:[#allocation3 + $0xc48] sm:$0xff]  ;;  %v440_v29 = vld [vmem:[#allocation3 + $0xc58] sm:$0xff] }
  0xd6   :  { %v1607_v3 = vadd.f32 %v1606_v41, %v1067_v59  ;;  %v1484_v48 = vadd.f32 %v1483_v55, %v951_v51  ;;  %v1514_v11 = vadd.f32 %v1513_v53, %v979_v24  ;;  %v3381_v58 = vmul.f32 %v2592_v34, %v409_v52  ;;  %v412_v59 = vld [vmem:[#allocation3 + $0xb78] sm:$0xff] }
  0xd7   :  { %v1475_v40 = vadd.f32 %v1474_v23, %v3332_v63  ;;  %v982_v13 = vmul.f32 %v2574_v16, %v434_v36  ;;  %v993_v7 = vmul.f32 %v2562_v1, %v445_v9  ;;  %v994_v60 = vmul.f32 %v2564_v2, %v446_v57  ;;  %v441_v9 = vld [vmem:[#allocation3 + $0xc60] sm:$0xff] }
  0xd8   :  { %v1608_v49 = vadd.f32 %v1607_v3, %v1068_v56  ;;  %v1485_v61 = vadd.f32 %v1484_v48, %v952_v18  ;;  %v1515_v54 = vadd.f32 %v1514_v11, %v980_v10  ;;  %v3388_v63 = vmul.f32 %v2594_v35, %v410_v38  ;;  %v439_v18 = vld [vmem:[#allocation3 + $0xc50] sm:$0xff]  ;;  %v450_v10 = vld [vmem:[#allocation3 + $0xca8] sm:$0xff]  ;;  %v477_v3 = vld [vmem:[#allocation3 + $0xd80] sm:$0xff] }
  0xd9   :  { %v1476_v0 = vadd.f32 %v1475_v40, %v3338_v26  ;;  %v3391_v62 = vmul.f32 %v2596_v39, %v411_v12  ;;  %v983_v51 = vmul.f32 %v2577_v19, %v435_v28  ;;  %v995_v52 = vmul.f32 %v2566_v5, %v447_v47  ;;  %v478_v38 = vld [vmem:[#allocation3 + $0xd88] sm:$0xff]  ;;  %v479_v11 = vld [vmem:[#allocation3 + $0xd90] sm:$0xff] }
  0xda   :  { %v1609_v56 = vadd.f32 %v1608_v49, %v3350_v27  ;;  %v1486_v24 = vadd.f32 %v1485_v61, %v953_v50  ;;  %v1516_v41 = vadd.f32 %v1515_v54, %v981_v42  ;;  %v3397_v26 = vmul.f32 %v2600_v45, %v412_v59  ;;  %v451_v59 = vld [vmem:[#allocation3 + $0xcb0] sm:$0xff] }
  0xdb   :  { %1477 = vadd.xlane.f32.xlu0 %v1476_v0  ;;  %v984_v55 = vmul.f32 %v2579_v20, %v436_v4  ;;  %v985_v36 = vmul.f32 %v2581_v21, %v437_v37  ;;  %v996_v53 = vmul.f32 %v2568_v8, %v448_v31  ;;  %v1530_v57 = vadd.f32 %v994_v60, %v993_v7  ;;  %v444_v31 = vld [vmem:[#allocation3 + $0xc78] sm:$0xff]  ;;  %v453_v0 = vld [vmem:[#allocation3 + $0xcc0] sm:$0xff] }
  0xdc   :  { %v1610_v27 = vadd.f32 %v1609_v56, %v3358_v6  ;;  %v1487_v50 = vadd.f32 %v1486_v24, %v954_v25  ;;  %v1517_v23 = vadd.f32 %v1516_v41, %v982_v13  ;;  %v986_v12 = vmul.f32 %v2583_v22, %v438_v43  ;;  %v442_v6 = vld [vmem:[#allocation3 + $0xc68] sm:$0xff]  ;;  %v443_v25 = vld [vmem:[#allocation3 + $0xc70] sm:$0xff]  ;;  %v452_v60 = vld [vmem:[#allocation3 + $0xcb8] sm:$0xff] }
  0xdd   :  { %v987_v48 = vmul.f32 %v2588_v32, %v439_v18  ;;  %v3406_v28 = vmul.f32 %v2590_v33, %v440_v29  ;;  %v997_v42 = vmul.f32 %v2572_v15, %v449_v44  ;;  %v1531_v7 = vadd.f32 %v1530_v57, %v995_v52  ;;  %v454_v18 = vld [vmem:[#allocation3 + $0xcc8] sm:$0xff]  ;;  %v455_v41 = vld [vmem:[#allocation3 + $0xcd0] sm:$0xff]  ;;  %v456_v52 = vld [vmem:[#allocation3 + $0xcd8] sm:$0xff] }
  0xde   :  { %v1611_v40 = vadd.f32 %v1610_v27, %v3361_v46  ;;  %v1488_v47 = vadd.f32 %v1487_v50, %v955_v14  ;;  %v1518_v13 = vadd.f32 %v1517_v23, %v983_v51  ;;  %v3411_v49 = vmul.f32 %v2592_v34, %v441_v9  ;;  %v480_v51 = vld [vmem:[#allocation3 + $0xd98] sm:$0xff]  ;;  %v457_v27 = vld [vmem:[#allocation3 + $0xce0] sm:$0xff] }
  0xdf   :  { %v998_v61 = vmul.f32 %v2574_v16, %v450_v10  ;;  %v1025_v4 = vmul.f32 %v2562_v1, %v477_v3  ;;  %v1026_v37 = vmul.f32 %v2564_v2, %v478_v38  ;;  %v1532_v44 = vadd.f32 %v1531_v7, %v996_v53  ;;  %v481_v53 = vld [vmem:[#allocation3 + $0xda0] sm:$0xff] }
  0xe0   :  { %v1612_v54 = vadd.f32 %v1611_v40, %v3367_v17  ;;  %v1489_v46 = vadd.f32 %v1488_v47, %v3376_v30  ;;  %v1519_v14 = vadd.f32 %v1518_v13, %v984_v55  ;;  %v3419_v56 = vmul.f32 %v2594_v35, %v442_v6  ;;  %v493_v40 = vld [vmem:[#allocation3 + $0xe00] sm:$0xff]  ;;  %v494_v47 = vld [vmem:[#allocation3 + $0xe08] sm:$0xff] }
  0xe1   :  { %v3422_v24 = vmul.f32 %v2596_v39, %v443_v25  ;;  %v3425_v43 = vmul.f32 %v2600_v45, %v444_v31  ;;  %v1027_v29 = vmul.f32 %v2566_v5, %v479_v11  ;;  %v999_v55 = vmul.f32 %v2577_v19, %v451_v59  ;;  %v482_v11 = vld [vmem:[#allocation3 + $0xda8] sm:$0xff] }
  0xe2   :  { %1613 = vadd.xlane.f32.xlu2 %v1612_v54  ;;  %v1490_v17 = vadd.f32 %v1489_v46, %v3381_v58  ;;  %v1520_v30 = vadd.f32 %v1519_v14, %v985_v36  ;;  %v1533_v10 = vadd.f32 %v1532_v44, %v997_v42  ;;  %v1000_v50 = vmul.f32 %v2579_v20, %v452_v60  ;;  %v458_v6 = vld [vmem:[#allocation3 + $0xce8] sm:$0xff]  ;;  %v484_v54 = vld [vmem:[#allocation3 + $0xdb8] sm:$0xff]  ;;  %v485_v46 = vld [vmem:[#allocation3 + $0xdc0] sm:$0xff] }
  0xe3   :  { %v1001_v9 = vmul.f32 %v2581_v21, %v453_v0  ;;  %v1028_v23 = vmul.f32 %v2568_v8, %v480_v51  ;;  %v1564_v57 = vadd.f32 %v1026_v37, %v1025_v4  ;;  %v1002_v58 = vmul.f32 %v2583_v22, %v454_v18  ;;  %v459_v4 = vld [vmem:[#allocation3 + $0xcf0] sm:$0xff] }
  0xe4   :  { %v1491_v3 = vadd.f32 %v1490_v17, %v3388_v63  ;;  %v1521_v38 = vadd.f32 %v1520_v30, %v986_v12  ;;  %v1534_v36 = vadd.f32 %v1533_v10, %v998_v61  ;;  %v1003_v42 = vmul.f32 %v2588_v32, %v455_v41  ;;  %v483_v61 = vld [vmem:[#allocation3 + $0xdb0] sm:$0xff]  ;;  %v496_v17 = vld [vmem:[#allocation3 + $0xe18] sm:$0xff] }
  0xe5   :  { %v1004_v25 = vmul.f32 %v2590_v33, %v456_v52  ;;  %v1029_v31 = vmul.f32 %v2572_v15, %v481_v53  ;;  %v1565_v13 = vadd.f32 %v1564_v57, %v1027_v29  ;;  %v3440_v63 = vmul.f32 %v2592_v34, %v457_v27  ;;  %v495_v37 = vld [vmem:[#allocation3 + $0xe10] sm:$0xff]  ;;  %v486_v29 = vld [vmem:[#allocation3 + $0xdc8] sm:$0xff]  ;;  %v488_v57 = vld [vmem:[#allocation3 + $0xdd8] sm:$0xff] }
  0xe6   :  { %v1492_v7 = vadd.f32 %v1491_v3, %v3391_v62  ;;  %v1522_v59 = vadd.f32 %v1521_v38, %v987_v48  ;;  %v1535_v12 = vadd.f32 %v1534_v36, %v999_v55  ;;  %v1030_v14 = vmul.f32 %v2574_v16, %v482_v11  ;;  %v487_v41 = vld [vmem:[#allocation3 + $0xdd0] sm:$0xff]  ;;  %v498_v36 = vld [vmem:[#allocation3 + $0xe28] sm:$0xff] }
  0xe7   :  { %v1566_v60 = vadd.f32 %v1565_v13, %v1028_v23  ;;  %v1041_v0 = vmul.f32 %v2562_v1, %v493_v40  ;;  %v1042_v44 = vmul.f32 %v2564_v2, %v494_v47  ;;  %v3448_v48 = vmul.f32 %v2594_v35, %v458_v6  ;;  %v1121_v23 = vpop.xlane.xlu0 %1120 }
  0xe8   :  { %v1493_v51 = vadd.f32 %v1492_v7, %v3397_v26  ;;  %v1523_v62 = vadd.f32 %v1522_v59, %v3406_v28  ;;  %v1536_v18 = vadd.f32 %v1535_v12, %v1000_v50  ;;  %v3451_v30 = vmul.f32 %v2596_v39, %v459_v4  ;;  %v497_v50 = vld [vmem:[#allocation3 + $0xe20] sm:$0xff] }
  0xe9   :  { %v1031_v52 = vmul.f32 %v2577_v19, %v483_v61  ;;  %v1567_v55 = vadd.f32 %v1566_v60, %v1029_v31  ;;  %v1043_v10 = vmul.f32 %v2566_v5, %v495_v37  ;;  %v1032_v28 = vmul.f32 %v2579_v20, %v484_v54  ;;  %v500_v54 = vld [vmem:[#allocation3 + $0xe38] sm:$0xff] }
  0xea   :  { %1494 = vadd.xlane.f32.xlu1 %v1493_v51  ;;  %v1524_v26 = vadd.f32 %v1523_v62, %v3411_v49  ;;  %v1537_v53 = vadd.f32 %v1536_v18, %v1001_v9  ;;  %v1033_v27 = vmul.f32 %v2581_v21, %v485_v46  ;;  %v1034_v3 = vmul.f32 %v2583_v22, %v486_v29  ;;  %v460_v18 = vld [vmem:[#allocation3 + $0xcf8] sm:$0xff]  ;;  %v489_v29 = vld [vmem:[#allocation3 + $0xde0] sm:$0xff] }
  0xeb   :  { %v1568_v38 = vadd.f32 %v1567_v55, %v1030_v14  ;;  %v1044_v11 = vmul.f32 %v2568_v8, %v496_v17  ;;  %v1581_v40 = vadd.f32 %v1042_v44, %v1041_v0  ;;  %v1035_v49 = vmul.f32 %v2588_v32, %v487_v41  ;;  %v525_v0 = vld [vmem:[#allocation3 + $0xf00] sm:$0xff] }
  0xec   :  { %v1525_v47 = vadd.f32 %v1524_v26, %v3419_v56  ;;  %v1538_v6 = vadd.f32 %v1537_v53, %v1002_v58  ;;  %v3465_v9 = vstv %s3690_s2  ;;  %v1045_v13 = vmul.f32 %v2572_v15, %v497_v50  ;;  %v499_v58 = vld [vmem:[#allocation3 + $0xe30] sm:$0xff]  ;;  %v501_v26 = vld [vmem:[#allocation3 + $0xe40] sm:$0xff]  ;;  %v490_v50 = vld [vmem:[#allocation3 + $0xde8] sm:$0xff] }
  0xed   :  { %v1569_v31 = vadd.f32 %v1568_v38, %v1031_v52  ;;  %v1582_v7 = vadd.f32 %v1581_v40, %v1043_v10  ;;  %v3469_v59 = vadd.f32 %v3465_v9, %v1121_v23  ;;  %v1036_v56 = vmul.f32 %v2590_v33, %v488_v57  ;;  %v527_v53 = vld [vmem:[#allocation3 + $0xf10] sm:$0xff]  ;;  %v502_v23 = vld [vmem:[#allocation3 + $0xe48] sm:$0xff] }
  0xee   :  { %v1526_v4 = vadd.f32 %v1525_v47, %v3422_v24  ;;  %v1539_v12 = vadd.f32 %v1538_v6, %v1003_v42  ;;  %v1046_v61 = vmul.f32 %v2574_v16, %v498_v36  ;;  %v526_v42 = vld [vmem:[#allocation3 + $0xf08] sm:$0xff]  ;;  %v1047_v41 = vmul.f32 %v2577_v19, %v499_v58  ;;  %v528_v6 = vld [vmem:[#allocation3 + $0xf18] sm:$0xff] }
  0xef   :  { %v1570_v37 = vadd.f32 %v1569_v31, %v1032_v28  ;;  %v1583_v46 = vadd.f32 %v1582_v7, %v1044_v11  ;;  %v1715_v14 = vperm.slane %v3469_v59, 0  ;;  %v1716_v60 = vperm.slane %v3469_v59, 1  ;;  %v491_v31 = vld [vmem:[#allocation3 + $0xdf0] sm:$0xff] }
  0xf0   :  { %v1527_v44 = vadd.f32 %v1526_v4, %v3425_v43  ;;  %v1540_v51 = vadd.f32 %v1539_v12, %v1004_v25  ;;  %v1717_v62 = vperm.slane %v3469_v59, 2  ;;  %v1718_v24 = vperm.slane %v3469_v59, 3  ;;  %v503_v7 = vld [vmem:[#allocation3 + $0xe50] sm:$0xff] }
  0xf1   :  { %v1571_v17 = vadd.f32 %v1570_v37, %v1033_v27  ;;  %v1584_v52 = vadd.f32 %v1583_v46, %v1045_v13  ;;  %v1719_v55 = vperm.slane %v3469_v59, 4  ;;  %1971 = vst [vmem:[#allocation1] ss:$9 sm:$0xff] %v1715_v14  ;;  %v1048_v43 = vmul.f32 %v2579_v20, %v500_v54  ;;  %v492_v13 = vld [vmem:[#allocation3 + $0xdf8] sm:$0xff]  ;;  %v505_v14 = vld [vmem:[#allocation3 + $0xe60] sm:$0xff] }
  0xf2   :  { %1528 = vadd.xlane.f32.xlu0 %v1527_v44  ;;  %v1541_v10 = vadd.f32 %v1540_v51, %v3440_v63  ;;  %v1720_v25 = vperm.slane %v3469_v59, 5  ;;  %1973 = vst [vmem:[#allocation1 + $0x1] ss:$9 sm:$0xff] %v1716_v60  ;;  %v1073_v28 = vmul.f32 %v2562_v1, %v525_v0  ;;  %v1721_v38 = vperm.slane %v3469_v59, 6  ;;  %v504_v37 = vld [vmem:[#allocation3 + $0xe58] sm:$0xff]  ;;  %v541_v44 = vld [vmem:[#allocation3 + $0xf80] sm:$0xff] }
  0xf3   :  { %v1572_v27 = vadd.f32 %v1571_v17, %v1034_v3  ;;  %v1585_v57 = vadd.f32 %v1584_v52, %v1046_v61  ;;  %1975 = vst [vmem:[#allocation1 + $0x2] ss:$9 sm:$0xff] %v1717_v62  ;;  %v1074_v36 = vmul.f32 %v2564_v2, %v526_v42  ;;  %v1008_v63 = vmul.f32 %v2600_v45, %v460_v18  ;;  %v542_v51 = vld [vmem:[#allocation3 + $0xf88] sm:$0xff] }
  0xf4   :  { %v1542_v11 = vadd.f32 %v1541_v10, %v3448_v48  ;;  %v1037_v40 = vmul.f32 %v2592_v34, %v489_v29  ;;  %v1722_v47 = vperm.slane %v3469_v59, 7  ;;  %1977 = vst [vmem:[#allocation1 + $0x3] ss:$9 sm:$0xff] %v1718_v24  ;;  %v1049_v4 = vmul.f32 %v2581_v21, %v501_v26  ;;  %v529_v59 = vld [vmem:[#allocation3 + $0xf20] sm:$0xff]  ;;  %v530_v18 = vld [vmem:[#allocation3 + $0xf28] sm:$0xff]  ;;  %v531_v29 = vld [vmem:[#allocation3 + $0xf30] sm:$0xff] }
  0xf5   :  { %v1573_v3 = vadd.f32 %v1572_v27, %v1035_v49  ;;  %v1586_v12 = vadd.f32 %v1585_v57, %v1047_v41  ;;  %1979 = vst [vmem:[#allocation1 + $0x4] ss:$9 sm:$0xff] %v1719_v55  ;;  %v1075_v58 = vmul.f32 %v2566_v5, %v527_v53  ;;  %v1038_v48 = vmul.f32 %v2594_v35, %v490_v50  ;;  %v507_v41 = vld [vmem:[#allocation3 + $0xe70] sm:$0xff]  ;;  %v532_v53 = vld [vmem:[#allocation3 + $0xf38] sm:$0xff] }
  0xf6   :  { %v1543_v61 = vadd.f32 %v1542_v11, %v3451_v30  ;;  %v1050_v54 = vmul.f32 %v2583_v22, %v502_v23  ;;  %1981 = vst [vmem:[#allocation1 + $0x5] ss:$9 sm:$0xff] %v1720_v25  ;;  %v1076_v49 = vmul.f32 %v2568_v8, %v528_v6  ;;  %v1615_v0 = vadd.f32 %v1074_v36, %v1073_v28  ;;  %v543_v26 = vld [vmem:[#allocation3 + $0xf90] sm:$0xff]  ;;  %v544_v36 = vld [vmem:[#allocation3 + $0xf98] sm:$0xff] }
  0xf7   :  { %v1574_v46 = vadd.f32 %v1573_v3, %v1036_v56  ;;  %v1587_v60 = vadd.f32 %v1586_v12, %v1048_v43  ;;  %1983 = vst [vmem:[#allocation1 + $0x6] ss:$9 sm:$0xff] %v1721_v38  ;;  %v1039_v24 = vmul.f32 %v2596_v39, %v491_v31  ;;  %v1040_v30 = vmul.f32 %v2600_v45, %v492_v13  ;;  %v506_v56 = vld [vmem:[#allocation3 + $0xe68] sm:$0xff]  ;;  %v1138_v31 = vpop.xlane.xlu0 %1137 }
  0xf8   :  { %v1544_v62 = vadd.f32 %v1543_v61, %v1008_v63  ;;  %v1051_v42 = vmul.f32 %v2588_v32, %v503_v7  ;;  %1985 = vst [vmem:[#allocation1 + $0x7] ss:$9 sm:$0xff] %v1722_v47  ;;  %v1077_v55 = vmul.f32 %v2572_v15, %v529_v59  ;;  %v1616_v10 = vadd.f32 %v1615_v0, %v1075_v58  ;;  %v545_v63 = vld [vmem:[#allocation3 + $0xfa0] sm:$0xff] }
  0xf9   :  { %v1575_v17 = vadd.f32 %v1574_v46, %v1037_v40  ;;  %v1588_v52 = vadd.f32 %v1587_v60, %v1049_v4  ;;  %v1052_v43 = vmul.f32 %v2590_v33, %v504_v37  ;;  %v1053_v25 = vmul.f32 %v2592_v34, %v505_v14  ;;  %v533_v7 = vld [vmem:[#allocation3 + $0xf40] sm:$0xff]  ;;  %v508_v37 = vld [vmem:[#allocation3 + $0xe78] sm:$0xff]  ;;  %v546_v46 = vld [vmem:[#allocation3 + $0xfa8] sm:$0xff] }
  0xfa   :  { %1545 = vadd.xlane.f32.xlu1 %v1544_v62  ;;  %v1089_v28 = vmul.f32 %v2562_v1, %v541_v44  ;;  %v1090_v50 = vmul.f32 %v2564_v2, %v542_v51  ;;  %v1078_v57 = vmul.f32 %v2574_v16, %v530_v18  ;;  %v1617_v38 = vadd.f32 %v1616_v10, %v1076_v49  ;;  %v534_v14 = vld [vmem:[#allocation3 + $0xf48] sm:$0xff]  ;;  %v535_v18 = vld [vmem:[#allocation3 + $0xf50] sm:$0xff]  ;;  %v548_v10 = vld [vmem:[#allocation3 + $0xfb8] sm:$0xff] }
  0xfb   :  { %v1576_v27 = vadd.f32 %v1575_v17, %v1038_v48  ;;  %v1589_v23 = vadd.f32 %v1588_v52, %v1050_v54  ;;  %v1054_v11 = vmul.f32 %v2594_v35, %v506_v56  ;;  %v1055_v40 = vmul.f32 %v2596_v39, %v507_v41 }
  0xfc   :  { %v1079_v47 = vmul.f32 %v2577_v19, %v531_v29  ;;  %v1091_v6 = vmul.f32 %v2566_v5, %v543_v26  ;;  %v1080_v2 = vmul.f32 %v2579_v20, %v532_v53  ;;  %v1618_v3 = vadd.f32 %v1617_v38, %v1077_v55  ;;  %v537_v38 = vld [vmem:[#allocation3 + $0xf60] sm:$0xff] }
  0xfd   :  { %v1577_v13 = vadd.f32 %v1576_v27, %v1039_v24  ;;  %v1590_v1 = vadd.f32 %v1589_v23, %v1051_v42  ;;  %v1092_v4 = vmul.f32 %v2568_v8, %v544_v36  ;;  %v1093_v12 = vmul.f32 %v2572_v15, %v545_v63  ;;  %v547_v24 = vld [vmem:[#allocation3 + $0xfb0] sm:$0xff]  ;;  %v549_v23 = vld [vmem:[#allocation3 + $0xfc0] sm:$0xff] }
  0xfe   :  { %v1632_v58 = vadd.f32 %v1090_v50, %v1089_v28  ;;  %v3514_v61 = vadd.f32 %v3465_v9, %v1138_v31  ;;  %v1619_v5 = vadd.f32 %v1618_v3, %v1078_v57  ;;  %v2535_v44 = vmov 0   ;;  %v550_v31 = vld [vmem:[#allocation3 + $0xfc8] sm:$0xff] }
  0xff   :  { %v1578_v48 = vadd.f32 %v1577_v13, %v1040_v30  ;;  %v1591_v54 = vadd.f32 %v1590_v1, %v1052_v43  ;;  %v1986_v59 = vld [vmem:[#allocation1] sm:$0xff]  ;;  %2476 = vset.pattern.permute.xlu2 %v2535_v44  ;;  %2477 = vset.pattern.permute.xlu0 %v2535_v44  ;;  %v1081_v51 = vmul.f32 %v2581_v21, %v533_v7  ;;  %v551_v7 = vld [vmem:[#allocation3 + $0xfd0] sm:$0xff]  ;;  %vm2375_vm2 = vcmask 261312  }
 0x100   :  { %v1633_v60 = vadd.f32 %v1632_v58, %v1091_v6  ;;  %v1723_v49 = vperm.slane %v3514_v61, 0  ;;  %v1724_v0 = vperm.slane %v3514_v61, 1  ;;  %v1725_v8 = vperm.slane %v3514_v61, 2  ;;  %2267 = vperm.xlu2 %2476, %v1986_v59   ;;  %2478 = vset.pattern.permute.xlu1 %v2535_v44  ;;  %v536_v43 = vld [vmem:[#allocation3 + $0xf58] sm:$0xff] }
 0x101   :  { %1579 = vadd.xlane.f32.xlu0 %v1578_v48  ;;  %v1592_v15 = vadd.f32 %v1591_v54, %v1053_v25  ;;  %v1620_v62 = vadd.f32 %v1619_v5, %v1079_v47  ;;  %v1726_v30 = vperm.slane %v3514_v61, 3  ;;  %v1056_v42 = vmul.f32 %v2600_v45, %v508_v37  ;;  %v552_v37 = vld [vmem:[#allocation3 + $0xfd8] sm:$0xff] }
 0x102   :  { %v1094_v29 = vmul.f32 %v2574_v16, %v546_v46  ;;  %v1634_v17 = vadd.f32 %v1633_v60, %v1092_v4  ;;  %v1727_v56 = vperm.slane %v3514_v61, 4  ;;  %1987 = vst [vmem:[#allocation1] ss:$9 sm:$0xff] %v1723_v49  ;;  %v1082_v52 = vmul.f32 %v2583_v22, %v534_v14  ;;  %v539_v4 = vld [vmem:[#allocation3 + $0xf70] sm:$0xff]  ;;  %v540_v54 = vld [vmem:[#allocation3 + $0xf78] sm:$0xff]  ;;  %v553_v14 = vld [vmem:[#allocation3 + $0xfe0] sm:$0xff] }
 0x103   :  { %v1593_v41 = vadd.f32 %v1592_v15, %v1054_v11  ;;  %v1621_v55 = vadd.f32 %v1620_v62, %v1080_v2  ;;  %v1728_v26 = vperm.slane %v3514_v61, 5  ;;  %1988 = vst [vmem:[#allocation1 + $0x1] ss:$9 sm:$0xff] %v1724_v0  ;;  %v1095_v25 = vmul.f32 %v2577_v19, %v547_v24  ;;  %v1155_v11 = vpop.xlane.xlu1 %1154  ;;  %v554_v15 = vld [vmem:[#allocation3 + $0xfe8] sm:$0xff] }
 0x104   :  { %v1635_v53 = vadd.f32 %v1634_v17, %v1093_v12  ;;  %v1729_v28 = vperm.slane %v3514_v61, 6  ;;  %1989 = vst [vmem:[#allocation1 + $0x2] ss:$9 sm:$0xff] %v1725_v8  ;;  %v1083_v50 = vmul.f32 %v2588_v32, %v535_v18  ;;  %v1730_v57 = vperm.slane %v3514_v61, 7  ;;  %v555_v18 = vld [vmem:[#allocation3 + $0xff0] sm:$0xff] }
 0x105   :  { %v1594_v16 = vadd.f32 %v1593_v41, %v1055_v40  ;;  %v1622_v27 = vadd.f32 %v1621_v55, %v1081_v51  ;;  %1990 = vst [vmem:[#allocation1 + $0x3] ss:$9 sm:$0xff] %v1726_v30  ;;  %v1096_v36 = vmul.f32 %v2579_v20, %v548_v10  ;;  %v1084_v19 = vmul.f32 %v2590_v33, %v536_v43  ;;  %v538_v40 = vld [vmem:[#allocation3 + $0xf68] sm:$0xff] }
 0x106   :  { %v1636_v63 = vadd.f32 %v1635_v53, %v1094_v29  ;;  %1991 = vst [vmem:[#allocation1 + $0x4] ss:$9 sm:$0xff] %v1727_v56  ;;  %v1097_v13 = vmul.f32 %v2581_v21, %v549_v23  ;;  %v1085_v2 = vmul.f32 %v2592_v34, %v537_v38  ;;  %v1653_v20 = vadd.f32 %v3465_v9, %v1155_v11  ;;  %v1189_v11 = vpop.xlane.xlu2 %1188 }
 0x107   :  { %v1595_v47 = vadd.f32 %v1594_v16, %v1056_v42  ;;  %v1623_v6 = vadd.f32 %v1622_v27, %v1082_v52  ;;  %1992 = vst [vmem:[#allocation1 + $0x5] ss:$9 sm:$0xff] %v1728_v26  ;;  %v1098_v12 = vmul.f32 %v2583_v22, %v550_v31  ;;  %v1086_v61 = vmul.f32 %v2594_v35, %v538_v40  ;;  %v556_v52 = vld [vmem:[#allocation3 + $0xff8] sm:$0xff] }
 0x108   :  { %v1637_v1 = vadd.f32 %v1636_v63, %v1095_v25  ;;  %1993 = vst [vmem:[#allocation1 + $0x6] ss:$9 sm:$0xff] %v1729_v28  ;;  %v1099_v21 = vmul.f32 %v2588_v32, %v551_v7  ;;  %v1087_v5 = vmul.f32 %v2596_v39, %v539_v4  ;;  %v1731_v60 = vperm.slane %v1653_v20, 0 }
 0x109   :  { %1596 = vadd.xlane.f32.xlu1 %v1595_v47  ;;  %v1624_v3 = vadd.f32 %v1623_v6, %v1083_v50  ;;  %1994 = vst [vmem:[#allocation1 + $0x7] ss:$9 sm:$0xff] %v1730_v57  ;;  %v1100_v49 = vmul.f32 %v2590_v33, %v552_v37  ;;  %v1732_v8 = vperm.slane %v1653_v20, 1  ;;  %v1088_v22 = vmul.f32 %v2600_v45, %v540_v54 }
 0x10a   :  { %v1638_v58 = vadd.f32 %v1637_v1, %v1096_v36  ;;  %v1733_v51 = vperm.slane %v1653_v20, 2  ;;  %v1101_v62 = vmul.f32 %v2592_v34, %v553_v14  ;;  %v1734_v32 = vperm.slane %v1653_v20, 3 }
 0x10b   :  { %v1625_v48 = vadd.f32 %v1624_v3, %v1084_v19  ;;  %v1735_v29 = vperm.slane %v1653_v20, 4  ;;  %v1102_v17 = vmul.f32 %v2594_v35, %v554_v15  ;;  %v1736_v33 = vperm.slane %v1653_v20, 5  ;;  %v1172_v43 = vpop.xlane.xlu1 %1171 }
 0x10c   :  { %v1639_v59 = vadd.f32 %v1638_v58, %v1097_v13  ;;  %v1737_v55 = vperm.slane %v1653_v20, 6  ;;  %v1103_v10 = vmul.f32 %v2596_v39, %v555_v18  ;;  %v1738_v34 = vperm.slane %v1653_v20, 7 }
 0x10d   :  { %v1626_v46 = vadd.f32 %v1625_v48, %v1085_v2  ;;  %v1104_v25 = vmul.f32 %v2600_v45, %v556_v52  ;;  %v1654_v28 = vadd.f32 %v3465_v9, %v1172_v43  ;;  %v1655_v47 = vadd.f32 %v3465_v9, %v1189_v11 }
 0x10e   :  { %v1640_v0 = vadd.f32 %v1639_v59, %v1098_v12  ;;  %v1206_v20 = vpop.xlane.xlu2 %1205  ;;  %vm2379_vm3 = vcmask 326912   ;;  %vm2383_vm4 = vcmask 392512   ;;  %vm2387_vm5 = vcmask 458112  }
 0x10f   :  { %v1627_v44 = vadd.f32 %v1626_v46, %v1086_v61  ;;  %v1739_v50 = vperm.slane %v1654_v28, 0  ;;  %v1740_v27 = vperm.slane %v1654_v28, 1  ;;  %v1741_v39 = vperm.slane %v1654_v28, 2  ;;  %v1223_v46 = vpop.xlane.xlu0 %1222 }
 0x110   :  { %v1641_v24 = vadd.f32 %v1640_v0, %v1099_v21  ;;  %v1995_v30 = vld [vmem:[#allocation1] sm:$0xff]  ;;  %v1742_v57 = vperm.slane %v1654_v28, 3  ;;  %v1743_v38 = vperm.slane %v1654_v28, 4  ;;  %v1744_v36 = vperm.slane %v1654_v28, 5 }
 0x111   :  { %v1628_v42 = vadd.f32 %v1627_v44, %v1087_v5  ;;  %1996 = vst [vmem:[#allocation1] ss:$9 sm:$0xff] %v1731_v60  ;;  %v1745_v63 = vperm.slane %v1654_v28, 6  ;;  %v1746_v45 = vperm.slane %v1654_v28, 7  ;;  %v1747_v19 = vperm.slane %v1655_v47, 0 }
 0x112   :  { %v1642_v56 = vadd.f32 %v1641_v24, %v1100_v49  ;;  %1997 = vst [vmem:[#allocation1 + $0x1] ss:$9 sm:$0xff] %v1732_v8  ;;  %v1748_v6 = vperm.slane %v1655_v47, 1  ;;  %v1749_v31 = vperm.slane %v1655_v47, 2  ;;  %v1750_v40 = vperm.slane %v1655_v47, 3 }
 0x113   :  { %v1629_v41 = vadd.f32 %v1628_v42, %v1088_v22  ;;  %1998 = vst [vmem:[#allocation1 + $0x2] ss:$9 sm:$0xff] %v1733_v51  ;;  %v1751_v1 = vperm.slane %v1655_v47, 4  ;;  %v1752_v2 = vperm.slane %v1655_v47, 5  ;;  %v1753_v3 = vperm.slane %v1655_v47, 6  ;;  %v1240_v24 = vpop.xlane.xlu1 %1239 }
 0x114   :  { %v1643_v26 = vadd.f32 %v1642_v56, %v1101_v62  ;;  %1999 = vst [vmem:[#allocation1 + $0x3] ss:$9 sm:$0xff] %v1734_v32  ;;  %v1754_v7 = vperm.slane %v1655_v47, 7  ;;  %v1656_v4 = vadd.f32 %v3465_v9, %v1206_v20  ;;  %v1657_v14 = vadd.f32 %v3465_v9, %v1223_v46 }
 0x115   :  { %1630 = vadd.xlane.f32.xlu0 %v1629_v41  ;;  %2000 = vst [vmem:[#allocation1 + $0x4] ss:$9 sm:$0xff] %v1735_v29  ;;  %vm2391_vm6 = vcmask 523712   ;;  %vm2395_vm7 = vcmask 589312   ;;  %vm2399_vm8 = vcmask 654912   ;;  %vm2403_vm9 = vcmask 720512  }
 0x116   :  { %v1644_v53 = vadd.f32 %v1643_v26, %v1102_v17  ;;  %2001 = vst [vmem:[#allocation1 + $0x5] ss:$9 sm:$0xff] %v1736_v33  ;;  %v1755_v12 = vperm.slane %v1656_v4, 0  ;;  %v1756_v58 = vperm.slane %v1656_v4, 1  ;;  %v1757_v61 = vperm.slane %v1656_v4, 2 }
 0x117   :  { %2002 = vst [vmem:[#allocation1 + $0x6] ss:$9 sm:$0xff] %v1737_v55  ;;  %v1758_v37 = vperm.slane %v1656_v4, 3  ;;  %v1759_v54 = vperm.slane %v1656_v4, 4  ;;  %v1760_v21 = vperm.slane %v1656_v4, 5  ;;  %v1761_v59 = vperm.slane %v1656_v4, 6  ;;  %v1257_v55 = vpop.xlane.xlu2 %1256 }
 0x118   :  { %v1645_v35 = vadd.f32 %v1644_v53, %v1103_v10  ;;  %2003 = vst [vmem:[#allocation1 + $0x7] ss:$9 sm:$0xff] %v1738_v34  ;;  %v1762_v5 = vperm.slane %v1656_v4, 7  ;;  %v1763_v60 = vperm.slane %v1657_v14, 0  ;;  %v1764_v49 = vperm.slane %v1657_v14, 1 }
 0x119   :  { %v1765_v0 = vperm.slane %v1657_v14, 2  ;;  %v1766_v22 = vperm.slane %v1657_v14, 3  ;;  %v1767_v44 = vperm.slane %v1657_v14, 4  ;;  %v1768_v15 = vperm.slane %v1657_v14, 5 }
 0x11a   :  { %v1646_v16 = vadd.f32 %v1645_v35, %v1104_v25  ;;  %v1769_v51 = vperm.slane %v1657_v14, 6  ;;  %v1770_v62 = vperm.slane %v1657_v14, 7  ;;  %v1659_v10 = vadd.f32 %v3465_v9, %v1257_v55 }
 0x11b   :  { %vm2407_vm10 = vcmask 786112   ;;  %vm2411_vm11 = vcmask 851712   ;;  %vm2415_vm12 = vcmask 917312   ;;  %vm2419_vm13 = vcmask 982912  }
 0x11c   :  { %1647 = vadd.xlane.f32.xlu1 %v1646_v16  ;;  %v1779_v26 = vperm.slane %v1659_v10, 0  ;;  %v1780_v34 = vperm.slane %v1659_v10, 1  ;;  %v1781_v43 = vperm.slane %v1659_v10, 2  ;;  %v1782_v25 = vperm.slane %v1659_v10, 3 }
 0x11d   :  { %v1783_v35 = vperm.slane %v1659_v10, 4  ;;  %v1784_v28 = vperm.slane %v1659_v10, 5  ;;  %v1785_v16 = vperm.slane %v1659_v10, 6  ;;  %vm2423_vm14 = vcmask 1048512  }
 0x11e   :  { %vm2457_vm15 = vcmask 1040384  }
 0x11f   :  { %v2004_v23 = vld [vmem:[#allocation1] sm:$0xff] }
 0x120   :  { %2005 = vst [vmem:[#allocation1] ss:$9 sm:$0xff] %v1739_v50  ;;  %v1786_v50 = vperm.slane %v1659_v10, 7 }
 0x121   :  { %2006 = vst [vmem:[#allocation1 + $0x1] ss:$9 sm:$0xff] %v1740_v27  ;;  %v1274_v27 = vpop.xlane.xlu0 %1273 }
 0x122   :  { %2007 = vst [vmem:[#allocation1 + $0x2] ss:$9 sm:$0xff] %v1741_v39  ;;  %v1660_v39 = vadd.f32 %v3465_v9, %v1274_v27 }
 0x123   :  { %2008 = vst [vmem:[#allocation1 + $0x3] ss:$9 sm:$0xff] %v1742_v57 }
 0x124   :  { %2009 = vst [vmem:[#allocation1 + $0x4] ss:$9 sm:$0xff] %v1743_v38  ;;  %v1788_v57 = vperm.slane %v1660_v39, 1  ;;  %v1789_v38 = vperm.slane %v1660_v39, 2  ;;  %v1792_v11 = vperm.slane %v1660_v39, 5  ;;  %v1793_v47 = vperm.slane %v1660_v39, 6 }
 0x125   :  { %2010 = vst [vmem:[#allocation1 + $0x5] ss:$9 sm:$0xff] %v1744_v36 }
 0x126   :  { %2011 = vst [vmem:[#allocation1 + $0x6] ss:$9 sm:$0xff] %v1745_v63  ;;  %v1790_v63 = vperm.slane %v1660_v39, 3 }
 0x127   :  { %2012 = vst [vmem:[#allocation1 + $0x7] ss:$9 sm:$0xff] %v1746_v45  ;;  %v1791_v45 = vperm.slane %v1660_v39, 4 }
 0x129   :  { %2270 = vperm.xlu0 %2477, %v1995_v30   ;;  %v1658_v30 = vadd.f32 %v3465_v9, %v1240_v24 }
 0x12b   :  { %v1771_v32 = vperm.slane %v1658_v30, 0  ;;  %v1772_v42 = vperm.slane %v1658_v30, 1  ;;  %v1773_v18 = vperm.slane %v1658_v30, 2  ;;  %v1774_v17 = vperm.slane %v1658_v30, 3 }
 0x12c   :  { %v1775_v56 = vperm.slane %v1658_v30, 4  ;;  %v1776_v33 = vperm.slane %v1658_v30, 5  ;;  %v1777_v41 = vperm.slane %v1658_v30, 6  ;;  %v1778_v52 = vperm.slane %v1658_v30, 7 }
 0x12e   :  { %v2013_v13 = vld [vmem:[#allocation1] sm:$0xff] }
 0x12f   :  { %2014 = vst [vmem:[#allocation1] ss:$9 sm:$0xff] %v1747_v19  ;;  %2276 = vperm.xlu2 %2476, %v2013_v13   ;;  %v1794_v19 = vperm.slane %v1660_v39, 7 }
 0x130   :  { %2015 = vst [vmem:[#allocation1 + $0x1] ss:$9 sm:$0xff] %v1748_v6  ;;  %v1291_v6 = vpop.xlane.xlu1 %1290 }
 0x131   :  { %2016 = vst [vmem:[#allocation1 + $0x2] ss:$9 sm:$0xff] %v1749_v31  ;;  %v1661_v31 = vadd.f32 %v3465_v9, %v1291_v6 }
 0x132   :  { %2017 = vst [vmem:[#allocation1 + $0x3] ss:$9 sm:$0xff] %v1750_v40 }
 0x133   :  { %2018 = vst [vmem:[#allocation1 + $0x4] ss:$9 sm:$0xff] %v1751_v1  ;;  %v1795_v40 = vperm.slane %v1661_v31, 0  ;;  %v1796_v13 = vperm.slane %v1661_v31, 1  ;;  %v1797_v1 = vperm.slane %v1661_v31, 2  ;;  %v1800_v20 = vperm.slane %v1661_v31, 5 }
 0x134   :  { %2019 = vst [vmem:[#allocation1 + $0x5] ss:$9 sm:$0xff] %v1752_v2  ;;  %v1801_v4 = vperm.slane %v1661_v31, 6 }
 0x135   :  { %2020 = vst [vmem:[#allocation1 + $0x6] ss:$9 sm:$0xff] %v1753_v3  ;;  %2273 = vperm.xlu1 %2478, %v2004_v23   ;;  %v1787_v23 = vperm.slane %v1660_v39, 0  ;;  %v1798_v3 = vperm.slane %v1661_v31, 3 }
 0x136   :  { %2021 = vst [vmem:[#allocation1 + $0x7] ss:$9 sm:$0xff] %v1754_v7  ;;  %v1799_v7 = vperm.slane %v1661_v31, 4 }
 0x13d   :  { %v2022_v48 = vld [vmem:[#allocation1] sm:$0xff] }
 0x13e   :  { %2023 = vst [vmem:[#allocation1] ss:$9 sm:$0xff] %v1755_v12  ;;  %2279 = vperm.xlu2 %2476, %v2022_v48   ;;  %v1802_v12 = vperm.slane %v1661_v31, 7 }
 0x13f   :  { %2024 = vst [vmem:[#allocation1 + $0x1] ss:$9 sm:$0xff] %v1756_v58  ;;  %v1308_v58 = vpop.xlane.xlu2 %1307 }
 0x140   :  { %2025 = vst [vmem:[#allocation1 + $0x2] ss:$9 sm:$0xff] %v1757_v61  ;;  %v1662_v61 = vadd.f32 %v3465_v9, %v1308_v58 }
 0x141   :  { %2026 = vst [vmem:[#allocation1 + $0x3] ss:$9 sm:$0xff] %v1758_v37 }
 0x142   :  { %2027 = vst [vmem:[#allocation1 + $0x4] ss:$9 sm:$0xff] %v1759_v54  ;;  %v1803_v48 = vperm.slane %v1662_v61, 0  ;;  %v1804_v37 = vperm.slane %v1662_v61, 1  ;;  %v1805_v54 = vperm.slane %v1662_v61, 2  ;;  %v1808_v46 = vperm.slane %v1662_v61, 5 }
 0x143   :  { %2028 = vst [vmem:[#allocation1 + $0x5] ss:$9 sm:$0xff] %v1760_v21  ;;  %v1806_v21 = vperm.slane %v1662_v61, 3  ;;  %v1809_v14 = vperm.slane %v1662_v61, 6 }
 0x144   :  { %2029 = vst [vmem:[#allocation1 + $0x6] ss:$9 sm:$0xff] %v1761_v59 }
 0x145   :  { %2030 = vst [vmem:[#allocation1 + $0x7] ss:$9 sm:$0xff] %v1762_v5  ;;  %v1807_v5 = vperm.slane %v1662_v61, 4 }
 0x14c   :  { %v2031_v8 = vld [vmem:[#allocation1] sm:$0xff] }
 0x14d   :  { %2032 = vst [vmem:[#allocation1] ss:$9 sm:$0xff] %v1763_v60  ;;  %2282 = vperm.xlu1 %2478, %v2031_v8   ;;  %v1810_v60 = vperm.slane %v1662_v61, 7 }
 0x14e   :  { %2033 = vst [vmem:[#allocation1 + $0x1] ss:$9 sm:$0xff] %v1764_v49  ;;  %v1325_v49 = vpop.xlane.xlu0 %1324 }
 0x14f   :  { %2034 = vst [vmem:[#allocation1 + $0x2] ss:$9 sm:$0xff] %v1765_v0  ;;  %v1663_v0 = vadd.f32 %v3465_v9, %v1325_v49 }
 0x150   :  { %2035 = vst [vmem:[#allocation1 + $0x3] ss:$9 sm:$0xff] %v1766_v22 }
 0x151   :  { %2036 = vst [vmem:[#allocation1 + $0x4] ss:$9 sm:$0xff] %v1767_v44  ;;  %v1811_v8 = vperm.slane %v1663_v0, 0  ;;  %v1812_v22 = vperm.slane %v1663_v0, 1  ;;  %v1813_v44 = vperm.slane %v1663_v0, 2  ;;  %v1816_v24 = vperm.slane %v1663_v0, 5 }
 0x152   :  { %2037 = vst [vmem:[#allocation1 + $0x5] ss:$9 sm:$0xff] %v1768_v15  ;;  %v1817_v30 = vperm.slane %v1663_v0, 6 }
 0x153   :  { %2038 = vst [vmem:[#allocation1 + $0x6] ss:$9 sm:$0xff] %v1769_v51  ;;  %v1814_v51 = vperm.slane %v1663_v0, 3 }
 0x154   :  { %2039 = vst [vmem:[#allocation1 + $0x7] ss:$9 sm:$0xff] %v1770_v62  ;;  %v1815_v62 = vperm.slane %v1663_v0, 4 }
 0x15b   :  { %v2040_v29 = vld [vmem:[#allocation1] sm:$0xff] }
 0x15c   :  { %2041 = vst [vmem:[#allocation1] ss:$9 sm:$0xff] %v1771_v32  ;;  %2285 = vperm.xlu2 %2476, %v2040_v29   ;;  %v1818_v32 = vperm.slane %v1663_v0, 7 }
 0x15d   :  { %2042 = vst [vmem:[#allocation1 + $0x1] ss:$9 sm:$0xff] %v1772_v42  ;;  %v1342_v42 = vpop.xlane.xlu1 %1341 }
 0x15e   :  { %2043 = vst [vmem:[#allocation1 + $0x2] ss:$9 sm:$0xff] %v1773_v18  ;;  %v1664_v18 = vadd.f32 %v3465_v9, %v1342_v42 }
 0x15f   :  { %2044 = vst [vmem:[#allocation1 + $0x3] ss:$9 sm:$0xff] %v1774_v17 }
 0x160   :  { %2045 = vst [vmem:[#allocation1 + $0x4] ss:$9 sm:$0xff] %v1775_v56  ;;  %v1819_v29 = vperm.slane %v1664_v18, 0  ;;  %v1820_v17 = vperm.slane %v1664_v18, 1  ;;  %v1821_v56 = vperm.slane %v1664_v18, 2  ;;  %v1824_v55 = vperm.slane %v1664_v18, 5 }
 0x161   :  { %2046 = vst [vmem:[#allocation1 + $0x5] ss:$9 sm:$0xff] %v1776_v33  ;;  %v1825_v10 = vperm.slane %v1664_v18, 6 }
 0x162   :  { %2047 = vst [vmem:[#allocation1 + $0x6] ss:$9 sm:$0xff] %v1777_v41  ;;  %v1822_v41 = vperm.slane %v1664_v18, 3 }
 0x163   :  { %2048 = vst [vmem:[#allocation1 + $0x7] ss:$9 sm:$0xff] %v1778_v52  ;;  %v1823_v52 = vperm.slane %v1664_v18, 4 }
 0x16a   :  { %v2049_v53 = vld [vmem:[#allocation1] sm:$0xff] }
 0x16b   :  { %2050 = vst [vmem:[#allocation1] ss:$9 sm:$0xff] %v1779_v26  ;;  %2288 = vperm.xlu1 %2478, %v2049_v53   ;;  %v1826_v26 = vperm.slane %v1664_v18, 7 }
 0x16c   :  { %2051 = vst [vmem:[#allocation1 + $0x1] ss:$9 sm:$0xff] %v1780_v34  ;;  %v1359_v34 = vpop.xlane.xlu2 %1358 }
 0x16d   :  { %2052 = vst [vmem:[#allocation1 + $0x2] ss:$9 sm:$0xff] %v1781_v43  ;;  %v1665_v43 = vadd.f32 %v3465_v9, %v1359_v34 }
 0x16e   :  { %2053 = vst [vmem:[#allocation1 + $0x3] ss:$9 sm:$0xff] %v1782_v25 }
 0x16f   :  { %2054 = vst [vmem:[#allocation1 + $0x4] ss:$9 sm:$0xff] %v1783_v35  ;;  %v1827_v25 = vperm.slane %v1665_v43, 0  ;;  %v1828_v53 = vperm.slane %v1665_v43, 1  ;;  %v1829_v35 = vperm.slane %v1665_v43, 2  ;;  %v1832_v27 = vperm.slane %v1665_v43, 5 }
 0x170   :  { %2055 = vst [vmem:[#allocation1 + $0x5] ss:$9 sm:$0xff] %v1784_v28  ;;  %v1830_v28 = vperm.slane %v1665_v43, 3  ;;  %v1833_v39 = vperm.slane %v1665_v43, 6 }
 0x171   :  { %2056 = vst [vmem:[#allocation1 + $0x6] ss:$9 sm:$0xff] %v1785_v16 }
 0x172   :  { %2057 = vst [vmem:[#allocation1 + $0x7] ss:$9 sm:$0xff] %v1786_v50  ;;  %v1831_v50 = vperm.slane %v1665_v43, 4 }
 0x179   :  { %v2058_v36 = vld [vmem:[#allocation1] sm:$0xff] }
 0x17a   :  { %2059 = vst [vmem:[#allocation1] ss:$9 sm:$0xff] %v1787_v23  ;;  %2291 = vperm.xlu0 %2477, %v2058_v36   ;;  %v1834_v23 = vperm.slane %v1665_v43, 7 }
 0x17b   :  { %2060 = vst [vmem:[#allocation1 + $0x1] ss:$9 sm:$0xff] %v1788_v57  ;;  %v1376_v57 = vpop.xlane.xlu0 %1375 }
 0x17c   :  { %2061 = vst [vmem:[#allocation1 + $0x2] ss:$9 sm:$0xff] %v1789_v38  ;;  %v1666_v38 = vadd.f32 %v3465_v9, %v1376_v57 }
 0x17d   :  { %2062 = vst [vmem:[#allocation1 + $0x3] ss:$9 sm:$0xff] %v1790_v63 }
 0x17e   :  { %2063 = vst [vmem:[#allocation1 + $0x4] ss:$9 sm:$0xff] %v1791_v45  ;;  %v1835_v36 = vperm.slane %v1666_v38, 0  ;;  %v1836_v63 = vperm.slane %v1666_v38, 1  ;;  %v1837_v45 = vperm.slane %v1666_v38, 2  ;;  %v1840_v6 = vperm.slane %v1666_v38, 5 }
 0x17f   :  { %2064 = vst [vmem:[#allocation1 + $0x5] ss:$9 sm:$0xff] %v1792_v11  ;;  %v1841_v31 = vperm.slane %v1666_v38, 6 }
 0x180   :  { %2065 = vst [vmem:[#allocation1 + $0x6] ss:$9 sm:$0xff] %v1793_v47  ;;  %v1838_v47 = vperm.slane %v1666_v38, 3 }
 0x181   :  { %2066 = vst [vmem:[#allocation1 + $0x7] ss:$9 sm:$0xff] %v1794_v19  ;;  %v1839_v19 = vperm.slane %v1666_v38, 4 }
 0x188   :  { %v2067_v2 = vld [vmem:[#allocation1] sm:$0xff] }
 0x189   :  { %2068 = vst [vmem:[#allocation1] ss:$9 sm:$0xff] %v1795_v40  ;;  %2294 = vperm.xlu2 %2476, %v2067_v2   ;;  %v1842_v40 = vperm.slane %v1666_v38, 7  ;;  %v2362_v38 = vlaneseq }
 0x18a   :  { %2069 = vst [vmem:[#allocation1 + $0x1] ss:$9 sm:$0xff] %v1796_v13  ;;  %v1410_v13 = vpop.xlane.xlu2 %1409 }
 0x18b   :  { %2070 = vst [vmem:[#allocation1 + $0x2] ss:$9 sm:$0xff] %v1797_v1  ;;  %v1393_v1 = vpop.xlane.xlu1 %1392 }
 0x18c   :  { %2071 = vst [vmem:[#allocation1 + $0x3] ss:$9 sm:$0xff] %v1798_v3  ;;  %v1667_v2 = vadd.f32 %v3465_v9, %v1393_v1 }
 0x18d   :  { %2072 = vst [vmem:[#allocation1 + $0x4] ss:$9 sm:$0xff] %v1799_v7 }
 0x18e   :  { %2073 = vst [vmem:[#allocation1 + $0x5] ss:$9 sm:$0xff] %v1800_v20  ;;  %v1843_v3 = vperm.slane %v1667_v2, 0  ;;  %v1844_v7 = vperm.slane %v1667_v2, 1  ;;  %v1845_v20 = vperm.slane %v1667_v2, 2  ;;  %v1846_v58 = vperm.slane %v1667_v2, 3 }
 0x18f   :  { %2074 = vst [vmem:[#allocation1 + $0x6] ss:$9 sm:$0xff] %v1801_v4  ;;  %v1847_v61 = vperm.slane %v1667_v2, 4 }
 0x190   :  { %2075 = vst [vmem:[#allocation1 + $0x7] ss:$9 sm:$0xff] %v1802_v12 }
 0x192   :  { %v3559_v4 = vpop.xlane.xlu2 %1460 }
 0x197   :  { %v2076_v59 = vld [vmem:[#allocation1] sm:$0xff] }
 0x198   :  { %2077 = vst [vmem:[#allocation1] ss:$9 sm:$0xff] %v1803_v48  ;;  %2297 = vperm.xlu1 %2478, %v2076_v59   ;;  %v1848_v48 = vperm.slane %v1667_v2, 5  ;;  %v1668_v59 = vadd.f32 %v3465_v9, %v1410_v13 }
 0x199   :  { %2078 = vst [vmem:[#allocation1 + $0x1] ss:$9 sm:$0xff] %v1804_v37  ;;  %v1849_v37 = vperm.slane %v1667_v2, 6 }
 0x19a   :  { %2079 = vst [vmem:[#allocation1 + $0x2] ss:$9 sm:$0xff] %v1805_v54  ;;  %v1427_v54 = vpop.xlane.xlu0 %1426  ;;  %v1853_v0 = vperm.slane %v1668_v59, 2 }
 0x19b   :  { %2080 = vst [vmem:[#allocation1 + $0x3] ss:$9 sm:$0xff] %v1806_v21  ;;  %v1850_v21 = vperm.slane %v1667_v2, 7 }
 0x19c   :  { %2081 = vst [vmem:[#allocation1 + $0x4] ss:$9 sm:$0xff] %v1807_v5  ;;  %v3562_v5 = vpop.xlane.xlu2 %1511 }
 0x19d   :  { %2082 = vst [vmem:[#allocation1 + $0x5] ss:$9 sm:$0xff] %v1808_v46  ;;  %v1444_v46 = vpop.xlane.xlu1 %1443 }
 0x19e   :  { %2083 = vst [vmem:[#allocation1 + $0x6] ss:$9 sm:$0xff] %v1809_v14  ;;  %v1851_v14 = vperm.slane %v1668_v59, 0 }
 0x19f   :  { %2084 = vst [vmem:[#allocation1 + $0x7] ss:$9 sm:$0xff] %v1810_v60  ;;  %v1852_v60 = vperm.slane %v1668_v59, 1 }
 0x1a2   :  { %v3564_v49 = vpop.xlane.xlu0 %1477 }
 0x1a6   :  { %v2085_v15 = vld [vmem:[#allocation1] sm:$0xff] }
 0x1a7   :  { %2086 = vst [vmem:[#allocation1] ss:$9 sm:$0xff] %v1811_v8  ;;  %2300 = vperm.xlu0 %2477, %v2085_v15   ;;  %v1854_v8 = vperm.slane %v1668_v59, 3  ;;  %v1856_v15 = vperm.slane %v1668_v59, 5 }
 0x1a8   :  { %2087 = vst [vmem:[#allocation1 + $0x1] ss:$9 sm:$0xff] %v1812_v22 }
 0x1a9   :  { %2088 = vst [vmem:[#allocation1 + $0x2] ss:$9 sm:$0xff] %v1813_v44  ;;  %v1855_v44 = vperm.slane %v1668_v59, 4 }
 0x1aa   :  { %2089 = vst [vmem:[#allocation1 + $0x3] ss:$9 sm:$0xff] %v1814_v51  ;;  %v1857_v51 = vperm.slane %v1668_v59, 6  ;;  %v3571_v42 = vpop.xlane.xlu0 %1528 }
 0x1ab   :  { %2090 = vst [vmem:[#allocation1 + $0x4] ss:$9 sm:$0xff] %v1815_v62  ;;  %v1858_v62 = vperm.slane %v1668_v59, 7 }
 0x1ac   :  { %2091 = vst [vmem:[#allocation1 + $0x5] ss:$9 sm:$0xff] %v1816_v24  ;;  %v3566_v24 = vpop.xlane.xlu2 %1562 }
 0x1ad   :  { %2092 = vst [vmem:[#allocation1 + $0x6] ss:$9 sm:$0xff] %v1817_v30  ;;  %v3568_v30 = vpop.xlane.xlu1 %1494 }
 0x1ae   :  { %2093 = vst [vmem:[#allocation1 + $0x7] ss:$9 sm:$0xff] %v1818_v32  ;;  %v1669_v32 = vadd.f32 %v3465_v9, %v1427_v54 }
 0x1b0   :  { %v1859_v18 = vperm.slane %v1669_v32, 0  ;;  %v1866_v43 = vperm.slane %v1669_v32, 7 }
 0x1b2   :  { %v3577_v34 = vpop.xlane.xlu0 %1579 }
 0x1b5   :  { %v2094_v33 = vld [vmem:[#allocation1] sm:$0xff] }
 0x1b6   :  { %2095 = vst [vmem:[#allocation1] ss:$9 sm:$0xff] %v1819_v29  ;;  %2303 = vperm.xlu2 %2476, %v2094_v33   ;;  %v1860_v29 = vperm.slane %v1669_v32, 1 }
 0x1b7   :  { %2096 = vst [vmem:[#allocation1 + $0x1] ss:$9 sm:$0xff] %v1820_v17  ;;  %v1861_v17 = vperm.slane %v1669_v32, 2 }
 0x1b8   :  { %2097 = vst [vmem:[#allocation1 + $0x2] ss:$9 sm:$0xff] %v1821_v56  ;;  %v3573_v56 = vpop.xlane.xlu2 %1613 }
 0x1b9   :  { %2098 = vst [vmem:[#allocation1 + $0x3] ss:$9 sm:$0xff] %v1822_v41  ;;  %v1862_v41 = vperm.slane %v1669_v32, 3 }
 0x1ba   :  { %2099 = vst [vmem:[#allocation1 + $0x4] ss:$9 sm:$0xff] %v1823_v52  ;;  %v3575_v52 = vpop.xlane.xlu1 %1545 }
 0x1bb   :  { %2100 = vst [vmem:[#allocation1 + $0x5] ss:$9 sm:$0xff] %v1824_v55  ;;  %v1863_v55 = vperm.slane %v1669_v32, 4 }
 0x1bc   :  { %2101 = vst [vmem:[#allocation1 + $0x6] ss:$9 sm:$0xff] %v1825_v10  ;;  %v1864_v10 = vperm.slane %v1669_v32, 5 }
 0x1bd   :  { %2102 = vst [vmem:[#allocation1 + $0x7] ss:$9 sm:$0xff] %v1826_v26  ;;  %v1865_v26 = vperm.slane %v1669_v32, 6 }
 0x1c4   :  { %v2103_v16 = vld [vmem:[#allocation1] sm:$0xff] }
 0x1c5   :  { %2104 = vst [vmem:[#allocation1] ss:$9 sm:$0xff] %v1827_v25  ;;  %2306 = vperm.xlu1 %2478, %v2103_v16   ;;  %v1670_v25 = vadd.f32 %v3465_v9, %v1444_v46 }
 0x1c6   :  { %2105 = vst [vmem:[#allocation1 + $0x1] ss:$9 sm:$0xff] %v1828_v53  ;;  %v2268_v53 = vpop.permute.xlu2 %2267 }
 0x1c7   :  { %2106 = vst [vmem:[#allocation1 + $0x2] ss:$9 sm:$0xff] %v1829_v35  ;;  %v3580_v35 = vpop.xlane.xlu1 %1596  ;;  %v1868_v16 = vperm.slane %v1670_v25, 1  ;;  %v1871_v57 = vperm.slane %v1670_v25, 4 }
 0x1c8   :  { %2107 = vst [vmem:[#allocation1 + $0x3] ss:$9 sm:$0xff] %v1830_v28  ;;  %v1867_v28 = vperm.slane %v1670_v25, 0 }
 0x1c9   :  { %2108 = vst [vmem:[#allocation1 + $0x4] ss:$9 sm:$0xff] %v1831_v50  ;;  %v3582_v50 = vpop.xlane.xlu0 %1630 }
 0x1ca   :  { %2109 = vst [vmem:[#allocation1 + $0x5] ss:$9 sm:$0xff] %v1832_v27  ;;  %v1869_v27 = vperm.slane %v1670_v25, 2 }
 0x1cb   :  { %2110 = vst [vmem:[#allocation1 + $0x6] ss:$9 sm:$0xff] %v1833_v39 }
 0x1cc   :  { %2111 = vst [vmem:[#allocation1 + $0x7] ss:$9 sm:$0xff] %v1834_v23  ;;  %v1870_v23 = vperm.slane %v1670_v25, 3 }
 0x1d3   :  { %v2112_v11 = vld [vmem:[#allocation1] sm:$0xff] }
 0x1d4   :  { %2113 = vst [vmem:[#allocation1] ss:$9 sm:$0xff] %v1835_v36  ;;  %2309 = vperm.xlu0 %2477, %v2112_v11   ;;  %v1872_v36 = vperm.slane %v1670_v25, 5  ;;  %v3584_v11 = vpop.xlane.xlu1 %1647 }
 0x1d5   :  { %2114 = vst [vmem:[#allocation1 + $0x1] ss:$9 sm:$0xff] %v1836_v63  ;;  %v1873_v63 = vperm.slane %v1670_v25, 6 }
 0x1d6   :  { %2115 = vst [vmem:[#allocation1 + $0x2] ss:$9 sm:$0xff] %v1837_v45  ;;  %v2277_v45 = vpop.permute.xlu2 %2276 }
 0x1d7   :  { %2116 = vst [vmem:[#allocation1 + $0x3] ss:$9 sm:$0xff] %v1838_v47  ;;  %v1874_v47 = vperm.slane %v1670_v25, 7  ;;  %v1673_v25 = vadd.f32 %v3465_v9, %v3568_v30  ;;  %v1674_v30 = vadd.f32 %v3465_v9, %v3562_v5  ;;  %v1675_v5 = vadd.f32 %v3465_v9, %v3571_v42 }
 0x1d8   :  { %2117 = vst [vmem:[#allocation1 + $0x4] ss:$9 sm:$0xff] %v1839_v19  ;;  %v3587_v19 = vand.u32 127, %v2362_v38  ;;  %v1676_v42 = vadd.f32 %v3465_v9, %v3575_v52  ;;  %v1677_v52 = vadd.f32 %v3465_v9, %v3566_v24  ;;  %v1678_v24 = vadd.f32 %v3465_v9, %v3577_v34 }
 0x1d9   :  { %2118 = vst [vmem:[#allocation1 + $0x5] ss:$9 sm:$0xff] %v1840_v6  ;;  %v1679_v34 = vadd.f32 %v3465_v9, %v3580_v35  ;;  %v1680_v35 = vadd.f32 %v3465_v9, %v3573_v56  ;;  %v1681_v56 = vadd.f32 %v3465_v9, %v3582_v50  ;;  %v1682_v50 = vadd.f32 %v3465_v9, %v3584_v11 }
 0x1da   :  { %2119 = vst [vmem:[#allocation1 + $0x6] ss:$9 sm:$0xff] %v1841_v31  ;;  %v3590_v6 = vadd.s32 4294967288, %v3587_v19  ;;  %v1671_v31 = vadd.f32 %v3465_v9, %v3559_v4  ;;  %v3595_v13 = vadd.s32 4294967280, %v3587_v19  ;;  %v3598_v1 = vadd.s32 4294967272, %v3587_v19 }
 0x1db   :  { %2120 = vst [vmem:[#allocation1 + $0x7] ss:$9 sm:$0xff] %v1842_v40  ;;  %v2271_v40 = vpop.permute.xlu0 %2270 }
 0x1dc   :  { %v2366_v2 = vperm.slane %v2271_v40, %v3590_v6  ;;  %v1879_v46 = vperm.slane %v1671_v31, 4  ;;  %v1901_v40 = vperm.slane %v1674_v30, 2 }
 0x1de   :  { %v2280_v4 = vpop.permute.xlu2 %2279 }
 0x1e2   :  { %v2121_v12 = vld [vmem:[#allocation1] sm:$0xff] }
 0x1e3   :  { %2122 = vst [vmem:[#allocation1] ss:$9 sm:$0xff] %v1843_v3  ;;  %2312 = vperm.xlu2 %2476, %v2121_v12   ;;  %v2274_v3 = vpop.permute.xlu1 %2273  ;;  %v1876_v12 = vperm.slane %v1671_v31, 1 }
 0x1e4   :  { %2123 = vst [vmem:[#allocation1 + $0x1] ss:$9 sm:$0xff] %v1844_v7  ;;  %v1875_v7 = vperm.slane %v1671_v31, 0 }
 0x1e5   :  { %2124 = vst [vmem:[#allocation1 + $0x2] ss:$9 sm:$0xff] %v1845_v20  ;;  %v3602_v20 = vadd.s32 4294967264, %v3587_v19 }
 0x1e6   :  { %2125 = vst [vmem:[#allocation1 + $0x3] ss:$9 sm:$0xff] %v1846_v58  ;;  %v2364_v58 = vperm.slane %v2268_v53, %v3587_v19  ;;  %v2286_v11 = vpop.permute.xlu2 %2285 }
 0x1e7   :  { %2126 = vst [vmem:[#allocation1 + $0x4] ss:$9 sm:$0xff] %v1847_v61  ;;  %v1877_v61 = vperm.slane %v1671_v31, 2 }
 0x1e8   :  { %2127 = vst [vmem:[#allocation1 + $0x5] ss:$9 sm:$0xff] %v1848_v48  ;;  %v2370_v48 = vperm.slane %v2274_v3, %v3595_v13  ;;  %v2368_v59 = vsel %vm2367_vm0, %v2366_v2, %v2364_v58  ;;  %v1902_v2 = vperm.slane %v1674_v30, 3  ;;  %v1905_v58 = vperm.slane %v1674_v30, 6 }
 0x1e9   :  { %2128 = vst [vmem:[#allocation1 + $0x6] ss:$9 sm:$0xff] %v1849_v37  ;;  %v1878_v37 = vperm.slane %v1671_v31, 3 }
 0x1ea   :  { %2129 = vst [vmem:[#allocation1 + $0x7] ss:$9 sm:$0xff] %v1850_v21  ;;  %v2374_v21 = vperm.slane %v2277_v45, %v3598_v1  ;;  %v1898_v45 = vperm.slane %v1673_v25, 7 }
 0x1f1   :  { %v2130_v22 = vld [vmem:[#allocation1] sm:$0xff] }
 0x1f2   :  { %2131 = vst [vmem:[#allocation1] ss:$9 sm:$0xff] %v1851_v14  ;;  %2315 = vperm.xlu1 %2478, %v2130_v22   ;;  %v2378_v14 = vperm.slane %v2280_v4, %v3602_v20  ;;  %v1881_v22 = vperm.slane %v1671_v31, 6  ;;  %v1906_v4 = vperm.slane %v1674_v30, 7 }
 0x1f3   :  { %2132 = vst [vmem:[#allocation1 + $0x1] ss:$9 sm:$0xff] %v1852_v60  ;;  %v2372_v60 = vsel %vm2371_vm1, %v2370_v48, %v2368_v59  ;;  %v1908_v48 = vperm.slane %v1675_v5, 1  ;;  %v1911_v59 = vperm.slane %v1675_v5, 4 }
 0x1f4   :  { %2133 = vst [vmem:[#allocation1 + $0x2] ss:$9 sm:$0xff] %v1853_v0  ;;  %v1880_v0 = vperm.slane %v1671_v31, 5 }
 0x1f5   :  { %2134 = vst [vmem:[#allocation1 + $0x3] ss:$9 sm:$0xff] %v1854_v8  ;;  %v2376_v8 = vsel %vm2375_vm2, %v2374_v21, %v2372_v60  ;;  %v1910_v21 = vperm.slane %v1675_v5, 3  ;;  %v1914_v60 = vperm.slane %v1675_v5, 7 }
 0x1f6   :  { %2135 = vst [vmem:[#allocation1 + $0x4] ss:$9 sm:$0xff] %v1855_v44  ;;  %v2380_v44 = vsel %vm2379_vm3, %v2378_v14, %v2376_v8  ;;  %v1913_v14 = vperm.slane %v1675_v5, 6  ;;  %v1916_v8 = vperm.slane %v1676_v42, 1 }
 0x1f7   :  { %2136 = vst [vmem:[#allocation1 + $0x5] ss:$9 sm:$0xff] %v1856_v15  ;;  %v1882_v15 = vperm.slane %v1671_v31, 7  ;;  %v1900_v31 = vperm.slane %v1674_v30, 1 }
 0x1f8   :  { %2137 = vst [vmem:[#allocation1 + $0x6] ss:$9 sm:$0xff] %v1857_v51  ;;  %v1672_v51 = vadd.f32 %v3465_v9, %v3564_v49 }
 0x1f9   :  { %2138 = vst [vmem:[#allocation1 + $0x7] ss:$9 sm:$0xff] %v1858_v62 }
 0x1fa   :  { %v1883_v62 = vperm.slane %v1672_v51, 0  ;;  %v1884_v32 = vperm.slane %v1672_v51, 1 }
 0x200   :  { %v2139_v33 = vld [vmem:[#allocation1] sm:$0xff] }
 0x201   :  { %2140 = vst [vmem:[#allocation1] ss:$9 sm:$0xff] %v1859_v18  ;;  %2318 = vperm.xlu0 %2477, %v2139_v33   ;;  %v1885_v18 = vperm.slane %v1672_v51, 2  ;;  %v1887_v33 = vperm.slane %v1672_v51, 4 }
 0x202   :  { %2141 = vst [vmem:[#allocation1 + $0x1] ss:$9 sm:$0xff] %v1860_v29 }
 0x203   :  { %2142 = vst [vmem:[#allocation1 + $0x2] ss:$9 sm:$0xff] %v1861_v17  ;;  %v1886_v17 = vperm.slane %v1672_v51, 3 }
 0x204   :  { %2143 = vst [vmem:[#allocation1 + $0x3] ss:$9 sm:$0xff] %v1862_v41  ;;  %v1888_v41 = vperm.slane %v1672_v51, 5 }
 0x205   :  { %2144 = vst [vmem:[#allocation1 + $0x4] ss:$9 sm:$0xff] %v1863_v55  ;;  %v1889_v55 = vperm.slane %v1672_v51, 6 }
 0x206   :  { %2145 = vst [vmem:[#allocation1 + $0x5] ss:$9 sm:$0xff] %v1864_v10  ;;  %v1890_v10 = vperm.slane %v1672_v51, 7  ;;  %v1919_v51 = vperm.slane %v1676_v42, 4 }
 0x207   :  { %2146 = vst [vmem:[#allocation1 + $0x6] ss:$9 sm:$0xff] %v1865_v26  ;;  %v3615_v26 = vadd.s32 4294967256, %v3587_v19 }
 0x208   :  { %2147 = vst [vmem:[#allocation1 + $0x7] ss:$9 sm:$0xff] %v1866_v43  ;;  %v2283_v43 = vpop.permute.xlu1 %2282 }
 0x209   :  { %v2382_v49 = vperm.slane %v2283_v43, %v3615_v26  ;;  %v1928_v43 = vperm.slane %v1677_v52, 5 }
 0x20b   :  { %v3621_v53 = vsel %vm2383_vm4, %v2382_v49, %v2380_v44  ;;  %v1929_v49 = vperm.slane %v1677_v52, 6 }
 0x20f   :  { %v2148_v39 = vld [vmem:[#allocation1] sm:$0xff] }
 0x210   :  { %2149 = vst [vmem:[#allocation1] ss:$9 sm:$0xff] %v1867_v28  ;;  %2321 = vperm.xlu2 %2476, %v2148_v39   ;;  %v1891_v28 = vperm.slane %v1673_v25, 0 }
 0x211   :  { %2150 = vst [vmem:[#allocation1 + $0x1] ss:$9 sm:$0xff] %v1868_v16  ;;  %v1892_v16 = vperm.slane %v1673_v25, 1 }
 0x212   :  { %2151 = vst [vmem:[#allocation1 + $0x2] ss:$9 sm:$0xff] %v1869_v27  ;;  %v1893_v27 = vperm.slane %v1673_v25, 2 }
 0x213   :  { %2152 = vst [vmem:[#allocation1 + $0x3] ss:$9 sm:$0xff] %v1870_v23  ;;  %v1894_v23 = vperm.slane %v1673_v25, 3 }
 0x214   :  { %2153 = vst [vmem:[#allocation1 + $0x4] ss:$9 sm:$0xff] %v1871_v57  ;;  %v1895_v57 = vperm.slane %v1673_v25, 4 }
 0x215   :  { %2154 = vst [vmem:[#allocation1 + $0x5] ss:$9 sm:$0xff] %v1872_v36  ;;  %v1896_v36 = vperm.slane %v1673_v25, 5 }
 0x216   :  { %2155 = vst [vmem:[#allocation1 + $0x6] ss:$9 sm:$0xff] %v1873_v63  ;;  %v1897_v63 = vperm.slane %v1673_v25, 6  ;;  %v1930_v25 = vperm.slane %v1677_v52, 7 }
 0x217   :  { %2156 = vst [vmem:[#allocation1 + $0x7] ss:$9 sm:$0xff] %v1874_v47  ;;  %v1899_v47 = vperm.slane %v1674_v30, 0 }
 0x21e   :  { %v2157_v54 = vld [vmem:[#allocation1] sm:$0xff] }
 0x21f   :  { %2158 = vst [vmem:[#allocation1] ss:$9 sm:$0xff] %v1875_v7  ;;  %2324 = vperm.xlu1 %2478, %v2157_v54   ;;  %v1903_v7 = vperm.slane %v1674_v30, 4 }
 0x220   :  { %2159 = vst [vmem:[#allocation1 + $0x1] ss:$9 sm:$0xff] %v1876_v12  ;;  %v1904_v12 = vperm.slane %v1674_v30, 5  ;;  %v1939_v30 = vperm.slane %v1679_v34, 0 }
 0x221   :  { %2160 = vst [vmem:[#allocation1 + $0x2] ss:$9 sm:$0xff] %v1877_v61  ;;  %v1907_v61 = vperm.slane %v1675_v5, 0 }
 0x222   :  { %2161 = vst [vmem:[#allocation1 + $0x3] ss:$9 sm:$0xff] %v1878_v37  ;;  %v1909_v37 = vperm.slane %v1675_v5, 2 }
 0x223   :  { %2162 = vst [vmem:[#allocation1 + $0x4] ss:$9 sm:$0xff] %v1879_v46  ;;  %v1912_v46 = vperm.slane %v1675_v5, 5  ;;  %v1948_v5 = vperm.slane %v1680_v35, 1 }
 0x224   :  { %2163 = vst [vmem:[#allocation1 + $0x5] ss:$9 sm:$0xff] %v1880_v0  ;;  %v1915_v0 = vperm.slane %v1676_v42, 0 }
 0x225   :  { %2164 = vst [vmem:[#allocation1 + $0x6] ss:$9 sm:$0xff] %v1881_v22  ;;  %v1917_v22 = vperm.slane %v1676_v42, 2 }
 0x226   :  { %2165 = vst [vmem:[#allocation1 + $0x7] ss:$9 sm:$0xff] %v1882_v15  ;;  %v1918_v15 = vperm.slane %v1676_v42, 3 }
 0x22d   :  { %v2166_v29 = vld [vmem:[#allocation1] sm:$0xff] }
 0x22e   :  { %2167 = vst [vmem:[#allocation1] ss:$9 sm:$0xff] %v1883_v62  ;;  %2327 = vperm.xlu0 %2477, %v2166_v29   ;;  %v1920_v62 = vperm.slane %v1676_v42, 5  ;;  %v1923_v29 = vperm.slane %v1677_v52, 0 }
 0x22f   :  { %2168 = vst [vmem:[#allocation1 + $0x1] ss:$9 sm:$0xff] %v1884_v32  ;;  %v1921_v32 = vperm.slane %v1676_v42, 6 }
 0x230   :  { %2169 = vst [vmem:[#allocation1 + $0x2] ss:$9 sm:$0xff] %v1885_v18  ;;  %v1922_v18 = vperm.slane %v1676_v42, 7  ;;  %v1957_v42 = vperm.slane %v1681_v56, 2 }
 0x231   :  { %2170 = vst [vmem:[#allocation1 + $0x3] ss:$9 sm:$0xff] %v1886_v17  ;;  %v1924_v17 = vperm.slane %v1677_v52, 1 }
 0x232   :  { %2171 = vst [vmem:[#allocation1 + $0x4] ss:$9 sm:$0xff] %v1887_v33  ;;  %v1925_v33 = vperm.slane %v1677_v52, 2 }
 0x233   :  { %2172 = vst [vmem:[#allocation1 + $0x5] ss:$9 sm:$0xff] %v1888_v41  ;;  %v1926_v41 = vperm.slane %v1677_v52, 3 }
 0x234   :  { %2173 = vst [vmem:[#allocation1 + $0x6] ss:$9 sm:$0xff] %v1889_v55 }
 0x235   :  { %2174 = vst [vmem:[#allocation1 + $0x7] ss:$9 sm:$0xff] %v1890_v10  ;;  %v1927_v10 = vperm.slane %v1677_v52, 4  ;;  %v1966_v52 = vperm.slane %v1682_v50, 3 }
 0x23c   :  { %v2175_v39 = vld [vmem:[#allocation1] sm:$0xff] }
 0x23d   :  { %2176 = vst [vmem:[#allocation1] ss:$9 sm:$0xff] %v1891_v28  ;;  %2330 = vperm.xlu2 %2476, %v2175_v39   ;;  %v1931_v28 = vperm.slane %v1678_v24, 0  ;;  %v1934_v39 = vperm.slane %v1678_v24, 3 }
 0x23e   :  { %2177 = vst [vmem:[#allocation1 + $0x1] ss:$9 sm:$0xff] %v1892_v16  ;;  %v1932_v16 = vperm.slane %v1678_v24, 1 }
 0x23f   :  { %2178 = vst [vmem:[#allocation1 + $0x2] ss:$9 sm:$0xff] %v1893_v27  ;;  %v1933_v27 = vperm.slane %v1678_v24, 2 }
 0x240   :  { %2179 = vst [vmem:[#allocation1 + $0x3] ss:$9 sm:$0xff] %v1894_v23 }
 0x241   :  { %2180 = vst [vmem:[#allocation1 + $0x4] ss:$9 sm:$0xff] %v1895_v57  ;;  %v1935_v57 = vperm.slane %v1678_v24, 4 }
 0x242   :  { %2181 = vst [vmem:[#allocation1 + $0x5] ss:$9 sm:$0xff] %v1896_v36  ;;  %v1936_v36 = vperm.slane %v1678_v24, 5 }
 0x243   :  { %2182 = vst [vmem:[#allocation1 + $0x6] ss:$9 sm:$0xff] %v1897_v63  ;;  %v1937_v63 = vperm.slane %v1678_v24, 6 }
 0x244   :  { %2183 = vst [vmem:[#allocation1 + $0x7] ss:$9 sm:$0xff] %v1898_v45  ;;  %v1938_v45 = vperm.slane %v1678_v24, 7 }
 0x24b   :  { %v2184_v3 = vld [vmem:[#allocation1] sm:$0xff] }
 0x24c   :  { %2185 = vst [vmem:[#allocation1] ss:$9 sm:$0xff] %v1899_v47  ;;  %2333 = vperm.xlu1 %2478, %v2184_v3   ;;  %v1940_v47 = vperm.slane %v1679_v34, 1  ;;  %v1943_v3 = vperm.slane %v1679_v34, 4 }
 0x24d   :  { %2186 = vst [vmem:[#allocation1 + $0x1] ss:$9 sm:$0xff] %v1900_v31  ;;  %v1941_v31 = vperm.slane %v1679_v34, 2 }
 0x24e   :  { %2187 = vst [vmem:[#allocation1 + $0x2] ss:$9 sm:$0xff] %v1901_v40  ;;  %v1942_v40 = vperm.slane %v1679_v34, 3 }
 0x24f   :  { %2188 = vst [vmem:[#allocation1 + $0x3] ss:$9 sm:$0xff] %v1902_v2 }
 0x250   :  { %2189 = vst [vmem:[#allocation1 + $0x4] ss:$9 sm:$0xff] %v1903_v7  ;;  %v1944_v7 = vperm.slane %v1679_v34, 5 }
 0x251   :  { %2190 = vst [vmem:[#allocation1 + $0x5] ss:$9 sm:$0xff] %v1904_v12  ;;  %v1945_v12 = vperm.slane %v1679_v34, 6 }
 0x252   :  { %2191 = vst [vmem:[#allocation1 + $0x6] ss:$9 sm:$0xff] %v1905_v58  ;;  %v1946_v58 = vperm.slane %v1679_v34, 7 }
 0x253   :  { %2192 = vst [vmem:[#allocation1 + $0x7] ss:$9 sm:$0xff] %v1906_v4  ;;  %v1947_v4 = vperm.slane %v1680_v35, 0 }
 0x25a   :  { %v2193_v54 = vld [vmem:[#allocation1] sm:$0xff] }
 0x25b   :  { %2194 = vst [vmem:[#allocation1] ss:$9 sm:$0xff] %v1907_v61  ;;  %2336 = vperm.xlu0 %2477, %v2193_v54   ;;  %v1949_v61 = vperm.slane %v1680_v35, 2  ;;  %v1951_v54 = vperm.slane %v1680_v35, 4 }
 0x25c   :  { %2195 = vst [vmem:[#allocation1 + $0x1] ss:$9 sm:$0xff] %v1908_v48  ;;  %v1950_v48 = vperm.slane %v1680_v35, 3 }
 0x25d   :  { %2196 = vst [vmem:[#allocation1 + $0x2] ss:$9 sm:$0xff] %v1909_v37 }
 0x25e   :  { %2197 = vst [vmem:[#allocation1 + $0x3] ss:$9 sm:$0xff] %v1910_v21  ;;  %v1952_v21 = vperm.slane %v1680_v35, 5 }
 0x25f   :  { %2198 = vst [vmem:[#allocation1 + $0x4] ss:$9 sm:$0xff] %v1911_v59  ;;  %v1953_v59 = vperm.slane %v1680_v35, 6 }
 0x260   :  { %2199 = vst [vmem:[#allocation1 + $0x5] ss:$9 sm:$0xff] %v1912_v46  ;;  %v1954_v46 = vperm.slane %v1680_v35, 7  ;;  %v2385_v35 = vadd.s32 4294967248, %v3587_v19 }
 0x261   :  { %2200 = vst [vmem:[#allocation1 + $0x6] ss:$9 sm:$0xff] %v1913_v14  ;;  %v1955_v14 = vperm.slane %v1681_v56, 0 }
 0x262   :  { %2201 = vst [vmem:[#allocation1 + $0x7] ss:$9 sm:$0xff] %v1914_v60  ;;  %v1956_v60 = vperm.slane %v1681_v56, 1 }
 0x269   :  { %v2202_v44 = vld [vmem:[#allocation1] sm:$0xff] }
 0x26a   :  { %2203 = vst [vmem:[#allocation1] ss:$9 sm:$0xff] %v1915_v0  ;;  %2339 = vperm.xlu2 %2476, %v2202_v44   ;;  %v1958_v0 = vperm.slane %v1681_v56, 3  ;;  %v1960_v44 = vperm.slane %v1681_v56, 5 }
 0x26b   :  { %2204 = vst [vmem:[#allocation1 + $0x1] ss:$9 sm:$0xff] %v1916_v8 }
 0x26c   :  { %2205 = vst [vmem:[#allocation1 + $0x2] ss:$9 sm:$0xff] %v1917_v22  ;;  %v1959_v22 = vperm.slane %v1681_v56, 4 }
 0x26d   :  { %2206 = vst [vmem:[#allocation1 + $0x3] ss:$9 sm:$0xff] %v1918_v15  ;;  %v1961_v15 = vperm.slane %v1681_v56, 6 }
 0x26e   :  { %2207 = vst [vmem:[#allocation1 + $0x4] ss:$9 sm:$0xff] %v1919_v51  ;;  %v1962_v51 = vperm.slane %v1681_v56, 7 }
 0x26f   :  { %2208 = vst [vmem:[#allocation1 + $0x5] ss:$9 sm:$0xff] %v1920_v62  ;;  %v1963_v62 = vperm.slane %v1682_v50, 0 }
 0x270   :  { %2209 = vst [vmem:[#allocation1 + $0x6] ss:$9 sm:$0xff] %v1921_v32  ;;  %v1964_v32 = vperm.slane %v1682_v50, 1 }
 0x271   :  { %2210 = vst [vmem:[#allocation1 + $0x7] ss:$9 sm:$0xff] %v1922_v18  ;;  %v1965_v18 = vperm.slane %v1682_v50, 2 }
 0x278   :  { %v2211_v55 = vld [vmem:[#allocation1] sm:$0xff] }
 0x279   :  { %2212 = vst [vmem:[#allocation1] ss:$9 sm:$0xff] %v1923_v29  ;;  %2342 = vperm.xlu1 %2478, %v2211_v55   ;;  %v1970_v55 = vperm.slane %v1682_v50, 7 }
 0x27a   :  { %2213 = vst [vmem:[#allocation1 + $0x1] ss:$9 sm:$0xff] %v1924_v17  ;;  %v1967_v17 = vperm.slane %v1682_v50, 4 }
 0x27b   :  { %2214 = vst [vmem:[#allocation1 + $0x2] ss:$9 sm:$0xff] %v1925_v33  ;;  %v1968_v33 = vperm.slane %v1682_v50, 5 }
 0x27c   :  { %2215 = vst [vmem:[#allocation1 + $0x3] ss:$9 sm:$0xff] %v1926_v41  ;;  %v1969_v41 = vperm.slane %v1682_v50, 6 }
 0x27d   :  { %2216 = vst [vmem:[#allocation1 + $0x4] ss:$9 sm:$0xff] %v1927_v10  ;;  %v2289_v10 = vpop.permute.xlu1 %2288 }
 0x27e   :  { %2217 = vst [vmem:[#allocation1 + $0x5] ss:$9 sm:$0xff] %v1928_v43  ;;  %v2292_v43 = vpop.permute.xlu0 %2291 }
 0x27f   :  { %2218 = vst [vmem:[#allocation1 + $0x6] ss:$9 sm:$0xff] %v1929_v49  ;;  %v3641_v49 = vpop.permute.xlu2 %2294 }
 0x280   :  { %2219 = vst [vmem:[#allocation1 + $0x7] ss:$9 sm:$0xff] %v1930_v25 }
 0x285   :  { %v3643_v25 = vpop.permute.xlu1 %2297 }
 0x286   :  { %v3645_v24 = vpop.permute.xlu0 %2300 }
 0x287   :  { %v2220_v23 = vld [vmem:[#allocation1] sm:$0xff] }
 0x288   :  { %2345 = vperm.xlu0 %2477, %v2220_v23   ;;  %2221 = vst [vmem:[#allocation1] ss:$9 sm:$0xff] %v1931_v28  ;;  %v3647_v28 = vpop.permute.xlu2 %2303 }
 0x289   :  { %2222 = vst [vmem:[#allocation1 + $0x1] ss:$9 sm:$0xff] %v1932_v16 }
 0x28a   :  { %2223 = vst [vmem:[#allocation1 + $0x2] ss:$9 sm:$0xff] %v1933_v27 }
 0x28b   :  { %2224 = vst [vmem:[#allocation1 + $0x3] ss:$9 sm:$0xff] %v1934_v39 }
 0x28c   :  { %2225 = vst [vmem:[#allocation1 + $0x4] ss:$9 sm:$0xff] %v1935_v57 }
 0x28d   :  { %2226 = vst [vmem:[#allocation1 + $0x5] ss:$9 sm:$0xff] %v1936_v36  ;;  %v3649_v16 = vpop.permute.xlu1 %2306 }
 0x28e   :  { %2227 = vst [vmem:[#allocation1 + $0x6] ss:$9 sm:$0xff] %v1937_v63  ;;  %v3651_v27 = vpop.permute.xlu0 %2309 }
 0x28f   :  { %2228 = vst [vmem:[#allocation1 + $0x7] ss:$9 sm:$0xff] %v1938_v45 }
 0x290   :  { %v3653_v39 = vpop.permute.xlu2 %2312 }
 0x295   :  { %v2316_v23 = vpop.permute.xlu1 %2315 }
 0x296   :  { %v2229_v2 = vld [vmem:[#allocation1] sm:$0xff]  ;;  %v2319_v57 = vpop.permute.xlu0 %2318 }
 0x297   :  { %2348 = vperm.xlu2 %2476, %v2229_v2   ;;  %2230 = vst [vmem:[#allocation1] ss:$9 sm:$0xff] %v1939_v30  ;;  %v2426_v30 = vperm.slane %v2319_v57, %v3590_v6 }
 0x298   :  { %2231 = vst [vmem:[#allocation1 + $0x1] ss:$9 sm:$0xff] %v1940_v47  ;;  %v2322_v36 = vpop.permute.xlu2 %2321 }
 0x299   :  { %2232 = vst [vmem:[#allocation1 + $0x2] ss:$9 sm:$0xff] %v1941_v31 }
 0x29a   :  { %2233 = vst [vmem:[#allocation1 + $0x3] ss:$9 sm:$0xff] %v1942_v40  ;;  %v2425_v40 = vperm.slane %v2316_v23, %v3587_v19 }
 0x29b   :  { %2234 = vst [vmem:[#allocation1 + $0x4] ss:$9 sm:$0xff] %v1943_v3 }
 0x29c   :  { %2235 = vst [vmem:[#allocation1 + $0x5] ss:$9 sm:$0xff] %v1944_v7  ;;  %v2427_v2 = vsel %vm2367_vm0, %v2426_v30, %v2425_v40  ;;  %v2428_v7 = vperm.slane %v2322_v36, %v3595_v13  ;;  %vm2462_vm0 = vcmp.lt.s32.totalorder %v2362_v38, 256 }
 0x29d   :  { %2236 = vst [vmem:[#allocation1 + $0x6] ss:$9 sm:$0xff] %v1945_v12  ;;  %v2325_v63 = vpop.permute.xlu1 %2324 }
 0x29e   :  { %2237 = vst [vmem:[#allocation1 + $0x7] ss:$9 sm:$0xff] %v1946_v58  ;;  %v2430_v3 = vperm.slane %v2325_v63, %v3598_v1 }
 0x2a0   :  { %v2328_v45 = vpop.permute.xlu0 %2327  ;;  %v2331_v34 = vpop.permute.xlu2 %2330 }
 0x2a1   :  { %v2432_v12 = vperm.slane %v2328_v45, %v3602_v20  ;;  %v2434_v13 = vperm.slane %v2331_v34, %v3615_v26  ;;  %v2386_v20 = vperm.slane %v2286_v11, %v2385_v35 }
 0x2a3   :  { %v2388_v26 = vsel %vm2387_vm5, %v2386_v20, %v3621_v53 }
 0x2a5   :  { %v2238_v37 = vld [vmem:[#allocation1] sm:$0xff] }
 0x2a6   :  { %2351 = vperm.xlu1 %2478, %v2238_v37   ;;  %2239 = vst [vmem:[#allocation1] ss:$9 sm:$0xff] %v1947_v4  ;;  %v2429_v4 = vsel %vm2371_vm1, %v2428_v7, %v2427_v2 }
 0x2a7   :  { %2240 = vst [vmem:[#allocation1 + $0x1] ss:$9 sm:$0xff] %v1948_v5  ;;  %v2389_v5 = vadd.s32 4294967240, %v3587_v19  ;;  %v2431_v6 = vsel %vm2375_vm2, %v2430_v3, %v2429_v4 }
 0x2a8   :  { %2241 = vst [vmem:[#allocation1 + $0x2] ss:$9 sm:$0xff] %v1949_v61  ;;  %v2433_v37 = vsel %vm2379_vm3, %v2432_v12, %v2431_v6 }
 0x2a9   :  { %2242 = vst [vmem:[#allocation1 + $0x3] ss:$9 sm:$0xff] %v1950_v48  ;;  %v2393_v48 = vadd.s32 4294967232, %v3587_v19  ;;  %v2435_v56 = vsel %vm2383_vm4, %v2434_v13, %v2433_v37 }
 0x2aa   :  { %2243 = vst [vmem:[#allocation1 + $0x4] ss:$9 sm:$0xff] %v1951_v54 }
 0x2ab   :  { %2244 = vst [vmem:[#allocation1 + $0x5] ss:$9 sm:$0xff] %v1952_v21 }
 0x2ac   :  { %2245 = vst [vmem:[#allocation1 + $0x6] ss:$9 sm:$0xff] %v1953_v59  ;;  %v2397_v59 = vadd.s32 4294967224, %v3587_v19 }
 0x2ad   :  { %2246 = vst [vmem:[#allocation1 + $0x7] ss:$9 sm:$0xff] %v1954_v46  ;;  %v2390_v46 = vperm.slane %v2289_v10, %v2389_v5 }
 0x2ae   :  { %v2398_v50 = vperm.slane %v3641_v49, %v2397_v59 }
 0x2b4   :  { %v2247_v8 = vld [vmem:[#allocation1] sm:$0xff] }
 0x2b5   :  { %2354 = vperm.xlu0 %2477, %v2247_v8   ;;  %2248 = vst [vmem:[#allocation1] ss:$9 sm:$0xff] %v1955_v14  ;;  %v2394_v14 = vperm.slane %v2292_v43, %v2393_v48 }
 0x2b6   :  { %2249 = vst [vmem:[#allocation1 + $0x1] ss:$9 sm:$0xff] %v1956_v60  ;;  %v2401_v60 = vadd.s32 4294967216, %v3587_v19 }
 0x2b7   :  { %2250 = vst [vmem:[#allocation1 + $0x2] ss:$9 sm:$0xff] %v1957_v42 }
 0x2b8   :  { %2251 = vst [vmem:[#allocation1 + $0x3] ss:$9 sm:$0xff] %v1958_v0  ;;  %v2405_v0 = vadd.s32 4294967208, %v3587_v19 }
 0x2b9   :  { %2252 = vst [vmem:[#allocation1 + $0x4] ss:$9 sm:$0xff] %v1959_v22 }
 0x2ba   :  { %2253 = vst [vmem:[#allocation1 + $0x5] ss:$9 sm:$0xff] %v1960_v44 }
 0x2bb   :  { %2254 = vst [vmem:[#allocation1 + $0x6] ss:$9 sm:$0xff] %v1961_v15 }
 0x2bc   :  { %2255 = vst [vmem:[#allocation1 + $0x7] ss:$9 sm:$0xff] %v1962_v51 }
 0x2be   :  { %v2334_v47 = vpop.permute.xlu1 %2333 }
 0x2bf   :  { %v2436_v54 = vperm.slane %v2334_v47, %v2385_v35  ;;  %v2421_v47 = vadd.s32 4294967176, %v3587_v19 }
 0x2c1   :  { %v2437_v42 = vsel %vm2387_vm5, %v2436_v54, %v2435_v56  ;;  %v2422_v35 = vperm.slane %v3653_v39, %v2421_v47 }
 0x2c3   :  { %v2256_v29 = vld [vmem:[#allocation1] sm:$0xff] }
 0x2c4   :  { %2357 = vperm.xlu2 %2476, %v2256_v29   ;;  %2257 = vst [vmem:[#allocation1] ss:$9 sm:$0xff] %v1963_v62  ;;  %v2340_v58 = vpop.permute.xlu2 %2339  ;;  %v2392_v62 = vsel %vm2391_vm6, %v2390_v46, %v2388_v26  ;;  %v2402_v29 = vperm.slane %v3643_v25, %v2401_v60 }
 0x2c5   :  { %2258 = vst [vmem:[#allocation1 + $0x1] ss:$9 sm:$0xff] %v1964_v32  ;;  %v2440_v15 = vperm.slane %v2340_v58, %v2393_v48 }
 0x2c6   :  { %2259 = vst [vmem:[#allocation1 + $0x2] ss:$9 sm:$0xff] %v1965_v18  ;;  %v2396_v18 = vsel %vm2395_vm7, %v2394_v14, %v2392_v62 }
 0x2c7   :  { %2260 = vst [vmem:[#allocation1 + $0x3] ss:$9 sm:$0xff] %v1966_v52  ;;  %v2409_v52 = vadd.s32 4294967200, %v3587_v19  ;;  %v2400_v43 = vsel %vm2399_vm8, %v2398_v50, %v2396_v18 }
 0x2c8   :  { %2261 = vst [vmem:[#allocation1 + $0x4] ss:$9 sm:$0xff] %v1967_v17  ;;  %v2404_v57 = vsel %vm2403_vm9, %v2402_v29, %v2400_v43 }
 0x2c9   :  { %2262 = vst [vmem:[#allocation1 + $0x5] ss:$9 sm:$0xff] %v1968_v33 }
 0x2ca   :  { %2263 = vst [vmem:[#allocation1 + $0x6] ss:$9 sm:$0xff] %v1969_v41  ;;  %v2406_v41 = vperm.slane %v3645_v24, %v2405_v0  ;;  %v2410_v24 = vperm.slane %v3647_v28, %v2409_v52 }
 0x2cb   :  { %2264 = vst [vmem:[#allocation1 + $0x7] ss:$9 sm:$0xff] %v1970_v55  ;;  %v2413_v55 = vadd.s32 4294967192, %v3587_v19 }
 0x2cc   :  { %v2408_v36 = vsel %vm2407_vm10, %v2406_v41, %v2404_v57 }
 0x2cd   :  { %v2337_v31 = vpop.permute.xlu0 %2336  ;;  %v2414_v25 = vperm.slane %v3649_v16, %v2413_v55  ;;  %v2412_v40 = vsel %vm2411_vm11, %v2410_v24, %v2408_v36 }
 0x2ce   :  { %v2438_v21 = vperm.slane %v2337_v31, %v2389_v5 }
 0x2cf   :  { %v2416_v7 = vsel %vm2415_vm12, %v2414_v25, %v2412_v40 }
 0x2d0   :  { %v2439_v8 = vsel %vm2391_vm6, %v2438_v21, %v2437_v42 }
 0x2d1   :  { %v2441_v17 = vsel %vm2395_vm7, %v2440_v15, %v2439_v8 }
 0x2d2   :  { %v2265_v9 = vld [vmem:[#allocation1] sm:$0xff] }
 0x2d3   :  { %2360 = vperm.xlu1 %2478, %v2265_v9   ;;  %v2417_v9 = vadd.s32 4294967184, %v3587_v19 }
 0x2d5   :  { %v2418_v34 = vperm.slane %v3651_v27, %v2417_v9 }
 0x2d7   :  { %v2420_v58 = vsel %vm2419_vm13, %v2418_v34, %v2416_v7 }
 0x2d8   :  { %v2424_v4 = vsel %vm2423_vm14, %v2422_v35, %v2420_v58 }
 0x2eb   :  { %v2343_v61 = vpop.permute.xlu1 %2342 }
 0x2ec   :  { %v2442_v44 = vperm.slane %v2343_v61, %v2397_v59 }
 0x2ee   :  { %v2443_v53 = vsel %vm2399_vm8, %v2442_v44, %v2441_v17 }
 0x2f1   :  { %v2349_v22 = vpop.permute.xlu2 %2348 }
 0x2f2   :  { %v2446_v49 = vperm.slane %v2349_v22, %v2405_v0 }
 0x2fa   :  { %v2346_v1 = vpop.permute.xlu0 %2345 }
 0x2fb   :  { %v2444_v51 = vperm.slane %v2346_v1, %v2401_v60 }
 0x2fd   :  { %v2445_v11 = vsel %vm2403_vm9, %v2444_v51, %v2443_v53 }
 0x2fe   :  { %v2447_v45 = vsel %vm2407_vm10, %v2446_v49, %v2445_v11 }
 0x318   :  { %v2352_v32 = vpop.permute.xlu1 %2351 }
 0x319   :  { %v2448_v10 = vperm.slane %v2352_v32, %v2409_v52 }
 0x31b   :  { %v2449_v30 = vsel %vm2411_vm11, %v2448_v10, %v2447_v45 }
 0x31e   :  { %v2358_v63 = vpop.permute.xlu2 %2357 }
 0x31f   :  { %v2452_v2 = vperm.slane %v2358_v63, %v2417_v9 }
 0x327   :  { %v2355_v33 = vpop.permute.xlu0 %2354 }
 0x328   :  { %v2450_v23 = vperm.slane %v2355_v33, %v2413_v55 }
 0x32a   :  { %v2451_v31 = vsel %vm2415_vm12, %v2450_v23, %v2449_v30 }
 0x32b   :  { %v2453_v16 = vsel %vm2419_vm13, %v2452_v2, %v2451_v31 }
 0x345   :  { %v2361_v3 = vpop.permute.xlu1 %2360 }
 0x346   :  { %v2454_v12 = vperm.slane %v2361_v3, %v2421_v47 }
 0x348   :  { %v2455_v28 = vsel %vm2423_vm14, %v2454_v12, %v2453_v16 }
 0x349   :  { %v2456_v27 = vrot.slane %v2455_v28, 7 }
 0x34b   :  { %v2458_v5 = vsel %vm2457_vm15, %v2424_v4, %v2456_v27 }
 0x34c   :  { %2464 = vst.msk [vmem:[%s3691_s3] sm:$0x3] %vm2462_vm0, %v2458_v5 }
 0x34d   :  { %2469 = vsyncpa [#allocation4], 1 }
 0x34e   :  { %2470 = vsyncpa [#allocation6], 1 }

</bundles_post_ra>
